<compile_context>
chip_gen: v7x
topology: tpu7x:2x2x1
jax: 0.10.0
libtpu: 0.0.40
codegen_flags: <defaults>
</compile_context>

<pallas_src>
import functools

import jax
import jax.numpy as jnp
from jax.experimental import pallas as pl
from jax.experimental.pallas import tpu as pltpu


_TAP_OFFSETS = tuple((dy, dx) for dy in (-1, 0, 1) for dx in (-1, 0, 1))


def _round_up(x, m):
    return -(-x // m) * m


# ----------------------------------------------------------------------------
# In-kernel helpers (channels-first, spatially flattened: [C, H*W])
# ----------------------------------------------------------------------------
def _tap_masks(H, W):
    """Border masks for the 9 conv taps, each [1, H*W] f32 (None == all-ones).

    Computed in-kernel from a lane iota (no mask tensor DMA'd from HBM); uses
    only compares / bitwise ops (W must be a power of two here).
    """
    HW = H * W
    pos = jax.lax.broadcasted_iota(jnp.int32, (1, HW), 1)
    col = pos & (W - 1)                                  # W is a power of two
    masks = []
    for dy, dx in _TAP_OFFSETS:
        if dy == 0 and dx == 0:
            masks.append(None)
            continue
        ok = None
        if dy < 0:
            ok = pos >= W                                # row above exists
        if dy > 0:
            ok = pos < HW - W                            # row below exists
        if dx < 0:
            ok = (col >= 1) if ok is None else ok & (col >= 1)
        if dx > 0:
            ok = (col < W - 1) if ok is None else ok & (col < W - 1)
        masks.append(jnp.where(ok, 1.0, 0.0))
    return masks


def _conv3x3(x, wt, b, masks, W):
    """3x3 'same' convolution as a single im2col MXU matmul.

    x     : [Cp, HW]     activation (channels on sublanes, pixels on lanes)
    wt    : [Cop, 9*Cp]  weights; contraction rows ordered (tap, cin); padded
                         cin/cout rows/cols are zero
    b     : [Cop, 1]
    masks : list of 9 [1, HW] border masks (None == all-ones)
    """
    hw = x.shape[-1]
    taps = []
    for (dy, dx), m in zip(_TAP_OFFSETS, masks):
        s = dy * W + dx                       # want tap[:, p] = x[:, p + s]
        # pltpu.roll follows jnp.roll: roll(x, r)[:, p] = x[:, (p - r) % hw],
        # so r = (-s) % hw; the border mask zeroes the wrapped lanes.
        t = x if s == 0 else pltpu.roll(x, (-s) % hw, axis=1)
        if m is not None:
            t = t * m
        taps.append(t)
    patches = jnp.concatenate(taps, axis=0)   # [9*Cp, HW], 8-row aligned groups
    return jnp.dot(wt, patches, preferred_element_type=jnp.float32) + b


# ----------------------------------------------------------------------------
# Single fused kernel: all 4 refinement iterations for one image
# ----------------------------------------------------------------------------
def _dehaze_kernel(x_ref,
                   w1at_ref, b1at_ref, w2at_ref, b2at_ref,
                   w1j_ref, b1j_ref, w2j_ref, b2j_ref,
                   out_ref, *, H, W, t_clamp):
    HW = H * W
    masks = _tap_masks(H, W)                                   # built once
    cpad = w1at_ref.shape[2] // 9                              # padded Cin (16)

    I = x_ref[0].astype(jnp.float32)                           # [3, HW]
    # Iteration-1 input: extra channels are zero and so are their weight rows.
    x = jnp.concatenate([I, jnp.zeros((cpad - 3, HW), jnp.float32)], axis=0)

    chunks = []
    for k in range(4):
        # -- stacked A-net + t-net (shared input, block-diagonal 2nd layer) --
        h = jnp.maximum(_conv3x3(x, w1at_ref[k], b1at_ref[k], masks, W), 0.0)
        o = jax.nn.sigmoid(_conv3x3(h, w2at_ref[k], b2at_ref[k], masks, W))
        A, t = o[0:3], o[3:6]                                  # [3, HW] each

        # -- dehaze formula; division via approximate EUP reciprocal --
        Jf = (I - A) * pl.reciprocal(jnp.maximum(t, t_clamp), approx=True) + A

        if k == 0:
            J = Jf                                             # iter 1: no J-net
        else:
            xj = jnp.concatenate(
                [I, o[0:6], Jf, jnp.zeros((cpad - 12, HW), jnp.float32)], axis=0)
            hj = jnp.maximum(
                _conv3x3(xj, w1j_ref[k - 1], b1j_ref[k - 1], masks, W), 0.0)
            J = jax.nn.sigmoid(
                _conv3x3(hj, w2j_ref[k - 1], b2j_ref[k - 1], masks, W))[0:3]

        chunks.append(jnp.concatenate([o[0:6], J], axis=0))    # [9, HW] = A,t,J

        if k < 3:
            # Next iteration's input cat(I, A, t, J) (torch .detach() is an
            # identity in the forward pass); padded channels are zero.
            x = jnp.concatenate(
                [I, o[0:6], J, jnp.zeros((cpad - 12, HW), jnp.float32)], axis=0)

    # One lane-dense [36, HW] writeback instead of twelve 3-sublane stores.
    out_ref[0] = jnp.concatenate(chunks, axis=0).astype(out_ref.dtype)


# ----------------------------------------------------------------------------
# Weight preparation (wrapper side, traced once under jit)
# ----------------------------------------------------------------------------
def _matmul_form(w, b, cin_pad, cout_pad):
    """[3,3,Cin,Cout] -> ([Cout_pad, 9*Cin_pad], [Cout_pad, 1]); zero padded,
    contraction rows ordered (tap, cin)."""
    kh, kw, cin, cout = w.shape
    wp = jnp.zeros((kh, kw, cin_pad, cout_pad), jnp.float32)
    wp = wp.at[:, :, :cin, :cout].set(w)
    bp = jnp.zeros((cout_pad, 1), jnp.float32).at[:cout, 0].set(b)
    return wp.reshape(kh * kw * cin_pad, cout_pad).T, bp


def _prep_At(pA, pt, cin_pad):
    """Stack A-net and t-net: shared-input first layers along Cout, second
    layers block-diagonally (A reads A-hidden, t reads t-hidden)."""
    w1A, b1A, w2A, b2A = pA
    w1t, b1t, w2t, b2t = pt
    hid = w1A.shape[-1]
    h2p = _round_up(2 * hid, 8)
    w1 = jnp.concatenate([w1A, w1t], axis=-1)                  # [3,3,Cin,2*hid]
    b1 = jnp.concatenate([b1A, b1t], axis=0)
    w2 = jnp.zeros((3, 3, h2p, 6), jnp.float32)
    w2 = w2.at[:, :, :hid, 0:3].set(w2A)
    w2 = w2.at[:, :, hid:2 * hid, 3:6].set(w2t)
    b2 = jnp.concatenate([b2A, b2t], axis=0)
    w1m, b1m = _matmul_form(w1, b1, cin_pad, h2p)
    w2m, b2m = _matmul_form(w2, b2, h2p, 8)
    return w1m, b1m, w2m, b2m


def _prep_J(pJ, cin_pad):
    w1, b1, w2, b2 = pJ
    hid = w1.shape[-1]
    hp = _round_up(hid, 8)
    w1m, b1m = _matmul_form(w1, b1, cin_pad, hp)
    w2m, b2m = _matmul_form(w2, b2, hp, 8)
    return w1m, b1m, w2m, b2m


# ----------------------------------------------------------------------------
# Synthetic sub-net parameters + full Dehaze_net forward
# ----------------------------------------------------------------------------
def make_subnet_params(key, cin, hid, cout=3):
    k1, k2 = jax.random.split(key)
    w1 = jax.random.normal(k1, (3, 3, cin, hid), jnp.float32) * 0.1
    b1 = jnp.zeros((hid,), jnp.float32)
    w2 = jax.random.normal(k2, (3, 3, hid, cout), jnp.float32) * 0.1
    b2 = jnp.zeros((cout,), jnp.float32)
    return (w1, b1, w2, b2)


def make_dehaze_params(key, hid=8):
    spec = [("A1", 3), ("t1", 3),
            ("A2", 12), ("t2", 12), ("J2", 12),
            ("A3", 12), ("t3", 12), ("J3", 12),
            ("A4", 12), ("t4", 12), ("J4", 12)]
    keys = jax.random.split(key, len(spec))
    return {name: make_subnet_params(k, cin, hid)
            for (name, cin), k in zip(spec, keys)}


def dehaze_net_forward(params, I, t_clamp=0.05):
    """I: [N, 3, H, W] (NCHW, like torch). Returns the 12 outputs of forward()."""
    N, C, H, W = I.shape
    HW = H * W
    assert C == 3
    assert HW % 128 == 0, "flattened spatial dim must be lane aligned"
    assert W & (W - 1) == 0, "in-kernel border masks assume power-of-two W"

    cin_pad = 16                    # cat(I, A, t, J) = 12 channels -> pad to 16
    at = [_prep_At(params[f"A{k}"], params[f"t{k}"], cin_pad) for k in (1, 2, 3, 4)]
    jn = [_prep_J(params[f"J{k}"], cin_pad) for k in (2, 3, 4)]
    w1at = jnp.stack([p[0] for p in at]); b1at = jnp.stack([p[1] for p in at])
    w2at = jnp.stack([p[2] for p in at]); b2at = jnp.stack([p[3] for p in at])
    w1j = jnp.stack([p[0] for p in jn]);  b1j = jnp.stack([p[1] for p in jn])
    w2j = jnp.stack([p[2] for p in jn]);  b2j = jnp.stack([p[3] for p in jn])
    weights = (w1at, b1at, w2at, b2at, w1j, b1j, w2j, b2j)

    If = I.reshape(N, C, HW)                     # metadata-only reshape

    in_specs = [pl.BlockSpec((1, C, HW), lambda n: (n, 0, 0))]
    in_specs += [pl.BlockSpec(w.shape, lambda n: (0, 0, 0)) for w in weights]
    out_specs = pl.BlockSpec((1, 36, HW), lambda n: (n, 0, 0))

    packed = pl.pallas_call(
        functools.partial(_dehaze_kernel, H=H, W=W, t_clamp=t_clamp),
        out_shape=jax.ShapeDtypeStruct((N, 36, HW), I.dtype),
        grid_spec=pltpu.PrefetchScalarGridSpec(
            num_scalar_prefetch=0,
            grid=(N,),
            in_specs=in_specs,
            out_specs=out_specs),
        compiler_params=pltpu.CompilerParams(
            dimension_semantics=("parallel",)),   # batch across TCs on v7x
    )(If, *weights)

    # Packed rows per iteration k: [A(3), t(3), J(3)]  ->  12 NCHW outputs.
    return tuple(packed[:, 3 * i:3 * i + 3, :].reshape(N, 3, H, W)
                 for i in range(12))


# ----------------------------------------------------------------------------
# Pure-JAX reference (for numerical validation of the Pallas kernel)
# ----------------------------------------------------------------------------
def _conv_ref(x, w, b, act):
    y = jax.lax.conv_general_dilated(
        x, jnp.transpose(w, (3, 2, 0, 1)), (1, 1), "SAME",
        dimension_numbers=("NCHW", "OIHW", "NCHW"),
        precision=jax.lax.Precision.HIGHEST) + b[None, :, None, None]
    return jnp.maximum(y, 0.0) if act == "relu" else jax.nn.sigmoid(y)


def _subnet_ref(p, x):
    w1, b1, w2, b2 = p
    return _conv_ref(_conv_ref(x, w1, b1, "relu"), w2, b2, "sigmoid")


def dehaze_net_reference(params, I, t_clamp=0.05):
    A = _subnet_ref(params["A1"], I)
    t = _subnet_ref(params["t1"], I)
    J = (I - A) / jnp.maximum(t, t_clamp) + A
    outs = [A, t, J]
    for k in (2, 3, 4):
        x = jnp.concatenate([I, A, t, J], axis=1)
        A = _subnet_ref(params[f"A{k}"], x)
        t = _subnet_ref(params[f"t{k}"], x)
        Jf = (I - A) / jnp.maximum(t, t_clamp) + A
        x2 = jnp.concatenate([I, A, t, Jf], axis=1)
        J = _subnet_ref(params[f"J{k}"], x2)
        outs += [A, t, J]
    return tuple(outs)


# ----------------------------------------------------------------------------
if __name__ == "__main__":
    key = jax.random.PRNGKey(0)
    k_params, k_input = jax.random.split(key)

    params = make_dehaze_params(k_params, hid=8)
    I = jax.random.uniform(k_input, (2, 3, 16, 16), jnp.float32)   # NCHW like torch

    outs = jax.block_until_ready(jax.jit(dehaze_net_forward)(params, I))
    refs = jax.block_until_ready(jax.jit(dehaze_net_reference)(params, I))

    assert len(outs) == 12
    for o, r in zip(outs, refs):
        assert o.shape == (2, 3, 16, 16)
        assert bool(jnp.all(jnp.isfinite(o)))
        err = float(jnp.max(jnp.abs(o - r)))
        # Tolerance absorbs the approximate EUP reciprocal and default MXU
        # precision (the reference conv uses Precision.HIGHEST).
        assert bool(jnp.allclose(o, r, atol=2e-2, rtol=2e-2)), f"max abs err {err}"

    print("KERNEL_OK")
</pallas_src>

<mosaic_0001>
module attributes {stable_mosaic.version = 11 : i64} {
  func.func @_dehaze_kernel(%arg0: i32, %arg1: memref<1x3x256xf32, #tpu.memory_space<vmem>>, %arg2: memref<4x16x144xf32, #tpu.memory_space<vmem>>, %arg3: memref<4x16x1xf32, #tpu.memory_space<vmem>>, %arg4: memref<4x8x144xf32, #tpu.memory_space<vmem>>, %arg5: memref<4x8x1xf32, #tpu.memory_space<vmem>>, %arg6: memref<3x8x144xf32, #tpu.memory_space<vmem>>, %arg7: memref<3x8x1xf32, #tpu.memory_space<vmem>>, %arg8: memref<3x8x72xf32, #tpu.memory_space<vmem>>, %arg9: memref<3x8x1xf32, #tpu.memory_space<vmem>>, %arg10: memref<1x36x256xf32, #tpu.memory_space<vmem>>) attributes {dimension_semantics = [#tpu.dimension_semantics<parallel>], iteration_bounds = array<i64: 2>, scalar_prefetch = 0 : i64, scratch_operands = 0 : i64, tpu.core_type = #tpu.core_type<tc>, window_params = [{transform_indices = @transform_0, window_bounds = array<i64: 1, 3, 256>}, {pipeline_mode = #tpu.pipeline_mode<synchronous>, transform_indices = @transform_1, window_bounds = array<i64: 4, 16, 144>}, {pipeline_mode = #tpu.pipeline_mode<synchronous>, transform_indices = @transform_2, window_bounds = array<i64: 4, 16, 1>}, {pipeline_mode = #tpu.pipeline_mode<synchronous>, transform_indices = @transform_3, window_bounds = array<i64: 4, 8, 144>}, {pipeline_mode = #tpu.pipeline_mode<synchronous>, transform_indices = @transform_4, window_bounds = array<i64: 4, 8, 1>}, {pipeline_mode = #tpu.pipeline_mode<synchronous>, transform_indices = @transform_5, window_bounds = array<i64: 3, 8, 144>}, {pipeline_mode = #tpu.pipeline_mode<synchronous>, transform_indices = @transform_6, window_bounds = array<i64: 3, 8, 1>}, {pipeline_mode = #tpu.pipeline_mode<synchronous>, transform_indices = @transform_7, window_bounds = array<i64: 3, 8, 72>}, {pipeline_mode = #tpu.pipeline_mode<synchronous>, transform_indices = @transform_8, window_bounds = array<i64: 3, 8, 1>}, {transform_indices = @transform_9, window_bounds = array<i64: 1, 36, 256>}]} {
    %0 = tpu.iota {dimensions = array<i32: 1>} : vector<1x256xi32>
    %c15_i32 = arith.constant 15 : i32
    %1 = vector.broadcast %c15_i32 : i32 to vector<1x256xi32>
    %2 = arith.andi %0, %1 : vector<1x256xi32>
    %c16_i32 = arith.constant 16 : i32
    %3 = vector.broadcast %c16_i32 : i32 to vector<1x256xi32>
    %4 = arith.cmpi sge, %0, %3 : vector<1x256xi32>
    %c1_i32 = arith.constant 1 : i32
    %5 = vector.broadcast %c1_i32 : i32 to vector<1x256xi32>
    %6 = arith.cmpi sge, %2, %5 : vector<1x256xi32>
    %7 = arith.andi %4, %6 : vector<1x256xi1>
    %cst = arith.constant 1.000000e+00 : f32
    %cst_0 = arith.constant 0.000000e+00 : f32
    %8 = vector.broadcast %cst : f32 to vector<1x256xf32>
    %9 = vector.broadcast %cst_0 : f32 to vector<1x256xf32>
    %10 = arith.select %7, %8, %9 : vector<1x256xi1>, vector<1x256xf32>
    %c16_i32_1 = arith.constant 16 : i32
    %11 = vector.broadcast %c16_i32_1 : i32 to vector<1x256xi32>
    %12 = arith.cmpi sge, %0, %11 : vector<1x256xi32>
    %cst_2 = arith.constant 1.000000e+00 : f32
    %cst_3 = arith.constant 0.000000e+00 : f32
    %13 = vector.broadcast %cst_2 : f32 to vector<1x256xf32>
    %14 = vector.broadcast %cst_3 : f32 to vector<1x256xf32>
    %15 = arith.select %12, %13, %14 : vector<1x256xi1>, vector<1x256xf32>
    %c16_i32_4 = arith.constant 16 : i32
    %16 = vector.broadcast %c16_i32_4 : i32 to vector<1x256xi32>
    %17 = arith.cmpi sge, %0, %16 : vector<1x256xi32>
    %c15_i32_5 = arith.constant 15 : i32
    %18 = vector.broadcast %c15_i32_5 : i32 to vector<1x256xi32>
    %19 = arith.cmpi slt, %2, %18 : vector<1x256xi32>
    %20 = arith.andi %17, %19 : vector<1x256xi1>
    %cst_6 = arith.constant 1.000000e+00 : f32
    %cst_7 = arith.constant 0.000000e+00 : f32
    %21 = vector.broadcast %cst_6 : f32 to vector<1x256xf32>
    %22 = vector.broadcast %cst_7 : f32 to vector<1x256xf32>
    %23 = arith.select %20, %21, %22 : vector<1x256xi1>, vector<1x256xf32>
    %c1_i32_8 = arith.constant 1 : i32
    %24 = vector.broadcast %c1_i32_8 : i32 to vector<1x256xi32>
    %25 = arith.cmpi sge, %2, %24 : vector<1x256xi32>
    %cst_9 = arith.constant 1.000000e+00 : f32
    %cst_10 = arith.constant 0.000000e+00 : f32
    %26 = vector.broadcast %cst_9 : f32 to vector<1x256xf32>
    %27 = vector.broadcast %cst_10 : f32 to vector<1x256xf32>
    %28 = arith.select %25, %26, %27 : vector<1x256xi1>, vector<1x256xf32>
    %c15_i32_11 = arith.constant 15 : i32
    %29 = vector.broadcast %c15_i32_11 : i32 to vector<1x256xi32>
    %30 = arith.cmpi slt, %2, %29 : vector<1x256xi32>
    %cst_12 = arith.constant 1.000000e+00 : f32
    %cst_13 = arith.constant 0.000000e+00 : f32
    %31 = vector.broadcast %cst_12 : f32 to vector<1x256xf32>
    %32 = vector.broadcast %cst_13 : f32 to vector<1x256xf32>
    %33 = arith.select %30, %31, %32 : vector<1x256xi1>, vector<1x256xf32>
    %c240_i32 = arith.constant 240 : i32
    %34 = vector.broadcast %c240_i32 : i32 to vector<1x256xi32>
    %35 = arith.cmpi slt, %0, %34 : vector<1x256xi32>
    %c1_i32_14 = arith.constant 1 : i32
    %36 = vector.broadcast %c1_i32_14 : i32 to vector<1x256xi32>
    %37 = arith.cmpi sge, %2, %36 : vector<1x256xi32>
    %38 = arith.andi %35, %37 : vector<1x256xi1>
    %cst_15 = arith.constant 1.000000e+00 : f32
    %cst_16 = arith.constant 0.000000e+00 : f32
    %39 = vector.broadcast %cst_15 : f32 to vector<1x256xf32>
    %40 = vector.broadcast %cst_16 : f32 to vector<1x256xf32>
    %41 = arith.select %38, %39, %40 : vector<1x256xi1>, vector<1x256xf32>
    %c240_i32_17 = arith.constant 240 : i32
    %42 = vector.broadcast %c240_i32_17 : i32 to vector<1x256xi32>
    %43 = arith.cmpi slt, %0, %42 : vector<1x256xi32>
    %cst_18 = arith.constant 1.000000e+00 : f32
    %cst_19 = arith.constant 0.000000e+00 : f32
    %44 = vector.broadcast %cst_18 : f32 to vector<1x256xf32>
    %45 = vector.broadcast %cst_19 : f32 to vector<1x256xf32>
    %46 = arith.select %43, %44, %45 : vector<1x256xi1>, vector<1x256xf32>
    %c240_i32_20 = arith.constant 240 : i32
    %47 = vector.broadcast %c240_i32_20 : i32 to vector<1x256xi32>
    %48 = arith.cmpi slt, %0, %47 : vector<1x256xi32>
    %c15_i32_21 = arith.constant 15 : i32
    %49 = vector.broadcast %c15_i32_21 : i32 to vector<1x256xi32>
    %50 = arith.cmpi slt, %2, %49 : vector<1x256xi32>
    %51 = arith.andi %48, %50 : vector<1x256xi1>
    %cst_22 = arith.constant 1.000000e+00 : f32
    %cst_23 = arith.constant 0.000000e+00 : f32
    %52 = vector.broadcast %cst_22 : f32 to vector<1x256xf32>
    %53 = vector.broadcast %cst_23 : f32 to vector<1x256xf32>
    %54 = arith.select %51, %52, %53 : vector<1x256xi1>, vector<1x256xf32>
    %c0 = arith.constant 0 : index
    %c0_24 = arith.constant 0 : index
    %c0_25 = arith.constant 0 : index
    %55 = vector.load %arg1[%c0, %c0_24, %c0_25] : memref<1x3x256xf32, #tpu.memory_space<vmem>>, vector<1x3x256xf32>
    %56 = vector.shape_cast %55 : vector<1x3x256xf32> to vector<3x256xf32>
    %cst_26 = arith.constant 0.000000e+00 : f32
    %57 = vector.broadcast %cst_26 : f32 to vector<13x256xf32>
    %58 = tpu.concatenate %56, %57 in 0 : vector<3x256xf32>, vector<13x256xf32> -> vector<16x256xf32>
    %c0_27 = arith.constant 0 : index
    %c0_28 = arith.constant 0 : index
    %c0_29 = arith.constant 0 : index
    %59 = vector.load %arg2[%c0_27, %c0_28, %c0_29] : memref<4x16x144xf32, #tpu.memory_space<vmem>>, vector<1x16x144xf32>
    %60 = vector.shape_cast %59 : vector<1x16x144xf32> to vector<16x144xf32>
    %c0_30 = arith.constant 0 : index
    %c0_31 = arith.constant 0 : index
    %c0_32 = arith.constant 0 : index
    %61 = vector.load %arg3[%c0_30, %c0_31, %c0_32] : memref<4x16x1xf32, #tpu.memory_space<vmem>>, vector<1x16x1xf32>
    %62 = vector.shape_cast %61 : vector<1x16x1xf32> to vector<16x1xf32>
    %c17_i32 = arith.constant 17 : i32
    %63 = tpu.dynamic_rotate %58 by %c17_i32 dim 1 : vector<16x256xf32>, i32 -> vector<16x256xf32>
    %64 = vector.broadcast %10 : vector<1x256xf32> to vector<16x256xf32>
    %65 = arith.mulf %63, %64 : vector<16x256xf32>
    %c16_i32_33 = arith.constant 16 : i32
    %66 = tpu.dynamic_rotate %58 by %c16_i32_33 dim 1 : vector<16x256xf32>, i32 -> vector<16x256xf32>
    %67 = vector.broadcast %15 : vector<1x256xf32> to vector<16x256xf32>
    %68 = arith.mulf %66, %67 : vector<16x256xf32>
    %c15_i32_34 = arith.constant 15 : i32
    %69 = tpu.dynamic_rotate %58 by %c15_i32_34 dim 1 : vector<16x256xf32>, i32 -> vector<16x256xf32>
    %70 = vector.broadcast %23 : vector<1x256xf32> to vector<16x256xf32>
    %71 = arith.mulf %69, %70 : vector<16x256xf32>
    %c1_i32_35 = arith.constant 1 : i32
    %72 = tpu.dynamic_rotate %58 by %c1_i32_35 dim 1 : vector<16x256xf32>, i32 -> vector<16x256xf32>
    %73 = vector.broadcast %28 : vector<1x256xf32> to vector<16x256xf32>
    %74 = arith.mulf %72, %73 : vector<16x256xf32>
    %c255_i32 = arith.constant 255 : i32
    %75 = tpu.dynamic_rotate %58 by %c255_i32 dim 1 : vector<16x256xf32>, i32 -> vector<16x256xf32>
    %76 = vector.broadcast %33 : vector<1x256xf32> to vector<16x256xf32>
    %77 = arith.mulf %75, %76 : vector<16x256xf32>
    %c241_i32 = arith.constant 241 : i32
    %78 = tpu.dynamic_rotate %58 by %c241_i32 dim 1 : vector<16x256xf32>, i32 -> vector<16x256xf32>
    %79 = vector.broadcast %41 : vector<1x256xf32> to vector<16x256xf32>
    %80 = arith.mulf %78, %79 : vector<16x256xf32>
    %c240_i32_36 = arith.constant 240 : i32
    %81 = tpu.dynamic_rotate %58 by %c240_i32_36 dim 1 : vector<16x256xf32>, i32 -> vector<16x256xf32>
    %82 = vector.broadcast %46 : vector<1x256xf32> to vector<16x256xf32>
    %83 = arith.mulf %81, %82 : vector<16x256xf32>
    %c239_i32 = arith.constant 239 : i32
    %84 = tpu.dynamic_rotate %58 by %c239_i32 dim 1 : vector<16x256xf32>, i32 -> vector<16x256xf32>
    %85 = vector.broadcast %54 : vector<1x256xf32> to vector<16x256xf32>
    %86 = arith.mulf %84, %85 : vector<16x256xf32>
    %87 = tpu.concatenate %65, %68, %71, %74, %58, %77, %80, %83, %86 in 0 : vector<16x256xf32>, vector<16x256xf32>, vector<16x256xf32>, vector<16x256xf32>, vector<16x256xf32>, vector<16x256xf32>, vector<16x256xf32>, vector<16x256xf32>, vector<16x256xf32> -> vector<144x256xf32>
    %cst_37 = arith.constant dense<0.000000e+00> : vector<16x256xf32>
    %88 = tpu.matmul %60, %87, %cst_37 {dimension_numbers = #tpu.dot_dimension_numbers<[1], [0], [0], [1], [0, 0, 1, 1], [], []>} : vector<16x144xf32>, vector<144x256xf32>, vector<16x256xf32> -> vector<16x256xf32>
    %89 = vector.broadcast %62 : vector<16x1xf32> to vector<16x256xf32>
    %90 = arith.addf %88, %89 : vector<16x256xf32>
    %cst_38 = arith.constant 0.000000e+00 : f32
    %91 = vector.broadcast %cst_38 : f32 to vector<16x256xf32>
    %92 = arith.maximumf %90, %91 : vector<16x256xf32>
    %c0_39 = arith.constant 0 : index
    %c0_40 = arith.constant 0 : index
    %c0_41 = arith.constant 0 : index
    %93 = vector.load %arg4[%c0_39, %c0_40, %c0_41] : memref<4x8x144xf32, #tpu.memory_space<vmem>>, vector<1x8x144xf32>
    %94 = vector.shape_cast %93 : vector<1x8x144xf32> to vector<8x144xf32>
    %c0_42 = arith.constant 0 : index
    %c0_43 = arith.constant 0 : index
    %c0_44 = arith.constant 0 : index
    %95 = vector.load %arg5[%c0_42, %c0_43, %c0_44] : memref<4x8x1xf32, #tpu.memory_space<vmem>>, vector<1x8x1xf32>
    %96 = vector.shape_cast %95 : vector<1x8x1xf32> to vector<8x1xf32>
    %c17_i32_45 = arith.constant 17 : i32
    %97 = tpu.dynamic_rotate %92 by %c17_i32_45 dim 1 : vector<16x256xf32>, i32 -> vector<16x256xf32>
    %98 = vector.broadcast %10 : vector<1x256xf32> to vector<16x256xf32>
    %99 = arith.mulf %97, %98 : vector<16x256xf32>
    %c16_i32_46 = arith.constant 16 : i32
    %100 = tpu.dynamic_rotate %92 by %c16_i32_46 dim 1 : vector<16x256xf32>, i32 -> vector<16x256xf32>
    %101 = vector.broadcast %15 : vector<1x256xf32> to vector<16x256xf32>
    %102 = arith.mulf %100, %101 : vector<16x256xf32>
    %c15_i32_47 = arith.constant 15 : i32
    %103 = tpu.dynamic_rotate %92 by %c15_i32_47 dim 1 : vector<16x256xf32>, i32 -> vector<16x256xf32>
    %104 = vector.broadcast %23 : vector<1x256xf32> to vector<16x256xf32>
    %105 = arith.mulf %103, %104 : vector<16x256xf32>
    %c1_i32_48 = arith.constant 1 : i32
    %106 = tpu.dynamic_rotate %92 by %c1_i32_48 dim 1 : vector<16x256xf32>, i32 -> vector<16x256xf32>
    %107 = vector.broadcast %28 : vector<1x256xf32> to vector<16x256xf32>
    %108 = arith.mulf %106, %107 : vector<16x256xf32>
    %c255_i32_49 = arith.constant 255 : i32
    %109 = tpu.dynamic_rotate %92 by %c255_i32_49 dim 1 : vector<16x256xf32>, i32 -> vector<16x256xf32>
    %110 = vector.broadcast %33 : vector<1x256xf32> to vector<16x256xf32>
    %111 = arith.mulf %109, %110 : vector<16x256xf32>
    %c241_i32_50 = arith.constant 241 : i32
    %112 = tpu.dynamic_rotate %92 by %c241_i32_50 dim 1 : vector<16x256xf32>, i32 -> vector<16x256xf32>
    %113 = vector.broadcast %41 : vector<1x256xf32> to vector<16x256xf32>
    %114 = arith.mulf %112, %113 : vector<16x256xf32>
    %c240_i32_51 = arith.constant 240 : i32
    %115 = tpu.dynamic_rotate %92 by %c240_i32_51 dim 1 : vector<16x256xf32>, i32 -> vector<16x256xf32>
    %116 = vector.broadcast %46 : vector<1x256xf32> to vector<16x256xf32>
    %117 = arith.mulf %115, %116 : vector<16x256xf32>
    %c239_i32_52 = arith.constant 239 : i32
    %118 = tpu.dynamic_rotate %92 by %c239_i32_52 dim 1 : vector<16x256xf32>, i32 -> vector<16x256xf32>
    %119 = vector.broadcast %54 : vector<1x256xf32> to vector<16x256xf32>
    %120 = arith.mulf %118, %119 : vector<16x256xf32>
    %121 = tpu.concatenate %99, %102, %105, %108, %92, %111, %114, %117, %120 in 0 : vector<16x256xf32>, vector<16x256xf32>, vector<16x256xf32>, vector<16x256xf32>, vector<16x256xf32>, vector<16x256xf32>, vector<16x256xf32>, vector<16x256xf32>, vector<16x256xf32> -> vector<144x256xf32>
    %cst_53 = arith.constant dense<0.000000e+00> : vector<8x256xf32>
    %122 = tpu.matmul %94, %121, %cst_53 {dimension_numbers = #tpu.dot_dimension_numbers<[1], [0], [0], [1], [0, 0, 1, 1], [], []>} : vector<8x144xf32>, vector<144x256xf32>, vector<8x256xf32> -> vector<8x256xf32>
    %123 = vector.broadcast %96 : vector<8x1xf32> to vector<8x256xf32>
    %124 = arith.addf %122, %123 : vector<8x256xf32>
    %125 = arith.negf %124 : vector<8x256xf32>
    %126 = math.exp %125 : vector<8x256xf32>
    %cst_54 = arith.constant 1.000000e+00 : f32
    %127 = vector.broadcast %cst_54 : f32 to vector<8x256xf32>
    %128 = arith.addf %127, %126 : vector<8x256xf32>
    %129 = arith.divf %127, %128 : vector<8x256xf32>
    %130 = vector.extract_strided_slice %129 {offsets = [0, 0], sizes = [3, 256], strides = [1, 1]} : vector<8x256xf32> to vector<3x256xf32>
    %131 = vector.extract_strided_slice %129 {offsets = [3, 0], sizes = [3, 256], strides = [1, 1]} : vector<8x256xf32> to vector<3x256xf32>
    %132 = arith.subf %56, %130 : vector<3x256xf32>
    %cst_55 = arith.constant 5.000000e-02 : f32
    %133 = vector.broadcast %cst_55 : f32 to vector<3x256xf32>
    %134 = arith.maximumf %131, %133 : vector<3x256xf32>
    %135 = tpu.reciprocal %134 {approx = true} : vector<3x256xf32> -> vector<3x256xf32>
    %136 = arith.mulf %132, %135 : vector<3x256xf32>
    %137 = arith.addf %136, %130 : vector<3x256xf32>
    %138 = vector.extract_strided_slice %129 {offsets = [0, 0], sizes = [6, 256], strides = [1, 1]} : vector<8x256xf32> to vector<6x256xf32>
    %139 = tpu.concatenate %138, %137 in 0 : vector<6x256xf32>, vector<3x256xf32> -> vector<9x256xf32>
    %140 = vector.extract_strided_slice %129 {offsets = [0, 0], sizes = [6, 256], strides = [1, 1]} : vector<8x256xf32> to vector<6x256xf32>
    %cst_56 = arith.constant 0.000000e+00 : f32
    %141 = vector.broadcast %cst_56 : f32 to vector<4x256xf32>
    %142 = tpu.concatenate %56, %140, %137, %141 in 0 : vector<3x256xf32>, vector<6x256xf32>, vector<3x256xf32>, vector<4x256xf32> -> vector<16x256xf32>
    %c1 = arith.constant 1 : index
    %c0_57 = arith.constant 0 : index
    %c0_58 = arith.constant 0 : index
    %143 = vector.load %arg2[%c1, %c0_57, %c0_58] : memref<4x16x144xf32, #tpu.memory_space<vmem>>, vector<1x16x144xf32>
    %144 = vector.shape_cast %143 : vector<1x16x144xf32> to vector<16x144xf32>
    %c1_59 = arith.constant 1 : index
    %c0_60 = arith.constant 0 : index
    %c0_61 = arith.constant 0 : index
    %145 = vector.load %arg3[%c1_59, %c0_60, %c0_61] : memref<4x16x1xf32, #tpu.memory_space<vmem>>, vector<1x16x1xf32>
    %146 = vector.shape_cast %145 : vector<1x16x1xf32> to vector<16x1xf32>
    %c17_i32_62 = arith.constant 17 : i32
    %147 = tpu.dynamic_rotate %142 by %c17_i32_62 dim 1 : vector<16x256xf32>, i32 -> vector<16x256xf32>
    %148 = vector.broadcast %10 : vector<1x256xf32> to vector<16x256xf32>
    %149 = arith.mulf %147, %148 : vector<16x256xf32>
    %c16_i32_63 = arith.constant 16 : i32
    %150 = tpu.dynamic_rotate %142 by %c16_i32_63 dim 1 : vector<16x256xf32>, i32 -> vector<16x256xf32>
    %151 = vector.broadcast %15 : vector<1x256xf32> to vector<16x256xf32>
    %152 = arith.mulf %150, %151 : vector<16x256xf32>
    %c15_i32_64 = arith.constant 15 : i32
    %153 = tpu.dynamic_rotate %142 by %c15_i32_64 dim 1 : vector<16x256xf32>, i32 -> vector<16x256xf32>
    %154 = vector.broadcast %23 : vector<1x256xf32> to vector<16x256xf32>
    %155 = arith.mulf %153, %154 : vector<16x256xf32>
    %c1_i32_65 = arith.constant 1 : i32
    %156 = tpu.dynamic_rotate %142 by %c1_i32_65 dim 1 : vector<16x256xf32>, i32 -> vector<16x256xf32>
    %157 = vector.broadcast %28 : vector<1x256xf32> to vector<16x256xf32>
    %158 = arith.mulf %156, %157 : vector<16x256xf32>
    %c255_i32_66 = arith.constant 255 : i32
    %159 = tpu.dynamic_rotate %142 by %c255_i32_66 dim 1 : vector<16x256xf32>, i32 -> vector<16x256xf32>
    %160 = vector.broadcast %33 : vector<1x256xf32> to vector<16x256xf32>
    %161 = arith.mulf %159, %160 : vector<16x256xf32>
    %c241_i32_67 = arith.constant 241 : i32
    %162 = tpu.dynamic_rotate %142 by %c241_i32_67 dim 1 : vector<16x256xf32>, i32 -> vector<16x256xf32>
    %163 = vector.broadcast %41 : vector<1x256xf32> to vector<16x256xf32>
    %164 = arith.mulf %162, %163 : vector<16x256xf32>
    %c240_i32_68 = arith.constant 240 : i32
    %165 = tpu.dynamic_rotate %142 by %c240_i32_68 dim 1 : vector<16x256xf32>, i32 -> vector<16x256xf32>
    %166 = vector.broadcast %46 : vector<1x256xf32> to vector<16x256xf32>
    %167 = arith.mulf %165, %166 : vector<16x256xf32>
    %c239_i32_69 = arith.constant 239 : i32
    %168 = tpu.dynamic_rotate %142 by %c239_i32_69 dim 1 : vector<16x256xf32>, i32 -> vector<16x256xf32>
    %169 = vector.broadcast %54 : vector<1x256xf32> to vector<16x256xf32>
    %170 = arith.mulf %168, %169 : vector<16x256xf32>
    %171 = tpu.concatenate %149, %152, %155, %158, %142, %161, %164, %167, %170 in 0 : vector<16x256xf32>, vector<16x256xf32>, vector<16x256xf32>, vector<16x256xf32>, vector<16x256xf32>, vector<16x256xf32>, vector<16x256xf32>, vector<16x256xf32>, vector<16x256xf32> -> vector<144x256xf32>
    %cst_70 = arith.constant dense<0.000000e+00> : vector<16x256xf32>
    %172 = tpu.matmul %144, %171, %cst_70 {dimension_numbers = #tpu.dot_dimension_numbers<[1], [0], [0], [1], [0, 0, 1, 1], [], []>} : vector<16x144xf32>, vector<144x256xf32>, vector<16x256xf32> -> vector<16x256xf32>
    %173 = vector.broadcast %146 : vector<16x1xf32> to vector<16x256xf32>
    %174 = arith.addf %172, %173 : vector<16x256xf32>
    %cst_71 = arith.constant 0.000000e+00 : f32
    %175 = vector.broadcast %cst_71 : f32 to vector<16x256xf32>
    %176 = arith.maximumf %174, %175 : vector<16x256xf32>
    %c1_72 = arith.constant 1 : index
    %c0_73 = arith.constant 0 : index
    %c0_74 = arith.constant 0 : index
    %177 = vector.load %arg4[%c1_72, %c0_73, %c0_74] : memref<4x8x144xf32, #tpu.memory_space<vmem>>, vector<1x8x144xf32>
    %178 = vector.shape_cast %177 : vector<1x8x144xf32> to vector<8x144xf32>
    %c1_75 = arith.constant 1 : index
    %c0_76 = arith.constant 0 : index
    %c0_77 = arith.constant 0 : index
    %179 = vector.load %arg5[%c1_75, %c0_76, %c0_77] : memref<4x8x1xf32, #tpu.memory_space<vmem>>, vector<1x8x1xf32>
    %180 = vector.shape_cast %179 : vector<1x8x1xf32> to vector<8x1xf32>
    %c17_i32_78 = arith.constant 17 : i32
    %181 = tpu.dynamic_rotate %176 by %c17_i32_78 dim 1 : vector<16x256xf32>, i32 -> vector<16x256xf32>
    %182 = vector.broadcast %10 : vector<1x256xf32> to vector<16x256xf32>
    %183 = arith.mulf %181, %182 : vector<16x256xf32>
    %c16_i32_79 = arith.constant 16 : i32
    %184 = tpu.dynamic_rotate %176 by %c16_i32_79 dim 1 : vector<16x256xf32>, i32 -> vector<16x256xf32>
    %185 = vector.broadcast %15 : vector<1x256xf32> to vector<16x256xf32>
    %186 = arith.mulf %184, %185 : vector<16x256xf32>
    %c15_i32_80 = arith.constant 15 : i32
    %187 = tpu.dynamic_rotate %176 by %c15_i32_80 dim 1 : vector<16x256xf32>, i32 -> vector<16x256xf32>
    %188 = vector.broadcast %23 : vector<1x256xf32> to vector<16x256xf32>
    %189 = arith.mulf %187, %188 : vector<16x256xf32>
    %c1_i32_81 = arith.constant 1 : i32
    %190 = tpu.dynamic_rotate %176 by %c1_i32_81 dim 1 : vector<16x256xf32>, i32 -> vector<16x256xf32>
    %191 = vector.broadcast %28 : vector<1x256xf32> to vector<16x256xf32>
    %192 = arith.mulf %190, %191 : vector<16x256xf32>
    %c255_i32_82 = arith.constant 255 : i32
    %193 = tpu.dynamic_rotate %176 by %c255_i32_82 dim 1 : vector<16x256xf32>, i32 -> vector<16x256xf32>
    %194 = vector.broadcast %33 : vector<1x256xf32> to vector<16x256xf32>
    %195 = arith.mulf %193, %194 : vector<16x256xf32>
    %c241_i32_83 = arith.constant 241 : i32
    %196 = tpu.dynamic_rotate %176 by %c241_i32_83 dim 1 : vector<16x256xf32>, i32 -> vector<16x256xf32>
    %197 = vector.broadcast %41 : vector<1x256xf32> to vector<16x256xf32>
    %198 = arith.mulf %196, %197 : vector<16x256xf32>
    %c240_i32_84 = arith.constant 240 : i32
    %199 = tpu.dynamic_rotate %176 by %c240_i32_84 dim 1 : vector<16x256xf32>, i32 -> vector<16x256xf32>
    %200 = vector.broadcast %46 : vector<1x256xf32> to vector<16x256xf32>
    %201 = arith.mulf %199, %200 : vector<16x256xf32>
    %c239_i32_85 = arith.constant 239 : i32
    %202 = tpu.dynamic_rotate %176 by %c239_i32_85 dim 1 : vector<16x256xf32>, i32 -> vector<16x256xf32>
    %203 = vector.broadcast %54 : vector<1x256xf32> to vector<16x256xf32>
    %204 = arith.mulf %202, %203 : vector<16x256xf32>
    %205 = tpu.concatenate %183, %186, %189, %192, %176, %195, %198, %201, %204 in 0 : vector<16x256xf32>, vector<16x256xf32>, vector<16x256xf32>, vector<16x256xf32>, vector<16x256xf32>, vector<16x256xf32>, vector<16x256xf32>, vector<16x256xf32>, vector<16x256xf32> -> vector<144x256xf32>
    %cst_86 = arith.constant dense<0.000000e+00> : vector<8x256xf32>
    %206 = tpu.matmul %178, %205, %cst_86 {dimension_numbers = #tpu.dot_dimension_numbers<[1], [0], [0], [1], [0, 0, 1, 1], [], []>} : vector<8x144xf32>, vector<144x256xf32>, vector<8x256xf32> -> vector<8x256xf32>
    %207 = vector.broadcast %180 : vector<8x1xf32> to vector<8x256xf32>
    %208 = arith.addf %206, %207 : vector<8x256xf32>
    %209 = arith.negf %208 : vector<8x256xf32>
    %210 = math.exp %209 : vector<8x256xf32>
    %cst_87 = arith.constant 1.000000e+00 : f32
    %211 = vector.broadcast %cst_87 : f32 to vector<8x256xf32>
    %212 = arith.addf %211, %210 : vector<8x256xf32>
    %213 = arith.divf %211, %212 : vector<8x256xf32>
    %214 = vector.extract_strided_slice %213 {offsets = [0, 0], sizes = [3, 256], strides = [1, 1]} : vector<8x256xf32> to vector<3x256xf32>
    %215 = vector.extract_strided_slice %213 {offsets = [3, 0], sizes = [3, 256], strides = [1, 1]} : vector<8x256xf32> to vector<3x256xf32>
    %216 = arith.subf %56, %214 : vector<3x256xf32>
    %cst_88 = arith.constant 5.000000e-02 : f32
    %217 = vector.broadcast %cst_88 : f32 to vector<3x256xf32>
    %218 = arith.maximumf %215, %217 : vector<3x256xf32>
    %219 = tpu.reciprocal %218 {approx = true} : vector<3x256xf32> -> vector<3x256xf32>
    %220 = arith.mulf %216, %219 : vector<3x256xf32>
    %221 = arith.addf %220, %214 : vector<3x256xf32>
    %222 = vector.extract_strided_slice %213 {offsets = [0, 0], sizes = [6, 256], strides = [1, 1]} : vector<8x256xf32> to vector<6x256xf32>
    %cst_89 = arith.constant 0.000000e+00 : f32
    %223 = vector.broadcast %cst_89 : f32 to vector<4x256xf32>
    %224 = tpu.concatenate %56, %222, %221, %223 in 0 : vector<3x256xf32>, vector<6x256xf32>, vector<3x256xf32>, vector<4x256xf32> -> vector<16x256xf32>
    %c0_90 = arith.constant 0 : index
    %c0_91 = arith.constant 0 : index
    %c0_92 = arith.constant 0 : index
    %225 = vector.load %arg6[%c0_90, %c0_91, %c0_92] : memref<3x8x144xf32, #tpu.memory_space<vmem>>, vector<1x8x144xf32>
    %226 = vector.shape_cast %225 : vector<1x8x144xf32> to vector<8x144xf32>
    %c0_93 = arith.constant 0 : index
    %c0_94 = arith.constant 0 : index
    %c0_95 = arith.constant 0 : index
    %227 = vector.load %arg7[%c0_93, %c0_94, %c0_95] : memref<3x8x1xf32, #tpu.memory_space<vmem>>, vector<1x8x1xf32>
    %228 = vector.shape_cast %227 : vector<1x8x1xf32> to vector<8x1xf32>
    %c17_i32_96 = arith.constant 17 : i32
    %229 = tpu.dynamic_rotate %224 by %c17_i32_96 dim 1 : vector<16x256xf32>, i32 -> vector<16x256xf32>
    %230 = vector.broadcast %10 : vector<1x256xf32> to vector<16x256xf32>
    %231 = arith.mulf %229, %230 : vector<16x256xf32>
    %c16_i32_97 = arith.constant 16 : i32
    %232 = tpu.dynamic_rotate %224 by %c16_i32_97 dim 1 : vector<16x256xf32>, i32 -> vector<16x256xf32>
    %233 = vector.broadcast %15 : vector<1x256xf32> to vector<16x256xf32>
    %234 = arith.mulf %232, %233 : vector<16x256xf32>
    %c15_i32_98 = arith.constant 15 : i32
    %235 = tpu.dynamic_rotate %224 by %c15_i32_98 dim 1 : vector<16x256xf32>, i32 -> vector<16x256xf32>
    %236 = vector.broadcast %23 : vector<1x256xf32> to vector<16x256xf32>
    %237 = arith.mulf %235, %236 : vector<16x256xf32>
    %c1_i32_99 = arith.constant 1 : i32
    %238 = tpu.dynamic_rotate %224 by %c1_i32_99 dim 1 : vector<16x256xf32>, i32 -> vector<16x256xf32>
    %239 = vector.broadcast %28 : vector<1x256xf32> to vector<16x256xf32>
    %240 = arith.mulf %238, %239 : vector<16x256xf32>
    %c255_i32_100 = arith.constant 255 : i32
    %241 = tpu.dynamic_rotate %224 by %c255_i32_100 dim 1 : vector<16x256xf32>, i32 -> vector<16x256xf32>
    %242 = vector.broadcast %33 : vector<1x256xf32> to vector<16x256xf32>
    %243 = arith.mulf %241, %242 : vector<16x256xf32>
    %c241_i32_101 = arith.constant 241 : i32
    %244 = tpu.dynamic_rotate %224 by %c241_i32_101 dim 1 : vector<16x256xf32>, i32 -> vector<16x256xf32>
    %245 = vector.broadcast %41 : vector<1x256xf32> to vector<16x256xf32>
    %246 = arith.mulf %244, %245 : vector<16x256xf32>
    %c240_i32_102 = arith.constant 240 : i32
    %247 = tpu.dynamic_rotate %224 by %c240_i32_102 dim 1 : vector<16x256xf32>, i32 -> vector<16x256xf32>
    %248 = vector.broadcast %46 : vector<1x256xf32> to vector<16x256xf32>
    %249 = arith.mulf %247, %248 : vector<16x256xf32>
    %c239_i32_103 = arith.constant 239 : i32
    %250 = tpu.dynamic_rotate %224 by %c239_i32_103 dim 1 : vector<16x256xf32>, i32 -> vector<16x256xf32>
    %251 = vector.broadcast %54 : vector<1x256xf32> to vector<16x256xf32>
    %252 = arith.mulf %250, %251 : vector<16x256xf32>
    %253 = tpu.concatenate %231, %234, %237, %240, %224, %243, %246, %249, %252 in 0 : vector<16x256xf32>, vector<16x256xf32>, vector<16x256xf32>, vector<16x256xf32>, vector<16x256xf32>, vector<16x256xf32>, vector<16x256xf32>, vector<16x256xf32>, vector<16x256xf32> -> vector<144x256xf32>
    %cst_104 = arith.constant dense<0.000000e+00> : vector<8x256xf32>
    %254 = tpu.matmul %226, %253, %cst_104 {dimension_numbers = #tpu.dot_dimension_numbers<[1], [0], [0], [1], [0, 0, 1, 1], [], []>} : vector<8x144xf32>, vector<144x256xf32>, vector<8x256xf32> -> vector<8x256xf32>
    %255 = vector.broadcast %228 : vector<8x1xf32> to vector<8x256xf32>
    %256 = arith.addf %254, %255 : vector<8x256xf32>
    %cst_105 = arith.constant 0.000000e+00 : f32
    %257 = vector.broadcast %cst_105 : f32 to vector<8x256xf32>
    %258 = arith.maximumf %256, %257 : vector<8x256xf32>
    %c0_106 = arith.constant 0 : index
    %c0_107 = arith.constant 0 : index
    %c0_108 = arith.constant 0 : index
    %259 = vector.load %arg8[%c0_106, %c0_107, %c0_108] : memref<3x8x72xf32, #tpu.memory_space<vmem>>, vector<1x8x72xf32>
    %260 = vector.shape_cast %259 : vector<1x8x72xf32> to vector<8x72xf32>
    %c0_109 = arith.constant 0 : index
    %c0_110 = arith.constant 0 : index
    %c0_111 = arith.constant 0 : index
    %261 = vector.load %arg9[%c0_109, %c0_110, %c0_111] : memref<3x8x1xf32, #tpu.memory_space<vmem>>, vector<1x8x1xf32>
    %262 = vector.shape_cast %261 : vector<1x8x1xf32> to vector<8x1xf32>
    %c17_i32_112 = arith.constant 17 : i32
    %263 = tpu.dynamic_rotate %258 by %c17_i32_112 dim 1 : vector<8x256xf32>, i32 -> vector<8x256xf32>
    %264 = vector.broadcast %10 : vector<1x256xf32> to vector<8x256xf32>
    %265 = arith.mulf %263, %264 : vector<8x256xf32>
    %c16_i32_113 = arith.constant 16 : i32
    %266 = tpu.dynamic_rotate %258 by %c16_i32_113 dim 1 : vector<8x256xf32>, i32 -> vector<8x256xf32>
    %267 = vector.broadcast %15 : vector<1x256xf32> to vector<8x256xf32>
    %268 = arith.mulf %266, %267 : vector<8x256xf32>
    %c15_i32_114 = arith.constant 15 : i32
    %269 = tpu.dynamic_rotate %258 by %c15_i32_114 dim 1 : vector<8x256xf32>, i32 -> vector<8x256xf32>
    %270 = vector.broadcast %23 : vector<1x256xf32> to vector<8x256xf32>
    %271 = arith.mulf %269, %270 : vector<8x256xf32>
    %c1_i32_115 = arith.constant 1 : i32
    %272 = tpu.dynamic_rotate %258 by %c1_i32_115 dim 1 : vector<8x256xf32>, i32 -> vector<8x256xf32>
    %273 = vector.broadcast %28 : vector<1x256xf32> to vector<8x256xf32>
    %274 = arith.mulf %272, %273 : vector<8x256xf32>
    %c255_i32_116 = arith.constant 255 : i32
    %275 = tpu.dynamic_rotate %258 by %c255_i32_116 dim 1 : vector<8x256xf32>, i32 -> vector<8x256xf32>
    %276 = vector.broadcast %33 : vector<1x256xf32> to vector<8x256xf32>
    %277 = arith.mulf %275, %276 : vector<8x256xf32>
    %c241_i32_117 = arith.constant 241 : i32
    %278 = tpu.dynamic_rotate %258 by %c241_i32_117 dim 1 : vector<8x256xf32>, i32 -> vector<8x256xf32>
    %279 = vector.broadcast %41 : vector<1x256xf32> to vector<8x256xf32>
    %280 = arith.mulf %278, %279 : vector<8x256xf32>
    %c240_i32_118 = arith.constant 240 : i32
    %281 = tpu.dynamic_rotate %258 by %c240_i32_118 dim 1 : vector<8x256xf32>, i32 -> vector<8x256xf32>
    %282 = vector.broadcast %46 : vector<1x256xf32> to vector<8x256xf32>
    %283 = arith.mulf %281, %282 : vector<8x256xf32>
    %c239_i32_119 = arith.constant 239 : i32
    %284 = tpu.dynamic_rotate %258 by %c239_i32_119 dim 1 : vector<8x256xf32>, i32 -> vector<8x256xf32>
    %285 = vector.broadcast %54 : vector<1x256xf32> to vector<8x256xf32>
    %286 = arith.mulf %284, %285 : vector<8x256xf32>
    %287 = tpu.concatenate %265, %268, %271, %274, %258, %277, %280, %283, %286 in 0 : vector<8x256xf32>, vector<8x256xf32>, vector<8x256xf32>, vector<8x256xf32>, vector<8x256xf32>, vector<8x256xf32>, vector<8x256xf32>, vector<8x256xf32>, vector<8x256xf32> -> vector<72x256xf32>
    %cst_120 = arith.constant dense<0.000000e+00> : vector<8x256xf32>
    %288 = tpu.matmul %260, %287, %cst_120 {dimension_numbers = #tpu.dot_dimension_numbers<[1], [0], [0], [1], [0, 0, 1, 1], [], []>} : vector<8x72xf32>, vector<72x256xf32>, vector<8x256xf32> -> vector<8x256xf32>
    %289 = vector.broadcast %262 : vector<8x1xf32> to vector<8x256xf32>
    %290 = arith.addf %288, %289 : vector<8x256xf32>
    %291 = arith.negf %290 : vector<8x256xf32>
    %292 = math.exp %291 : vector<8x256xf32>
    %cst_121 = arith.constant 1.000000e+00 : f32
    %293 = vector.broadcast %cst_121 : f32 to vector<8x256xf32>
    %294 = arith.addf %293, %292 : vector<8x256xf32>
    %295 = arith.divf %293, %294 : vector<8x256xf32>
    %296 = vector.extract_strided_slice %295 {offsets = [0, 0], sizes = [3, 256], strides = [1, 1]} : vector<8x256xf32> to vector<3x256xf32>
    %297 = vector.extract_strided_slice %213 {offsets = [0, 0], sizes = [6, 256], strides = [1, 1]} : vector<8x256xf32> to vector<6x256xf32>
    %298 = tpu.concatenate %297, %296 in 0 : vector<6x256xf32>, vector<3x256xf32> -> vector<9x256xf32>
    %299 = vector.extract_strided_slice %213 {offsets = [0, 0], sizes = [6, 256], strides = [1, 1]} : vector<8x256xf32> to vector<6x256xf32>
    %cst_122 = arith.constant 0.000000e+00 : f32
    %300 = vector.broadcast %cst_122 : f32 to vector<4x256xf32>
    %301 = tpu.concatenate %56, %299, %296, %300 in 0 : vector<3x256xf32>, vector<6x256xf32>, vector<3x256xf32>, vector<4x256xf32> -> vector<16x256xf32>
    %c2 = arith.constant 2 : index
    %c0_123 = arith.constant 0 : index
    %c0_124 = arith.constant 0 : index
    %302 = vector.load %arg2[%c2, %c0_123, %c0_124] : memref<4x16x144xf32, #tpu.memory_space<vmem>>, vector<1x16x144xf32>
    %303 = vector.shape_cast %302 : vector<1x16x144xf32> to vector<16x144xf32>
    %c2_125 = arith.constant 2 : index
    %c0_126 = arith.constant 0 : index
    %c0_127 = arith.constant 0 : index
    %304 = vector.load %arg3[%c2_125, %c0_126, %c0_127] : memref<4x16x1xf32, #tpu.memory_space<vmem>>, vector<1x16x1xf32>
    %305 = vector.shape_cast %304 : vector<1x16x1xf32> to vector<16x1xf32>
    %c17_i32_128 = arith.constant 17 : i32
    %306 = tpu.dynamic_rotate %301 by %c17_i32_128 dim 1 : vector<16x256xf32>, i32 -> vector<16x256xf32>
    %307 = vector.broadcast %10 : vector<1x256xf32> to vector<16x256xf32>
    %308 = arith.mulf %306, %307 : vector<16x256xf32>
    %c16_i32_129 = arith.constant 16 : i32
    %309 = tpu.dynamic_rotate %301 by %c16_i32_129 dim 1 : vector<16x256xf32>, i32 -> vector<16x256xf32>
    %310 = vector.broadcast %15 : vector<1x256xf32> to vector<16x256xf32>
    %311 = arith.mulf %309, %310 : vector<16x256xf32>
    %c15_i32_130 = arith.constant 15 : i32
    %312 = tpu.dynamic_rotate %301 by %c15_i32_130 dim 1 : vector<16x256xf32>, i32 -> vector<16x256xf32>
    %313 = vector.broadcast %23 : vector<1x256xf32> to vector<16x256xf32>
    %314 = arith.mulf %312, %313 : vector<16x256xf32>
    %c1_i32_131 = arith.constant 1 : i32
    %315 = tpu.dynamic_rotate %301 by %c1_i32_131 dim 1 : vector<16x256xf32>, i32 -> vector<16x256xf32>
    %316 = vector.broadcast %28 : vector<1x256xf32> to vector<16x256xf32>
    %317 = arith.mulf %315, %316 : vector<16x256xf32>
    %c255_i32_132 = arith.constant 255 : i32
    %318 = tpu.dynamic_rotate %301 by %c255_i32_132 dim 1 : vector<16x256xf32>, i32 -> vector<16x256xf32>
    %319 = vector.broadcast %33 : vector<1x256xf32> to vector<16x256xf32>
    %320 = arith.mulf %318, %319 : vector<16x256xf32>
    %c241_i32_133 = arith.constant 241 : i32
    %321 = tpu.dynamic_rotate %301 by %c241_i32_133 dim 1 : vector<16x256xf32>, i32 -> vector<16x256xf32>
    %322 = vector.broadcast %41 : vector<1x256xf32> to vector<16x256xf32>
    %323 = arith.mulf %321, %322 : vector<16x256xf32>
    %c240_i32_134 = arith.constant 240 : i32
    %324 = tpu.dynamic_rotate %301 by %c240_i32_134 dim 1 : vector<16x256xf32>, i32 -> vector<16x256xf32>
    %325 = vector.broadcast %46 : vector<1x256xf32> to vector<16x256xf32>
    %326 = arith.mulf %324, %325 : vector<16x256xf32>
    %c239_i32_135 = arith.constant 239 : i32
    %327 = tpu.dynamic_rotate %301 by %c239_i32_135 dim 1 : vector<16x256xf32>, i32 -> vector<16x256xf32>
    %328 = vector.broadcast %54 : vector<1x256xf32> to vector<16x256xf32>
    %329 = arith.mulf %327, %328 : vector<16x256xf32>
    %330 = tpu.concatenate %308, %311, %314, %317, %301, %320, %323, %326, %329 in 0 : vector<16x256xf32>, vector<16x256xf32>, vector<16x256xf32>, vector<16x256xf32>, vector<16x256xf32>, vector<16x256xf32>, vector<16x256xf32>, vector<16x256xf32>, vector<16x256xf32> -> vector<144x256xf32>
    %cst_136 = arith.constant dense<0.000000e+00> : vector<16x256xf32>
    %331 = tpu.matmul %303, %330, %cst_136 {dimension_numbers = #tpu.dot_dimension_numbers<[1], [0], [0], [1], [0, 0, 1, 1], [], []>} : vector<16x144xf32>, vector<144x256xf32>, vector<16x256xf32> -> vector<16x256xf32>
    %332 = vector.broadcast %305 : vector<16x1xf32> to vector<16x256xf32>
    %333 = arith.addf %331, %332 : vector<16x256xf32>
    %cst_137 = arith.constant 0.000000e+00 : f32
    %334 = vector.broadcast %cst_137 : f32 to vector<16x256xf32>
    %335 = arith.maximumf %333, %334 : vector<16x256xf32>
    %c2_138 = arith.constant 2 : index
    %c0_139 = arith.constant 0 : index
    %c0_140 = arith.constant 0 : index
    %336 = vector.load %arg4[%c2_138, %c0_139, %c0_140] : memref<4x8x144xf32, #tpu.memory_space<vmem>>, vector<1x8x144xf32>
    %337 = vector.shape_cast %336 : vector<1x8x144xf32> to vector<8x144xf32>
    %c2_141 = arith.constant 2 : index
    %c0_142 = arith.constant 0 : index
    %c0_143 = arith.constant 0 : index
    %338 = vector.load %arg5[%c2_141, %c0_142, %c0_143] : memref<4x8x1xf32, #tpu.memory_space<vmem>>, vector<1x8x1xf32>
    %339 = vector.shape_cast %338 : vector<1x8x1xf32> to vector<8x1xf32>
    %c17_i32_144 = arith.constant 17 : i32
    %340 = tpu.dynamic_rotate %335 by %c17_i32_144 dim 1 : vector<16x256xf32>, i32 -> vector<16x256xf32>
    %341 = vector.broadcast %10 : vector<1x256xf32> to vector<16x256xf32>
    %342 = arith.mulf %340, %341 : vector<16x256xf32>
    %c16_i32_145 = arith.constant 16 : i32
    %343 = tpu.dynamic_rotate %335 by %c16_i32_145 dim 1 : vector<16x256xf32>, i32 -> vector<16x256xf32>
    %344 = vector.broadcast %15 : vector<1x256xf32> to vector<16x256xf32>
    %345 = arith.mulf %343, %344 : vector<16x256xf32>
    %c15_i32_146 = arith.constant 15 : i32
    %346 = tpu.dynamic_rotate %335 by %c15_i32_146 dim 1 : vector<16x256xf32>, i32 -> vector<16x256xf32>
    %347 = vector.broadcast %23 : vector<1x256xf32> to vector<16x256xf32>
    %348 = arith.mulf %346, %347 : vector<16x256xf32>
    %c1_i32_147 = arith.constant 1 : i32
    %349 = tpu.dynamic_rotate %335 by %c1_i32_147 dim 1 : vector<16x256xf32>, i32 -> vector<16x256xf32>
    %350 = vector.broadcast %28 : vector<1x256xf32> to vector<16x256xf32>
    %351 = arith.mulf %349, %350 : vector<16x256xf32>
    %c255_i32_148 = arith.constant 255 : i32
    %352 = tpu.dynamic_rotate %335 by %c255_i32_148 dim 1 : vector<16x256xf32>, i32 -> vector<16x256xf32>
    %353 = vector.broadcast %33 : vector<1x256xf32> to vector<16x256xf32>
    %354 = arith.mulf %352, %353 : vector<16x256xf32>
    %c241_i32_149 = arith.constant 241 : i32
    %355 = tpu.dynamic_rotate %335 by %c241_i32_149 dim 1 : vector<16x256xf32>, i32 -> vector<16x256xf32>
    %356 = vector.broadcast %41 : vector<1x256xf32> to vector<16x256xf32>
    %357 = arith.mulf %355, %356 : vector<16x256xf32>
    %c240_i32_150 = arith.constant 240 : i32
    %358 = tpu.dynamic_rotate %335 by %c240_i32_150 dim 1 : vector<16x256xf32>, i32 -> vector<16x256xf32>
    %359 = vector.broadcast %46 : vector<1x256xf32> to vector<16x256xf32>
    %360 = arith.mulf %358, %359 : vector<16x256xf32>
    %c239_i32_151 = arith.constant 239 : i32
    %361 = tpu.dynamic_rotate %335 by %c239_i32_151 dim 1 : vector<16x256xf32>, i32 -> vector<16x256xf32>
    %362 = vector.broadcast %54 : vector<1x256xf32> to vector<16x256xf32>
    %363 = arith.mulf %361, %362 : vector<16x256xf32>
    %364 = tpu.concatenate %342, %345, %348, %351, %335, %354, %357, %360, %363 in 0 : vector<16x256xf32>, vector<16x256xf32>, vector<16x256xf32>, vector<16x256xf32>, vector<16x256xf32>, vector<16x256xf32>, vector<16x256xf32>, vector<16x256xf32>, vector<16x256xf32> -> vector<144x256xf32>
    %cst_152 = arith.constant dense<0.000000e+00> : vector<8x256xf32>
    %365 = tpu.matmul %337, %364, %cst_152 {dimension_numbers = #tpu.dot_dimension_numbers<[1], [0], [0], [1], [0, 0, 1, 1], [], []>} : vector<8x144xf32>, vector<144x256xf32>, vector<8x256xf32> -> vector<8x256xf32>
    %366 = vector.broadcast %339 : vector<8x1xf32> to vector<8x256xf32>
    %367 = arith.addf %365, %366 : vector<8x256xf32>
    %368 = arith.negf %367 : vector<8x256xf32>
    %369 = math.exp %368 : vector<8x256xf32>
    %cst_153 = arith.constant 1.000000e+00 : f32
    %370 = vector.broadcast %cst_153 : f32 to vector<8x256xf32>
    %371 = arith.addf %370, %369 : vector<8x256xf32>
    %372 = arith.divf %370, %371 : vector<8x256xf32>
    %373 = vector.extract_strided_slice %372 {offsets = [0, 0], sizes = [3, 256], strides = [1, 1]} : vector<8x256xf32> to vector<3x256xf32>
    %374 = vector.extract_strided_slice %372 {offsets = [3, 0], sizes = [3, 256], strides = [1, 1]} : vector<8x256xf32> to vector<3x256xf32>
    %375 = arith.subf %56, %373 : vector<3x256xf32>
    %cst_154 = arith.constant 5.000000e-02 : f32
    %376 = vector.broadcast %cst_154 : f32 to vector<3x256xf32>
    %377 = arith.maximumf %374, %376 : vector<3x256xf32>
    %378 = tpu.reciprocal %377 {approx = true} : vector<3x256xf32> -> vector<3x256xf32>
    %379 = arith.mulf %375, %378 : vector<3x256xf32>
    %380 = arith.addf %379, %373 : vector<3x256xf32>
    %381 = vector.extract_strided_slice %372 {offsets = [0, 0], sizes = [6, 256], strides = [1, 1]} : vector<8x256xf32> to vector<6x256xf32>
    %cst_155 = arith.constant 0.000000e+00 : f32
    %382 = vector.broadcast %cst_155 : f32 to vector<4x256xf32>
    %383 = tpu.concatenate %56, %381, %380, %382 in 0 : vector<3x256xf32>, vector<6x256xf32>, vector<3x256xf32>, vector<4x256xf32> -> vector<16x256xf32>
    %c1_156 = arith.constant 1 : index
    %c0_157 = arith.constant 0 : index
    %c0_158 = arith.constant 0 : index
    %384 = vector.load %arg6[%c1_156, %c0_157, %c0_158] : memref<3x8x144xf32, #tpu.memory_space<vmem>>, vector<1x8x144xf32>
    %385 = vector.shape_cast %384 : vector<1x8x144xf32> to vector<8x144xf32>
    %c1_159 = arith.constant 1 : index
    %c0_160 = arith.constant 0 : index
    %c0_161 = arith.constant 0 : index
    %386 = vector.load %arg7[%c1_159, %c0_160, %c0_161] : memref<3x8x1xf32, #tpu.memory_space<vmem>>, vector<1x8x1xf32>
    %387 = vector.shape_cast %386 : vector<1x8x1xf32> to vector<8x1xf32>
    %c17_i32_162 = arith.constant 17 : i32
    %388 = tpu.dynamic_rotate %383 by %c17_i32_162 dim 1 : vector<16x256xf32>, i32 -> vector<16x256xf32>
    %389 = vector.broadcast %10 : vector<1x256xf32> to vector<16x256xf32>
    %390 = arith.mulf %388, %389 : vector<16x256xf32>
    %c16_i32_163 = arith.constant 16 : i32
    %391 = tpu.dynamic_rotate %383 by %c16_i32_163 dim 1 : vector<16x256xf32>, i32 -> vector<16x256xf32>
    %392 = vector.broadcast %15 : vector<1x256xf32> to vector<16x256xf32>
    %393 = arith.mulf %391, %392 : vector<16x256xf32>
    %c15_i32_164 = arith.constant 15 : i32
    %394 = tpu.dynamic_rotate %383 by %c15_i32_164 dim 1 : vector<16x256xf32>, i32 -> vector<16x256xf32>
    %395 = vector.broadcast %23 : vector<1x256xf32> to vector<16x256xf32>
    %396 = arith.mulf %394, %395 : vector<16x256xf32>
    %c1_i32_165 = arith.constant 1 : i32
    %397 = tpu.dynamic_rotate %383 by %c1_i32_165 dim 1 : vector<16x256xf32>, i32 -> vector<16x256xf32>
    %398 = vector.broadcast %28 : vector<1x256xf32> to vector<16x256xf32>
    %399 = arith.mulf %397, %398 : vector<16x256xf32>
    %c255_i32_166 = arith.constant 255 : i32
    %400 = tpu.dynamic_rotate %383 by %c255_i32_166 dim 1 : vector<16x256xf32>, i32 -> vector<16x256xf32>
    %401 = vector.broadcast %33 : vector<1x256xf32> to vector<16x256xf32>
    %402 = arith.mulf %400, %401 : vector<16x256xf32>
    %c241_i32_167 = arith.constant 241 : i32
    %403 = tpu.dynamic_rotate %383 by %c241_i32_167 dim 1 : vector<16x256xf32>, i32 -> vector<16x256xf32>
    %404 = vector.broadcast %41 : vector<1x256xf32> to vector<16x256xf32>
    %405 = arith.mulf %403, %404 : vector<16x256xf32>
    %c240_i32_168 = arith.constant 240 : i32
    %406 = tpu.dynamic_rotate %383 by %c240_i32_168 dim 1 : vector<16x256xf32>, i32 -> vector<16x256xf32>
    %407 = vector.broadcast %46 : vector<1x256xf32> to vector<16x256xf32>
    %408 = arith.mulf %406, %407 : vector<16x256xf32>
    %c239_i32_169 = arith.constant 239 : i32
    %409 = tpu.dynamic_rotate %383 by %c239_i32_169 dim 1 : vector<16x256xf32>, i32 -> vector<16x256xf32>
    %410 = vector.broadcast %54 : vector<1x256xf32> to vector<16x256xf32>
    %411 = arith.mulf %409, %410 : vector<16x256xf32>
    %412 = tpu.concatenate %390, %393, %396, %399, %383, %402, %405, %408, %411 in 0 : vector<16x256xf32>, vector<16x256xf32>, vector<16x256xf32>, vector<16x256xf32>, vector<16x256xf32>, vector<16x256xf32>, vector<16x256xf32>, vector<16x256xf32>, vector<16x256xf32> -> vector<144x256xf32>
    %cst_170 = arith.constant dense<0.000000e+00> : vector<8x256xf32>
    %413 = tpu.matmul %385, %412, %cst_170 {dimension_numbers = #tpu.dot_dimension_numbers<[1], [0], [0], [1], [0, 0, 1, 1], [], []>} : vector<8x144xf32>, vector<144x256xf32>, vector<8x256xf32> -> vector<8x256xf32>
    %414 = vector.broadcast %387 : vector<8x1xf32> to vector<8x256xf32>
    %415 = arith.addf %413, %414 : vector<8x256xf32>
    %cst_171 = arith.constant 0.000000e+00 : f32
    %416 = vector.broadcast %cst_171 : f32 to vector<8x256xf32>
    %417 = arith.maximumf %415, %416 : vector<8x256xf32>
    %c1_172 = arith.constant 1 : index
    %c0_173 = arith.constant 0 : index
    %c0_174 = arith.constant 0 : index
    %418 = vector.load %arg8[%c1_172, %c0_173, %c0_174] : memref<3x8x72xf32, #tpu.memory_space<vmem>>, vector<1x8x72xf32>
    %419 = vector.shape_cast %418 : vector<1x8x72xf32> to vector<8x72xf32>
    %c1_175 = arith.constant 1 : index
    %c0_176 = arith.constant 0 : index
    %c0_177 = arith.constant 0 : index
    %420 = vector.load %arg9[%c1_175, %c0_176, %c0_177] : memref<3x8x1xf32, #tpu.memory_space<vmem>>, vector<1x8x1xf32>
    %421 = vector.shape_cast %420 : vector<1x8x1xf32> to vector<8x1xf32>
    %c17_i32_178 = arith.constant 17 : i32
    %422 = tpu.dynamic_rotate %417 by %c17_i32_178 dim 1 : vector<8x256xf32>, i32 -> vector<8x256xf32>
    %423 = vector.broadcast %10 : vector<1x256xf32> to vector<8x256xf32>
    %424 = arith.mulf %422, %423 : vector<8x256xf32>
    %c16_i32_179 = arith.constant 16 : i32
    %425 = tpu.dynamic_rotate %417 by %c16_i32_179 dim 1 : vector<8x256xf32>, i32 -> vector<8x256xf32>
    %426 = vector.broadcast %15 : vector<1x256xf32> to vector<8x256xf32>
    %427 = arith.mulf %425, %426 : vector<8x256xf32>
    %c15_i32_180 = arith.constant 15 : i32
    %428 = tpu.dynamic_rotate %417 by %c15_i32_180 dim 1 : vector<8x256xf32>, i32 -> vector<8x256xf32>
    %429 = vector.broadcast %23 : vector<1x256xf32> to vector<8x256xf32>
    %430 = arith.mulf %428, %429 : vector<8x256xf32>
    %c1_i32_181 = arith.constant 1 : i32
    %431 = tpu.dynamic_rotate %417 by %c1_i32_181 dim 1 : vector<8x256xf32>, i32 -> vector<8x256xf32>
    %432 = vector.broadcast %28 : vector<1x256xf32> to vector<8x256xf32>
    %433 = arith.mulf %431, %432 : vector<8x256xf32>
    %c255_i32_182 = arith.constant 255 : i32
    %434 = tpu.dynamic_rotate %417 by %c255_i32_182 dim 1 : vector<8x256xf32>, i32 -> vector<8x256xf32>
    %435 = vector.broadcast %33 : vector<1x256xf32> to vector<8x256xf32>
    %436 = arith.mulf %434, %435 : vector<8x256xf32>
    %c241_i32_183 = arith.constant 241 : i32
    %437 = tpu.dynamic_rotate %417 by %c241_i32_183 dim 1 : vector<8x256xf32>, i32 -> vector<8x256xf32>
    %438 = vector.broadcast %41 : vector<1x256xf32> to vector<8x256xf32>
    %439 = arith.mulf %437, %438 : vector<8x256xf32>
    %c240_i32_184 = arith.constant 240 : i32
    %440 = tpu.dynamic_rotate %417 by %c240_i32_184 dim 1 : vector<8x256xf32>, i32 -> vector<8x256xf32>
    %441 = vector.broadcast %46 : vector<1x256xf32> to vector<8x256xf32>
    %442 = arith.mulf %440, %441 : vector<8x256xf32>
    %c239_i32_185 = arith.constant 239 : i32
    %443 = tpu.dynamic_rotate %417 by %c239_i32_185 dim 1 : vector<8x256xf32>, i32 -> vector<8x256xf32>
    %444 = vector.broadcast %54 : vector<1x256xf32> to vector<8x256xf32>
    %445 = arith.mulf %443, %444 : vector<8x256xf32>
    %446 = tpu.concatenate %424, %427, %430, %433, %417, %436, %439, %442, %445 in 0 : vector<8x256xf32>, vector<8x256xf32>, vector<8x256xf32>, vector<8x256xf32>, vector<8x256xf32>, vector<8x256xf32>, vector<8x256xf32>, vector<8x256xf32>, vector<8x256xf32> -> vector<72x256xf32>
    %cst_186 = arith.constant dense<0.000000e+00> : vector<8x256xf32>
    %447 = tpu.matmul %419, %446, %cst_186 {dimension_numbers = #tpu.dot_dimension_numbers<[1], [0], [0], [1], [0, 0, 1, 1], [], []>} : vector<8x72xf32>, vector<72x256xf32>, vector<8x256xf32> -> vector<8x256xf32>
    %448 = vector.broadcast %421 : vector<8x1xf32> to vector<8x256xf32>
    %449 = arith.addf %447, %448 : vector<8x256xf32>
    %450 = arith.negf %449 : vector<8x256xf32>
    %451 = math.exp %450 : vector<8x256xf32>
    %cst_187 = arith.constant 1.000000e+00 : f32
    %452 = vector.broadcast %cst_187 : f32 to vector<8x256xf32>
    %453 = arith.addf %452, %451 : vector<8x256xf32>
    %454 = arith.divf %452, %453 : vector<8x256xf32>
    %455 = vector.extract_strided_slice %454 {offsets = [0, 0], sizes = [3, 256], strides = [1, 1]} : vector<8x256xf32> to vector<3x256xf32>
    %456 = vector.extract_strided_slice %372 {offsets = [0, 0], sizes = [6, 256], strides = [1, 1]} : vector<8x256xf32> to vector<6x256xf32>
    %457 = tpu.concatenate %456, %455 in 0 : vector<6x256xf32>, vector<3x256xf32> -> vector<9x256xf32>
    %458 = vector.extract_strided_slice %372 {offsets = [0, 0], sizes = [6, 256], strides = [1, 1]} : vector<8x256xf32> to vector<6x256xf32>
    %cst_188 = arith.constant 0.000000e+00 : f32
    %459 = vector.broadcast %cst_188 : f32 to vector<4x256xf32>
    %460 = tpu.concatenate %56, %458, %455, %459 in 0 : vector<3x256xf32>, vector<6x256xf32>, vector<3x256xf32>, vector<4x256xf32> -> vector<16x256xf32>
    %c3 = arith.constant 3 : index
    %c0_189 = arith.constant 0 : index
    %c0_190 = arith.constant 0 : index
    %461 = vector.load %arg2[%c3, %c0_189, %c0_190] : memref<4x16x144xf32, #tpu.memory_space<vmem>>, vector<1x16x144xf32>
    %462 = vector.shape_cast %461 : vector<1x16x144xf32> to vector<16x144xf32>
    %c3_191 = arith.constant 3 : index
    %c0_192 = arith.constant 0 : index
    %c0_193 = arith.constant 0 : index
    %463 = vector.load %arg3[%c3_191, %c0_192, %c0_193] : memref<4x16x1xf32, #tpu.memory_space<vmem>>, vector<1x16x1xf32>
    %464 = vector.shape_cast %463 : vector<1x16x1xf32> to vector<16x1xf32>
    %c17_i32_194 = arith.constant 17 : i32
    %465 = tpu.dynamic_rotate %460 by %c17_i32_194 dim 1 : vector<16x256xf32>, i32 -> vector<16x256xf32>
    %466 = vector.broadcast %10 : vector<1x256xf32> to vector<16x256xf32>
    %467 = arith.mulf %465, %466 : vector<16x256xf32>
    %c16_i32_195 = arith.constant 16 : i32
    %468 = tpu.dynamic_rotate %460 by %c16_i32_195 dim 1 : vector<16x256xf32>, i32 -> vector<16x256xf32>
    %469 = vector.broadcast %15 : vector<1x256xf32> to vector<16x256xf32>
    %470 = arith.mulf %468, %469 : vector<16x256xf32>
    %c15_i32_196 = arith.constant 15 : i32
    %471 = tpu.dynamic_rotate %460 by %c15_i32_196 dim 1 : vector<16x256xf32>, i32 -> vector<16x256xf32>
    %472 = vector.broadcast %23 : vector<1x256xf32> to vector<16x256xf32>
    %473 = arith.mulf %471, %472 : vector<16x256xf32>
    %c1_i32_197 = arith.constant 1 : i32
    %474 = tpu.dynamic_rotate %460 by %c1_i32_197 dim 1 : vector<16x256xf32>, i32 -> vector<16x256xf32>
    %475 = vector.broadcast %28 : vector<1x256xf32> to vector<16x256xf32>
    %476 = arith.mulf %474, %475 : vector<16x256xf32>
    %c255_i32_198 = arith.constant 255 : i32
    %477 = tpu.dynamic_rotate %460 by %c255_i32_198 dim 1 : vector<16x256xf32>, i32 -> vector<16x256xf32>
    %478 = vector.broadcast %33 : vector<1x256xf32> to vector<16x256xf32>
    %479 = arith.mulf %477, %478 : vector<16x256xf32>
    %c241_i32_199 = arith.constant 241 : i32
    %480 = tpu.dynamic_rotate %460 by %c241_i32_199 dim 1 : vector<16x256xf32>, i32 -> vector<16x256xf32>
    %481 = vector.broadcast %41 : vector<1x256xf32> to vector<16x256xf32>
    %482 = arith.mulf %480, %481 : vector<16x256xf32>
    %c240_i32_200 = arith.constant 240 : i32
    %483 = tpu.dynamic_rotate %460 by %c240_i32_200 dim 1 : vector<16x256xf32>, i32 -> vector<16x256xf32>
    %484 = vector.broadcast %46 : vector<1x256xf32> to vector<16x256xf32>
    %485 = arith.mulf %483, %484 : vector<16x256xf32>
    %c239_i32_201 = arith.constant 239 : i32
    %486 = tpu.dynamic_rotate %460 by %c239_i32_201 dim 1 : vector<16x256xf32>, i32 -> vector<16x256xf32>
    %487 = vector.broadcast %54 : vector<1x256xf32> to vector<16x256xf32>
    %488 = arith.mulf %486, %487 : vector<16x256xf32>
    %489 = tpu.concatenate %467, %470, %473, %476, %460, %479, %482, %485, %488 in 0 : vector<16x256xf32>, vector<16x256xf32>, vector<16x256xf32>, vector<16x256xf32>, vector<16x256xf32>, vector<16x256xf32>, vector<16x256xf32>, vector<16x256xf32>, vector<16x256xf32> -> vector<144x256xf32>
    %cst_202 = arith.constant dense<0.000000e+00> : vector<16x256xf32>
    %490 = tpu.matmul %462, %489, %cst_202 {dimension_numbers = #tpu.dot_dimension_numbers<[1], [0], [0], [1], [0, 0, 1, 1], [], []>} : vector<16x144xf32>, vector<144x256xf32>, vector<16x256xf32> -> vector<16x256xf32>
    %491 = vector.broadcast %464 : vector<16x1xf32> to vector<16x256xf32>
    %492 = arith.addf %490, %491 : vector<16x256xf32>
    %cst_203 = arith.constant 0.000000e+00 : f32
    %493 = vector.broadcast %cst_203 : f32 to vector<16x256xf32>
    %494 = arith.maximumf %492, %493 : vector<16x256xf32>
    %c3_204 = arith.constant 3 : index
    %c0_205 = arith.constant 0 : index
    %c0_206 = arith.constant 0 : index
    %495 = vector.load %arg4[%c3_204, %c0_205, %c0_206] : memref<4x8x144xf32, #tpu.memory_space<vmem>>, vector<1x8x144xf32>
    %496 = vector.shape_cast %495 : vector<1x8x144xf32> to vector<8x144xf32>
    %c3_207 = arith.constant 3 : index
    %c0_208 = arith.constant 0 : index
    %c0_209 = arith.constant 0 : index
    %497 = vector.load %arg5[%c3_207, %c0_208, %c0_209] : memref<4x8x1xf32, #tpu.memory_space<vmem>>, vector<1x8x1xf32>
    %498 = vector.shape_cast %497 : vector<1x8x1xf32> to vector<8x1xf32>
    %c17_i32_210 = arith.constant 17 : i32
    %499 = tpu.dynamic_rotate %494 by %c17_i32_210 dim 1 : vector<16x256xf32>, i32 -> vector<16x256xf32>
    %500 = vector.broadcast %10 : vector<1x256xf32> to vector<16x256xf32>
    %501 = arith.mulf %499, %500 : vector<16x256xf32>
    %c16_i32_211 = arith.constant 16 : i32
    %502 = tpu.dynamic_rotate %494 by %c16_i32_211 dim 1 : vector<16x256xf32>, i32 -> vector<16x256xf32>
    %503 = vector.broadcast %15 : vector<1x256xf32> to vector<16x256xf32>
    %504 = arith.mulf %502, %503 : vector<16x256xf32>
    %c15_i32_212 = arith.constant 15 : i32
    %505 = tpu.dynamic_rotate %494 by %c15_i32_212 dim 1 : vector<16x256xf32>, i32 -> vector<16x256xf32>
    %506 = vector.broadcast %23 : vector<1x256xf32> to vector<16x256xf32>
    %507 = arith.mulf %505, %506 : vector<16x256xf32>
    %c1_i32_213 = arith.constant 1 : i32
    %508 = tpu.dynamic_rotate %494 by %c1_i32_213 dim 1 : vector<16x256xf32>, i32 -> vector<16x256xf32>
    %509 = vector.broadcast %28 : vector<1x256xf32> to vector<16x256xf32>
    %510 = arith.mulf %508, %509 : vector<16x256xf32>
    %c255_i32_214 = arith.constant 255 : i32
    %511 = tpu.dynamic_rotate %494 by %c255_i32_214 dim 1 : vector<16x256xf32>, i32 -> vector<16x256xf32>
    %512 = vector.broadcast %33 : vector<1x256xf32> to vector<16x256xf32>
    %513 = arith.mulf %511, %512 : vector<16x256xf32>
    %c241_i32_215 = arith.constant 241 : i32
    %514 = tpu.dynamic_rotate %494 by %c241_i32_215 dim 1 : vector<16x256xf32>, i32 -> vector<16x256xf32>
    %515 = vector.broadcast %41 : vector<1x256xf32> to vector<16x256xf32>
    %516 = arith.mulf %514, %515 : vector<16x256xf32>
    %c240_i32_216 = arith.constant 240 : i32
    %517 = tpu.dynamic_rotate %494 by %c240_i32_216 dim 1 : vector<16x256xf32>, i32 -> vector<16x256xf32>
    %518 = vector.broadcast %46 : vector<1x256xf32> to vector<16x256xf32>
    %519 = arith.mulf %517, %518 : vector<16x256xf32>
    %c239_i32_217 = arith.constant 239 : i32
    %520 = tpu.dynamic_rotate %494 by %c239_i32_217 dim 1 : vector<16x256xf32>, i32 -> vector<16x256xf32>
    %521 = vector.broadcast %54 : vector<1x256xf32> to vector<16x256xf32>
    %522 = arith.mulf %520, %521 : vector<16x256xf32>
    %523 = tpu.concatenate %501, %504, %507, %510, %494, %513, %516, %519, %522 in 0 : vector<16x256xf32>, vector<16x256xf32>, vector<16x256xf32>, vector<16x256xf32>, vector<16x256xf32>, vector<16x256xf32>, vector<16x256xf32>, vector<16x256xf32>, vector<16x256xf32> -> vector<144x256xf32>
    %cst_218 = arith.constant dense<0.000000e+00> : vector<8x256xf32>
    %524 = tpu.matmul %496, %523, %cst_218 {dimension_numbers = #tpu.dot_dimension_numbers<[1], [0], [0], [1], [0, 0, 1, 1], [], []>} : vector<8x144xf32>, vector<144x256xf32>, vector<8x256xf32> -> vector<8x256xf32>
    %525 = vector.broadcast %498 : vector<8x1xf32> to vector<8x256xf32>
    %526 = arith.addf %524, %525 : vector<8x256xf32>
    %527 = arith.negf %526 : vector<8x256xf32>
    %528 = math.exp %527 : vector<8x256xf32>
    %cst_219 = arith.constant 1.000000e+00 : f32
    %529 = vector.broadcast %cst_219 : f32 to vector<8x256xf32>
    %530 = arith.addf %529, %528 : vector<8x256xf32>
    %531 = arith.divf %529, %530 : vector<8x256xf32>
    %532 = vector.extract_strided_slice %531 {offsets = [0, 0], sizes = [3, 256], strides = [1, 1]} : vector<8x256xf32> to vector<3x256xf32>
    %533 = vector.extract_strided_slice %531 {offsets = [3, 0], sizes = [3, 256], strides = [1, 1]} : vector<8x256xf32> to vector<3x256xf32>
    %534 = arith.subf %56, %532 : vector<3x256xf32>
    %cst_220 = arith.constant 5.000000e-02 : f32
    %535 = vector.broadcast %cst_220 : f32 to vector<3x256xf32>
    %536 = arith.maximumf %533, %535 : vector<3x256xf32>
    %537 = tpu.reciprocal %536 {approx = true} : vector<3x256xf32> -> vector<3x256xf32>
    %538 = arith.mulf %534, %537 : vector<3x256xf32>
    %539 = arith.addf %538, %532 : vector<3x256xf32>
    %540 = vector.extract_strided_slice %531 {offsets = [0, 0], sizes = [6, 256], strides = [1, 1]} : vector<8x256xf32> to vector<6x256xf32>
    %cst_221 = arith.constant 0.000000e+00 : f32
    %541 = vector.broadcast %cst_221 : f32 to vector<4x256xf32>
    %542 = tpu.concatenate %56, %540, %539, %541 in 0 : vector<3x256xf32>, vector<6x256xf32>, vector<3x256xf32>, vector<4x256xf32> -> vector<16x256xf32>
    %c2_222 = arith.constant 2 : index
    %c0_223 = arith.constant 0 : index
    %c0_224 = arith.constant 0 : index
    %543 = vector.load %arg6[%c2_222, %c0_223, %c0_224] : memref<3x8x144xf32, #tpu.memory_space<vmem>>, vector<1x8x144xf32>
    %544 = vector.shape_cast %543 : vector<1x8x144xf32> to vector<8x144xf32>
    %c2_225 = arith.constant 2 : index
    %c0_226 = arith.constant 0 : index
    %c0_227 = arith.constant 0 : index
    %545 = vector.load %arg7[%c2_225, %c0_226, %c0_227] : memref<3x8x1xf32, #tpu.memory_space<vmem>>, vector<1x8x1xf32>
    %546 = vector.shape_cast %545 : vector<1x8x1xf32> to vector<8x1xf32>
    %c17_i32_228 = arith.constant 17 : i32
    %547 = tpu.dynamic_rotate %542 by %c17_i32_228 dim 1 : vector<16x256xf32>, i32 -> vector<16x256xf32>
    %548 = vector.broadcast %10 : vector<1x256xf32> to vector<16x256xf32>
    %549 = arith.mulf %547, %548 : vector<16x256xf32>
    %c16_i32_229 = arith.constant 16 : i32
    %550 = tpu.dynamic_rotate %542 by %c16_i32_229 dim 1 : vector<16x256xf32>, i32 -> vector<16x256xf32>
    %551 = vector.broadcast %15 : vector<1x256xf32> to vector<16x256xf32>
    %552 = arith.mulf %550, %551 : vector<16x256xf32>
    %c15_i32_230 = arith.constant 15 : i32
    %553 = tpu.dynamic_rotate %542 by %c15_i32_230 dim 1 : vector<16x256xf32>, i32 -> vector<16x256xf32>
    %554 = vector.broadcast %23 : vector<1x256xf32> to vector<16x256xf32>
    %555 = arith.mulf %553, %554 : vector<16x256xf32>
    %c1_i32_231 = arith.constant 1 : i32
    %556 = tpu.dynamic_rotate %542 by %c1_i32_231 dim 1 : vector<16x256xf32>, i32 -> vector<16x256xf32>
    %557 = vector.broadcast %28 : vector<1x256xf32> to vector<16x256xf32>
    %558 = arith.mulf %556, %557 : vector<16x256xf32>
    %c255_i32_232 = arith.constant 255 : i32
    %559 = tpu.dynamic_rotate %542 by %c255_i32_232 dim 1 : vector<16x256xf32>, i32 -> vector<16x256xf32>
    %560 = vector.broadcast %33 : vector<1x256xf32> to vector<16x256xf32>
    %561 = arith.mulf %559, %560 : vector<16x256xf32>
    %c241_i32_233 = arith.constant 241 : i32
    %562 = tpu.dynamic_rotate %542 by %c241_i32_233 dim 1 : vector<16x256xf32>, i32 -> vector<16x256xf32>
    %563 = vector.broadcast %41 : vector<1x256xf32> to vector<16x256xf32>
    %564 = arith.mulf %562, %563 : vector<16x256xf32>
    %c240_i32_234 = arith.constant 240 : i32
    %565 = tpu.dynamic_rotate %542 by %c240_i32_234 dim 1 : vector<16x256xf32>, i32 -> vector<16x256xf32>
    %566 = vector.broadcast %46 : vector<1x256xf32> to vector<16x256xf32>
    %567 = arith.mulf %565, %566 : vector<16x256xf32>
    %c239_i32_235 = arith.constant 239 : i32
    %568 = tpu.dynamic_rotate %542 by %c239_i32_235 dim 1 : vector<16x256xf32>, i32 -> vector<16x256xf32>
    %569 = vector.broadcast %54 : vector<1x256xf32> to vector<16x256xf32>
    %570 = arith.mulf %568, %569 : vector<16x256xf32>
    %571 = tpu.concatenate %549, %552, %555, %558, %542, %561, %564, %567, %570 in 0 : vector<16x256xf32>, vector<16x256xf32>, vector<16x256xf32>, vector<16x256xf32>, vector<16x256xf32>, vector<16x256xf32>, vector<16x256xf32>, vector<16x256xf32>, vector<16x256xf32> -> vector<144x256xf32>
    %cst_236 = arith.constant dense<0.000000e+00> : vector<8x256xf32>
    %572 = tpu.matmul %544, %571, %cst_236 {dimension_numbers = #tpu.dot_dimension_numbers<[1], [0], [0], [1], [0, 0, 1, 1], [], []>} : vector<8x144xf32>, vector<144x256xf32>, vector<8x256xf32> -> vector<8x256xf32>
    %573 = vector.broadcast %546 : vector<8x1xf32> to vector<8x256xf32>
    %574 = arith.addf %572, %573 : vector<8x256xf32>
    %cst_237 = arith.constant 0.000000e+00 : f32
    %575 = vector.broadcast %cst_237 : f32 to vector<8x256xf32>
    %576 = arith.maximumf %574, %575 : vector<8x256xf32>
    %c2_238 = arith.constant 2 : index
    %c0_239 = arith.constant 0 : index
    %c0_240 = arith.constant 0 : index
    %577 = vector.load %arg8[%c2_238, %c0_239, %c0_240] : memref<3x8x72xf32, #tpu.memory_space<vmem>>, vector<1x8x72xf32>
    %578 = vector.shape_cast %577 : vector<1x8x72xf32> to vector<8x72xf32>
    %c2_241 = arith.constant 2 : index
    %c0_242 = arith.constant 0 : index
    %c0_243 = arith.constant 0 : index
    %579 = vector.load %arg9[%c2_241, %c0_242, %c0_243] : memref<3x8x1xf32, #tpu.memory_space<vmem>>, vector<1x8x1xf32>
    %580 = vector.shape_cast %579 : vector<1x8x1xf32> to vector<8x1xf32>
    %c17_i32_244 = arith.constant 17 : i32
    %581 = tpu.dynamic_rotate %576 by %c17_i32_244 dim 1 : vector<8x256xf32>, i32 -> vector<8x256xf32>
    %582 = vector.broadcast %10 : vector<1x256xf32> to vector<8x256xf32>
    %583 = arith.mulf %581, %582 : vector<8x256xf32>
    %c16_i32_245 = arith.constant 16 : i32
    %584 = tpu.dynamic_rotate %576 by %c16_i32_245 dim 1 : vector<8x256xf32>, i32 -> vector<8x256xf32>
    %585 = vector.broadcast %15 : vector<1x256xf32> to vector<8x256xf32>
    %586 = arith.mulf %584, %585 : vector<8x256xf32>
    %c15_i32_246 = arith.constant 15 : i32
    %587 = tpu.dynamic_rotate %576 by %c15_i32_246 dim 1 : vector<8x256xf32>, i32 -> vector<8x256xf32>
    %588 = vector.broadcast %23 : vector<1x256xf32> to vector<8x256xf32>
    %589 = arith.mulf %587, %588 : vector<8x256xf32>
    %c1_i32_247 = arith.constant 1 : i32
    %590 = tpu.dynamic_rotate %576 by %c1_i32_247 dim 1 : vector<8x256xf32>, i32 -> vector<8x256xf32>
    %591 = vector.broadcast %28 : vector<1x256xf32> to vector<8x256xf32>
    %592 = arith.mulf %590, %591 : vector<8x256xf32>
    %c255_i32_248 = arith.constant 255 : i32
    %593 = tpu.dynamic_rotate %576 by %c255_i32_248 dim 1 : vector<8x256xf32>, i32 -> vector<8x256xf32>
    %594 = vector.broadcast %33 : vector<1x256xf32> to vector<8x256xf32>
    %595 = arith.mulf %593, %594 : vector<8x256xf32>
    %c241_i32_249 = arith.constant 241 : i32
    %596 = tpu.dynamic_rotate %576 by %c241_i32_249 dim 1 : vector<8x256xf32>, i32 -> vector<8x256xf32>
    %597 = vector.broadcast %41 : vector<1x256xf32> to vector<8x256xf32>
    %598 = arith.mulf %596, %597 : vector<8x256xf32>
    %c240_i32_250 = arith.constant 240 : i32
    %599 = tpu.dynamic_rotate %576 by %c240_i32_250 dim 1 : vector<8x256xf32>, i32 -> vector<8x256xf32>
    %600 = vector.broadcast %46 : vector<1x256xf32> to vector<8x256xf32>
    %601 = arith.mulf %599, %600 : vector<8x256xf32>
    %c239_i32_251 = arith.constant 239 : i32
    %602 = tpu.dynamic_rotate %576 by %c239_i32_251 dim 1 : vector<8x256xf32>, i32 -> vector<8x256xf32>
    %603 = vector.broadcast %54 : vector<1x256xf32> to vector<8x256xf32>
    %604 = arith.mulf %602, %603 : vector<8x256xf32>
    %605 = tpu.concatenate %583, %586, %589, %592, %576, %595, %598, %601, %604 in 0 : vector<8x256xf32>, vector<8x256xf32>, vector<8x256xf32>, vector<8x256xf32>, vector<8x256xf32>, vector<8x256xf32>, vector<8x256xf32>, vector<8x256xf32>, vector<8x256xf32> -> vector<72x256xf32>
    %cst_252 = arith.constant dense<0.000000e+00> : vector<8x256xf32>
    %606 = tpu.matmul %578, %605, %cst_252 {dimension_numbers = #tpu.dot_dimension_numbers<[1], [0], [0], [1], [0, 0, 1, 1], [], []>} : vector<8x72xf32>, vector<72x256xf32>, vector<8x256xf32> -> vector<8x256xf32>
    %607 = vector.broadcast %580 : vector<8x1xf32> to vector<8x256xf32>
    %608 = arith.addf %606, %607 : vector<8x256xf32>
    %609 = arith.negf %608 : vector<8x256xf32>
    %610 = math.exp %609 : vector<8x256xf32>
    %cst_253 = arith.constant 1.000000e+00 : f32
    %611 = vector.broadcast %cst_253 : f32 to vector<8x256xf32>
    %612 = arith.addf %611, %610 : vector<8x256xf32>
    %613 = arith.divf %611, %612 : vector<8x256xf32>
    %614 = vector.extract_strided_slice %613 {offsets = [0, 0], sizes = [3, 256], strides = [1, 1]} : vector<8x256xf32> to vector<3x256xf32>
    %615 = vector.extract_strided_slice %531 {offsets = [0, 0], sizes = [6, 256], strides = [1, 1]} : vector<8x256xf32> to vector<6x256xf32>
    %616 = tpu.concatenate %615, %614 in 0 : vector<6x256xf32>, vector<3x256xf32> -> vector<9x256xf32>
    %617 = tpu.concatenate %139, %298, %457, %616 in 0 : vector<9x256xf32>, vector<9x256xf32>, vector<9x256xf32>, vector<9x256xf32> -> vector<36x256xf32>
    %c0_254 = arith.constant 0 : index
    %c0_255 = arith.constant 0 : index
    %c0_256 = arith.constant 0 : index
    %618 = vector.load %arg10[%c0_254, %c0_255, %c0_256] : memref<1x36x256xf32, #tpu.memory_space<vmem>>, vector<1x36x256xf32>
    %619 = vector.shape_cast %618 : vector<1x36x256xf32> to vector<36x256xf32>
    %620 = vector.shape_cast %617 : vector<36x256xf32> to vector<1x36x256xf32>
    tpu.vector_store %arg10[%c0_254, %c0_255, %c0_256], %620 {strides = array<i32>} : memref<1x36x256xf32, #tpu.memory_space<vmem>>, vector<1x36x256xf32>,
    return
  }
  func.func @transform_0(%arg0: i32) -> (i32, i32, i32) {
    %c0_i32 = arith.constant 0 : i32
    %c0_i32_0 = arith.constant 0 : i32
    %c0_i32_1 = arith.constant 0 : i32
    return %arg0, %c0_i32, %c0_i32_0 : i32, i32, i32
  }
  func.func @transform_1(%arg0: i32) -> (i32, i32, i32) {
    %c0_i32 = arith.constant 0 : i32
    %c0_i32_0 = arith.constant 0 : i32
    %c0_i32_1 = arith.constant 0 : i32
    %c0_i32_2 = arith.constant 0 : i32
    return %c0_i32, %c0_i32_0, %c0_i32_1 : i32, i32, i32
  }
  func.func @transform_2(%arg0: i32) -> (i32, i32, i32) {
    %c0_i32 = arith.constant 0 : i32
    %c0_i32_0 = arith.constant 0 : i32
    %c0_i32_1 = arith.constant 0 : i32
    %c0_i32_2 = arith.constant 0 : i32
    return %c0_i32, %c0_i32_0, %c0_i32_1 : i32, i32, i32
  }
  func.func @transform_3(%arg0: i32) -> (i32, i32, i32) {
    %c0_i32 = arith.constant 0 : i32
    %c0_i32_0 = arith.constant 0 : i32
    %c0_i32_1 = arith.constant 0 : i32
    %c0_i32_2 = arith.constant 0 : i32
    return %c0_i32, %c0_i32_0, %c0_i32_1 : i32, i32, i32
  }
  func.func @transform_4(%arg0: i32) -> (i32, i32, i32) {
    %c0_i32 = arith.constant 0 : i32
    %c0_i32_0 = arith.constant 0 : i32
    %c0_i32_1 = arith.constant 0 : i32
    %c0_i32_2 = arith.constant 0 : i32
    return %c0_i32, %c0_i32_0, %c0_i32_1 : i32, i32, i32
  }
  func.func @transform_5(%arg0: i32) -> (i32, i32, i32) {
    %c0_i32 = arith.constant 0 : i32
    %c0_i32_0 = arith.constant 0 : i32
    %c0_i32_1 = arith.constant 0 : i32
    %c0_i32_2 = arith.constant 0 : i32
    return %c0_i32, %c0_i32_0, %c0_i32_1 : i32, i32, i32
  }
  func.func @transform_6(%arg0: i32) -> (i32, i32, i32) {
    %c0_i32 = arith.constant 0 : i32
    %c0_i32_0 = arith.constant 0 : i32
    %c0_i32_1 = arith.constant 0 : i32
    %c0_i32_2 = arith.constant 0 : i32
    return %c0_i32, %c0_i32_0, %c0_i32_1 : i32, i32, i32
  }
  func.func @transform_7(%arg0: i32) -> (i32, i32, i32) {
    %c0_i32 = arith.constant 0 : i32
    %c0_i32_0 = arith.constant 0 : i32
    %c0_i32_1 = arith.constant 0 : i32
    %c0_i32_2 = arith.constant 0 : i32
    return %c0_i32, %c0_i32_0, %c0_i32_1 : i32, i32, i32
  }
  func.func @transform_8(%arg0: i32) -> (i32, i32, i32) {
    %c0_i32 = arith.constant 0 : i32
    %c0_i32_0 = arith.constant 0 : i32
    %c0_i32_1 = arith.constant 0 : i32
    %c0_i32_2 = arith.constant 0 : i32
    return %c0_i32, %c0_i32_0, %c0_i32_1 : i32, i32, i32
  }
  func.func @transform_9(%arg0: i32) -> (i32, i32, i32) {
    %c0_i32 = arith.constant 0 : i32
    %c0_i32_0 = arith.constant 0 : i32
    %c0_i32_1 = arith.constant 0 : i32
    return %arg0, %c0_i32, %c0_i32_0 : i32, i32, i32
  }
}

</mosaic_0001>

<bundles_post_ra>
// kernel: dehaze_net_forward.1
= control target key start
LH: loop header
LB: loop body
LE: loop exit
PB: predicated region body
PF: predicated region fallthrough
CT: control target
= control target key end

     0   :  { %s4192_s30 = smov 0   ;;  %s6818_s0 = inlined_call_operand.vmem [shape: f32[2,3,256], index: 0, kind: input, shape index: {}]   ;;  %s6819_s1 = inlined_call_operand.vmem [shape: f32[4,16,144], index: 1, kind: input, shape index: {}]   ;;  %s6820_s2 = inlined_call_operand.vmem [shape: f32[4,16,1], index: 2, kind: input, shape index: {}]   ;;  %s6821_s3 = inlined_call_operand.vmem [shape: f32[4,8,144], index: 3, kind: input, shape index: {}]   ;;  %s6822_s4 = inlined_call_operand.vmem [shape: f32[4,8,1], index: 4, kind: input, shape index: {}]   ;;  %s6823_s5 = inlined_call_operand.vmem [shape: f32[3,8,144], index: 5, kind: input, shape index: {}]   ;;  %s6824_s6 = inlined_call_operand.vmem [shape: f32[3,8,1], index: 6, kind: input, shape index: {}]   ;;  %s6825_s7 = inlined_call_operand.vmem [shape: f32[3,8,72], index: 7, kind: input, shape index: {}]   ;;  %s6826_s8 = inlined_call_operand.vmem [shape: f32[3,8,1], index: 8, kind: input, shape index: {}]   ;;  %s6827_s9 = inlined_call_operand.vmem [shape: f32[2,36,256], index: 9, kind: output, shape index: {}]  }
   0x1 LB: > { %s3469_s10 = sadd.s32 4294967295, %s4129_s30   ;;  %p3473_p0 = scmp.ge.s32.totalorder %s4129_s30, 1  ;;  %s4129_s30 = sphi %s4192_s30, %s19_s30  }
   0x2   : > { %p287_p1 = scmp.lt.s32.totalorder %s4129_s30, 3 }
   0x4   : > { %p288_p2 = pnand %p3473_p0, %p287_p1 }
   0x5   : > { %p323_p3 = scmp.lt.s32.totalorder (!%p288_p2), %s3469_s10, 1  ;;  %v4131_v0 = vmov (!%p288_p2), 0.0   ;;  %s4132_s11 = smov (!%p288_p2), 17   ;;  %vm374_vm0 = vcmask (!%p288_p2), 1042432   ;;  %v378_v5 = vld [vmem:[%s6819_s1 + $0x8] sm:$0xff] (!%p288_p2)  ;;  %vm497_vm1 = vcmask (!%p288_p2), 130048   ;;  %v333_v9 = vlaneseq (!%p288_p2) }
   0x6   : > { %291 = sbr.rel (%p288_p2) target bundleno = 5759 (0x167f), region = 56  ;;  %385 = vrot.lane.b32.xlu1 (!%p288_p2), %v4131_v0, %s4132_s11  ;;  %s4133_s16 = smov (!%p288_p2), 16   ;;  %3479 = vmatprep.mubr.msk.f32.mxu0 (!%p288_p2), %vm497_vm1, %v378_v5  ;;  %v382_v6 = vld [vmem:[%s6820_s2 + $0x8] sm:$0xff] (!%p288_p2)  ;;  %v4140_v7 = vmov (!%p288_p2), 0   ;;  %v381_v8 = vld [vmem:[%s6820_s2] sm:$0xff] (!%p288_p2)  ;;  %vm4141_vm15 = vmmov (!%p288_p2), 1  }
   0x7   : > { %s4134_s17 = smov (!%p288_p2), 15   ;;  %s4135_s18 = smov (!%p288_p2), 1   ;;  %4045 = vset.pattern.permute.xlu0 (!%p288_p2), %v4140_v7  ;;  %4046 = vset.pattern.permute.xlu1 (!%p288_p2), %v4140_v7  ;;  %v4261_v10 = vand.u32 (!%p288_p2), 127, %v333_v9 }
   0x8   : > { %s4136_s19 = smov (!%p288_p2), 127   ;;  %s4137_s20 = smov (!%p288_p2), 113  }
   0x9   : > { %s4138_s21 = smov (!%p288_p2), 112   ;;  %s4139_s22 = smov (!%p288_p2), 111   ;;  %v4264_v11 = vadd.s32 (!%p288_p2), 128, %v4261_v10  ;;  %v336_v13 = vand.u32 (!%p288_p2), 15, %v4261_v10  ;;  %vm338_vm2 = vcmp.ge.s32.totalorder (!%p288_p2), %v4261_v10, 16  ;;  %vm389_vm6 = vcmp.lt.s32.totalorder (!%p288_p2), %v4261_v10, 17 }
   0xa   : > { %398 = vrot.lane.b32.xlu1 (!%p288_p2), %v4131_v0, %s4133_s16  ;;  %vm402_vm7 = vcmp.lt.s32.totalorder (!%p288_p2), %v4261_v10, 16  ;;  %v4302_v30 = vsel (!%p288_p2), %vm338_vm2, 1.0, %v4131_v0  ;;  %vm415_vm10 = vcmp.lt.s32.totalorder (!%p288_p2), %v4261_v10, 15  ;;  %vm428_vm12 = vcmp.lt.s32.totalorder (!%p288_p2), %v4261_v10, 1 }
   0xb   : > { %v337_v14 = vand.u32 (!%p288_p2), 15, %v4264_v11  ;;  %vm4269_vm3 = vcmp.ge.s32.totalorder (!%p288_p2), %v336_v13, 1  ;;  %vm4304_vm8 = vcmp.lt.s32.totalorder (!%p288_p2), %v336_v13, 15  ;;  %vm441_vm13 = vcmp.lt.s32.totalorder (!%p288_p2), %v4261_v10, 127 }
   0xc   : > { %vm342_vm5 = vmand (!%p288_p2), %vm338_vm2, %vm4269_vm3  ;;  %v4338_v49 = vsel (!%p288_p2), %vm4269_vm3, 1.0, %v4131_v0  ;;  %vm359_vm14 = vcmp.lt.s32.totalorder (!%p288_p2), %v4264_v11, 240 }
   0xd   : > { %s6845_s10 = smov (!%p323_p3, %s3469_s10), 1  ;;  %vm4273_vm4 = vcmp.ge.s32.totalorder %v337_v14, 1  ;;  %v4288_v21 = vsel %vm342_vm5, 1.0, %v4131_v0  ;;  %vm4314_vm9 = vcmp.lt.s32.totalorder %v337_v14, 15  ;;  %vm350_vm11 = vmand %vm338_vm2, %vm4304_vm8  ;;  %vm467_vm5 = vcmp.lt.s32.totalorder %v4261_v10, 112 }
   0xe   : > { %s3566_s12 = sshll.u32 %s6845_s10, 3  ;;  %v4285_v20 = vsel %vm4273_vm4, 1.0, %v4131_v0  ;;  %v4326_v45 = vsel %vm4314_vm9, 1.0, %v4131_v0  ;;  %v4329_v46 = vsel %vm350_vm11, 1.0, %v4131_v0  ;;  %vm4359_vm2 = vmpackc.low %vm4141_vm15, %vm374_vm0  ;;  %vm480_vm11 = vcmp.lt.s32.totalorder %v4261_v10, 111  ;;  %s4025_s13 = smul.u32 80, %s6845_s10 }
   0xf   : > { %s4208_s15 = scalar_lea.vmem %s6818_s0, %s3566_s12  ;;  %vm361_vm3 = vmand %vm359_vm14, %vm4273_vm4  ;;  %vm454_vm4 = vcmp.lt.s32.totalorder %v4261_v10, 113 }
  0x10   : > { %v4213_v1 = vld [vmem:[%s4208_s15] sm:$0x77]  ;;  %s4679_s24 = scalar_lea.vmem %s6827_s9, %s4025_s13 }
  0x11   : > { %v375_v2 = vsel %vm374_vm0, %v4213_v1, 0.0  ;;  %v4219_v3 = vcombine.high %v4213_v1, %v4213_v1  ;;  %v3586_v14 = vpack.c.bf16 %v4131_v0, %v4213_v1 }
  0x12   : > { %383 = vrot.lane.b32.xlu0 %v375_v2, %s4132_s11  ;;  %396 = vrot.lane.b32.xlu1 %v375_v2, %s4133_s16 }
  0x13   : > { %v376_v4 = vsel %vm374_vm0, %v4219_v3, 0.0 }
  0x16   : > { %387 = vrot.lane.b32.xlu0 %v376_v4, %s4132_s11  ;;  %413 = vrot.lane.b32.xlu1 %v376_v4, %s4134_s17 }
  0x1a   : > { %400 = vrot.lane.b32.xlu0 %v376_v4, %s4133_s16  ;;  %422 = vrot.lane.b32.xlu1 %v375_v2, %s4135_s18 }
  0x1e   : > { %409 = vrot.lane.b32.xlu0 %v375_v2, %s4134_s17  ;;  %424 = vrot.lane.b32.xlu1 %v4131_v0, %s4135_s18 }
  0x22   : > { %411 = vrot.lane.b32.xlu0 %v4131_v0, %s4134_s17  ;;  %439 = vrot.lane.b32.xlu1 %v376_v4, %s4136_s19 }
  0x26   : > { %426 = vrot.lane.b32.xlu0 %v376_v4, %s4135_s18  ;;  %448 = vrot.lane.b32.xlu1 %v375_v2, %s4137_s20 }
  0x2a   : > { %435 = vrot.lane.b32.xlu0 %v375_v2, %s4136_s19  ;;  %450 = vrot.lane.b32.xlu1 %v4131_v0, %s4137_s20 }
  0x2e   : > { %437 = vrot.lane.b32.xlu0 %v4131_v0, %s4136_s19  ;;  %465 = vrot.lane.b32.xlu1 %v376_v4, %s4138_s21 }
  0x32   : > { %452 = vrot.lane.b32.xlu0 %v376_v4, %s4137_s20  ;;  %474 = vrot.lane.b32.xlu1 %v375_v2, %s4139_s22 }
  0x36   : > { %461 = vrot.lane.b32.xlu0 %v375_v2, %s4138_s21  ;;  %476 = vrot.lane.b32.xlu1 %v4131_v0, %s4139_s22 }
  0x3a   : > { %463 = vrot.lane.b32.xlu0 %v4131_v0, %s4138_s21  ;;  %494 = vperm.xlu1 %4046, %v382_v6  }
  0x3e   : > { %478 = vrot.lane.b32.xlu0 %v376_v4, %s4139_s22 }
  0x42   : > { %489 = vperm.xlu0 %4045, %v381_v8   ;;  %v3583_v8 = vpack.c.bf16 %v4131_v0, %v4219_v3 }
  0x78   : > { %v386_v12 = vpop.permute.xlu1 %385 }
  0x79   : > { %v395_v27 = vmul.f32 %v386_v12, %v4285_v20  ;;  %v394_v29 = vmul.f32 %v386_v12, %v4288_v21 }
  0x7c   : > { %v399_v15 = vpop.permute.xlu1 %398 }
  0x7d   : > { %v407_v38 = vmul.f32 %v399_v15, %v4302_v30 }
  0x84   : > { %v384_v17 = vpop.permute.xlu0 %383  ;;  %v397_v19 = vpop.permute.xlu1 %396 }
  0x88   : > { %v388_v22 = vpop.permute.xlu0 %387  ;;  %v414_v25 = vpop.permute.xlu1 %413 }
  0x89   : > { %v391_v23 = vsel %vm389_vm6, %v388_v22, %v384_v17  ;;  %v390_v24 = vsel %vm389_vm6, %v384_v17, %v388_v22 }
  0x8a   : > { %v393_v26 = vmul.f32 %v390_v24, %v4285_v20  ;;  %v392_v28 = vmul.f32 %v391_v23, %v4288_v21  ;;  %v4384_v23 = vsel %vm361_vm3, 1.0, %v4131_v0  ;;  %vm851_vm3 = vcmask 1043456  }
  0x8c   : > { %v401_v31 = vpop.permute.xlu0 %400  ;;  %v3567_v32 = vpack.c.bf16 %v395_v27, %v393_v26  ;;  %v3569_v33 = vpack.c.bf16 %v394_v29, %v392_v28  ;;  %v423_v37 = vpop.permute.xlu1 %422 }
  0x8d   : > { %v403_v35 = vsel %vm402_vm7, %v397_v19, %v401_v31  ;;  %v404_v36 = vsel %vm402_vm7, %v401_v31, %v397_v19 }
  0x8e   : > { %v405_v39 = vmul.f32 %v404_v36, %v4302_v30  ;;  %3568 = vmatprep.subr.bf16.mxu0 %v3567_v32  ;;  %v3571_v40 = vpack.c.bf16 %v399_v15, %v403_v35  ;;  %v4374_v15 = vsel %vm4304_vm8, 1.0, %v4131_v0  ;;  %vm367_vm8 = vmand %vm359_vm14, %vm4314_vm9  ;;  %vm820_vm9 = vcmask 1040384  }
  0x8f   : > { %3570 = vmatpush1.bf16.msra.mxu0 %v3569_v33 }
  0x90   : > { %3572 = vmatprep.subr.bf16.mxu0 %v3571_v40  ;;  %v410_v42 = vpop.permute.xlu0 %409  ;;  %v3573_v43 = vpack.c.bf16 %v407_v38, %v405_v39  ;;  %v425_v44 = vpop.permute.xlu1 %424  ;;  %v4402_v40 = vsel %vm359_vm14, 1.0, %v4131_v0  ;;  %vm821_vm14 = vcmask 1044484  }
  0x91   : > { %v416_v47 = vsel %vm415_vm10, %v410_v42, %v414_v25  ;;  %v417_v48 = vsel %vm415_vm10, %v414_v25, %v410_v42  ;;  %v433_v58 = vmul.f32 %v425_v44, %v4338_v49  ;;  %v434_v59 = vmul.f32 %v425_v44, %v4285_v20 }
  0x92   : > { %v418_v51 = vmul.f32 %v417_v48, %v4329_v46  ;;  %v419_v52 = vmul.f32 %v416_v47, %v4326_v45  ;;  %v4413_v48 = vsel %vm367_vm8, 1.0, %v4131_v0  ;;  %vm836_vm8 = vcmask 1045504  }
  0x93   : > { %3574 = vmatpush1.bf16.msra.mxu0 %v3573_v43 }
  0x94   : > { %v412_v50 = vpop.permute.xlu0 %411  ;;  %v440_v55 = vpop.permute.xlu1 %439 }
  0x95   : > { %v420_v53 = vmul.f32 %v412_v50, %v4329_v46  ;;  %v421_v54 = vmul.f32 %v412_v50, %v4326_v45 }
  0x97   : > { %v3575_v56 = vpack.c.bf16 %v421_v54, %v419_v52  ;;  %v3577_v57 = vpack.c.bf16 %v420_v53, %v418_v51 }
  0x98   : > { %v427_v60 = vpop.permute.xlu0 %426  ;;  %v449_v63 = vpop.permute.xlu1 %448 }
  0x99   : > { %v429_v61 = vsel %vm428_vm12, %v423_v37, %v427_v60  ;;  %v430_v62 = vsel %vm428_vm12, %v427_v60, %v423_v37  ;;  %3576 = vmatprep.subr.bf16.mxu0 %v3575_v56 }
  0x9a   : > { %v431_v2 = vmul.f32 %v430_v62, %v4338_v49  ;;  %v432_v4 = vmul.f32 %v429_v61, %v4285_v20  ;;  %3578 = vmatpush1.bf16.msra.mxu0 %v3577_v57  ;;  %v377_v61 = vld [vmem:[%s6819_s1] sm:$0xff]  ;;  %v380_v62 = vld [vmem:[%s6819_s1 + $0x18] sm:$0xff] }
  0x9c   : > { %v436_v5 = vpop.permute.xlu0 %435  ;;  %v3579_v6 = vpack.c.bf16 %v434_v59, %v432_v4  ;;  %v3581_v7 = vpack.c.bf16 %v433_v58, %v431_v2  ;;  %v451_v12 = vpop.permute.xlu1 %450 }
  0x9d   : > { %v443_v13 = vsel %vm441_vm13, %v440_v55, %v436_v5  ;;  %v442_v16 = vsel %vm441_vm13, %v436_v5, %v440_v55  ;;  %v459_v27 = vmul.f32 %v451_v12, %v4338_v49  ;;  %v460_v28 = vmul.f32 %v451_v12, %v4384_v23 }
  0x9e   : > { %3580 = vmatprep.subr.bf16.mxu0 %v3579_v6  ;;  %v445_v18 = vmul.f32 %v443_v13, %v4326_v45  ;;  %v444_v25 = vmul.f32 %v442_v16, %v4374_v15 }
  0x9f   : > { %3582 = vmatpush1.bf16.msra.mxu0 %v3581_v7 }
  0xa0   : > { %v438_v17 = vpop.permute.xlu0 %437  ;;  %3585 = vmatprep.subr.msk.bf16.mxu0 %vm4359_vm2, %v3583_v8  ;;  %v466_v24 = vpop.permute.xlu1 %465 }
  0xa1   : > { %v446_v19 = vmul.f32 %v438_v17, %v4374_v15  ;;  %v447_v22 = vmul.f32 %v438_v17, %v4326_v45 }
  0xa3   : > { %3588 = vmatpush1.bf16.msk.msra.mxu0 %vm4359_vm2, %v3586_v14  ;;  %v3589_v26 = vpack.c.bf16 %v447_v22, %v445_v18  ;;  %v3591_v33 = vpack.c.bf16 %v446_v19, %v444_v25  ;;  %v586_v25 = vld [vmem:[%s6821_s3 + $0x8] sm:$0xff]  ;;  %vm4657_vm2 = vmor %vm820_vm9, %vm821_vm14 }
  0xa4   : > { %v453_v29 = vpop.permute.xlu0 %452  ;;  %v475_v36 = vpop.permute.xlu1 %474  ;;  %3481 = vmatprep.mubr.msk.f32.mxu1 %vm497_vm1, %v586_v25  ;;  %vm4818_vm14 = vmpackc.low %vm851_vm3, %vm4141_vm15  ;;  %vm6828_vm15 = vcmask 588800  }
  0xa5   : > { %v455_v31 = vsel %vm454_vm4, %v449_v63, %v453_v29  ;;  %v456_v32 = vsel %vm454_vm4, %v453_v29, %v449_v63  ;;  %3590 = vmatprep.subr.bf16.mxu0 %v3589_v26  ;;  %v379_v63 = vld [vmem:[%s6819_s1 + $0x10] sm:$0xff]  ;;  %v587_v26 = vld [vmem:[%s6822_s4] sm:$0xff] }
  0xa6   : > { %v457_v34 = vmul.f32 %v455_v31, %v4338_v49  ;;  %v458_v35 = vmul.f32 %v456_v32, %v4384_v23 }
  0xa7   : > { %3592 = vmatpush1.bf16.msra.mxu0 %v3591_v33 }
  0xa8   : > { %v462_v37 = vpop.permute.xlu0 %461  ;;  %v3593_v38 = vpack.c.bf16 %v460_v28, %v458_v35  ;;  %v3595_v39 = vpack.c.bf16 %v459_v27, %v457_v34  ;;  %v477_v50 = vpop.permute.xlu1 %476 }
  0xa9   : > { %v469_v42 = vsel %vm467_vm5, %v466_v24, %v462_v37  ;;  %v468_v51 = vsel %vm467_vm5, %v462_v37, %v466_v24  ;;  %v485_v11 = vmul.f32 %v477_v50, %v4374_v15  ;;  %v486_v54 = vmul.f32 %v477_v50, %v4413_v48 }
  0xaa   : > { %3594 = vmatprep.subr.bf16.mxu0 %v3593_v38  ;;  %v471_v44 = vmul.f32 %v469_v42, %v4402_v40 }
  0xab   : > { %3596 = vmatpush1.bf16.msra.mxu0 %v3595_v39 }
  0xac   : > { %v464_v43 = vpop.permute.xlu0 %463 }
  0xad   : > { %v473_v47 = vmul.f32 %v464_v43, %v4402_v40  ;;  %v3599_v41 = vpack.c.bf16 %v464_v43, %v468_v51 }
  0xaf   : > { %v3597_v52 = vpack.c.bf16 %v473_v47, %v471_v44 }
  0xb0   : > { %v479_v53 = vpop.permute.xlu0 %478 }
  0xb1   : > { %v481_v55 = vsel %vm480_vm11, %v475_v36, %v479_v53  ;;  %v482_v56 = vsel %vm480_vm11, %v479_v53, %v475_v36  ;;  %3598 = vmatprep.subr.bf16.mxu0 %v3597_v52 }
  0xb2   : > { %v483_v57 = vmul.f32 %v481_v55, %v4374_v15  ;;  %v484_v58 = vmul.f32 %v482_v56, %v4413_v48  ;;  %3600 = vmatpush1.bf16.msra.mxu0 %v3599_v41 }
  0xb4   : > { %v3601_v59 = vpack.c.bf16 %v486_v54, %v484_v58  ;;  %v3603_v60 = vpack.c.bf16 %v485_v11, %v483_v57 }
  0xb6   : > { %3602 = vmatprep.subr.bf16.mxu0 %v3601_v59 }
  0xb7   : > { %3604 = vmatpush1.bf16.msra.mxu0 %v3603_v60 }
  0xb9   : > { %v495_v7 = vpop.permute.xlu1 %494 }
  0xba   : > { %569 = vmatmul.mubr.f32.vlgmr.msra.gmra.mrb[0].mxu0 %v377_v61 }
  0xbb   : > { %3480 = vmatprep.mubr.msk.f32.mxu0 %vm497_vm1, %v380_v62 }
  0xbe   : > { %575 = vmatmul.mubr.f32.gmra.mrb[2].mxu0 %v379_v63 }
  0xc1   : > { %v490_v2 = vpop.permute.xlu0 %489 }
 0x18d   : > { %v570_v4 = vpop.f32.mrb[0].mxu0 }
 0x18e   : > { %v571_v5 = vadd.f32 %v570_v4, %v490_v2  ;;  %v572_v6 = vpop.f32.mrb[1].mxu0 }
 0x18f   : > { %v573_v9 = vadd.f32 %v572_v6, %v490_v2 }
 0x190   : > { %v4436_v8 = vmax.f32 %v571_v5, 0.0 }
 0x191   : > { %v576_v12 = vpop.f32.mrb[2].mxu0  ;;  %v4442_v18 = vmax.f32 %v573_v9, 0.0 }
 0x192   : > { %v577_v13 = vadd.f32 %v576_v12, %v495_v7  ;;  %v578_v14 = vpop.f32.mrb[3].mxu0  ;;  %588 = vrot.lane.b32.xlu1 %v4436_v8, %s4132_s11 }
 0x193   : > { %v579_v16 = vadd.f32 %v578_v14, %v495_v7 }
 0x194   : > { %v4440_v17 = vmax.f32 %v577_v13, 0.0 }
 0x195   : > { %v4444_v19 = vmax.f32 %v579_v16, 0.0 }
 0x196   : > { %590 = vrot.lane.b32.xlu0 %v4440_v17, %s4132_s11  ;;  %604 = vrot.lane.b32.xlu1 %v4436_v8, %s4133_s16  ;;  %v3623_v22 = vpack.c.bf16 %v4440_v17, %v4436_v8 }
 0x197   : > { %v3621_v24 = vpack.c.bf16 %v4444_v19, %v4442_v18 }
 0x19a   : > { %606 = vrot.lane.b32.xlu0 %v4440_v17, %s4133_s16  ;;  %620 = vrot.lane.b32.xlu1 %v4436_v8, %s4134_s17 }
 0x19e   : > { %622 = vrot.lane.b32.xlu0 %v4440_v17, %s4134_s17  ;;  %636 = vrot.lane.b32.xlu1 %v4436_v8, %s4135_s18 }
 0x1a2   : > { %638 = vrot.lane.b32.xlu0 %v4440_v17, %s4135_s18  ;;  %652 = vrot.lane.b32.xlu1 %v4436_v8, %s4136_s19 }
 0x1a6   : > { %654 = vrot.lane.b32.xlu0 %v4440_v17, %s4136_s19  ;;  %668 = vrot.lane.b32.xlu1 %v4436_v8, %s4137_s20 }
 0x1aa   : > { %670 = vrot.lane.b32.xlu0 %v4440_v17, %s4137_s20  ;;  %684 = vrot.lane.b32.xlu1 %v4436_v8, %s4138_s21 }
 0x1ae   : > { %686 = vrot.lane.b32.xlu0 %v4440_v17, %s4138_s21  ;;  %592 = vrot.lane.b32.xlu1 %v4442_v18, %s4132_s11 }
 0x1b2   : > { %594 = vrot.lane.b32.xlu0 %v4444_v19, %s4132_s11  ;;  %608 = vrot.lane.b32.xlu1 %v4442_v18, %s4133_s16 }
 0x1b6   : > { %610 = vrot.lane.b32.xlu0 %v4444_v19, %s4133_s16  ;;  %624 = vrot.lane.b32.xlu1 %v4442_v18, %s4134_s17 }
 0x1ba   : > { %626 = vrot.lane.b32.xlu0 %v4444_v19, %s4134_s17  ;;  %640 = vrot.lane.b32.xlu1 %v4442_v18, %s4135_s18 }
 0x1be   : > { %642 = vrot.lane.b32.xlu0 %v4444_v19, %s4135_s18  ;;  %700 = vrot.lane.b32.xlu1 %v4436_v8, %s4139_s22 }
 0x1c2   : > { %702 = vrot.lane.b32.xlu0 %v4440_v17, %s4139_s22  ;;  %656 = vrot.lane.b32.xlu1 %v4442_v18, %s4136_s19 }
 0x1c6   : > { %658 = vrot.lane.b32.xlu0 %v4444_v19, %s4136_s19  ;;  %672 = vrot.lane.b32.xlu1 %v4442_v18, %s4137_s20 }
 0x1ca   : > { %674 = vrot.lane.b32.xlu0 %v4444_v19, %s4137_s20  ;;  %688 = vrot.lane.b32.xlu1 %v4442_v18, %s4138_s21 }
 0x1ce   : > { %690 = vrot.lane.b32.xlu0 %v4444_v19, %s4138_s21  ;;  %704 = vrot.lane.b32.xlu1 %v4442_v18, %s4139_s22 }
 0x1d2   : > { %706 = vrot.lane.b32.xlu0 %v4444_v19, %s4139_s22  ;;  %718 = vperm.xlu1 %4046, %v587_v26  }
 0x204   : > { %v589_v27 = vpop.permute.xlu1 %588 }
 0x208   : > { %v605_v28 = vpop.permute.xlu1 %604  ;;  %v591_v29 = vpop.permute.xlu0 %590 }
 0x20c   : > { %v621_v31 = vpop.permute.xlu1 %620  ;;  %v607_v32 = vpop.permute.xlu0 %606 }
 0x210   : > { %v637_v33 = vpop.permute.xlu1 %636  ;;  %v623_v34 = vpop.permute.xlu0 %622 }
 0x214   : > { %v4519_v35 = vpop.permute.xlu1 %652  ;;  %v639_v36 = vpop.permute.xlu0 %638 }
 0x218   : > { %v4521_v37 = vpop.permute.xlu1 %668  ;;  %v4523_v38 = vpop.permute.xlu0 %654 }
 0x21c   : > { %v4525_v39 = vpop.permute.xlu1 %684  ;;  %v4527_v42 = vpop.permute.xlu0 %670 }
 0x220   : > { %v593_v43 = vpop.permute.xlu1 %592  ;;  %v4529_v44 = vpop.permute.xlu0 %686 }
 0x221   : > { %v598_v47 = vsel %vm389_vm6, %v593_v43, %v589_v27  ;;  %v596_v50 = vsel %vm389_vm6, %v589_v27, %v593_v43 }
 0x222   : > { %v601_v11 = vmul.f32 %v596_v50, %v4285_v20  ;;  %v600_v55 = vmul.f32 %v598_v47, %v4288_v21 }
 0x224   : > { %v609_v51 = vpop.permute.xlu1 %608  ;;  %v595_v52 = vpop.permute.xlu0 %594 }
 0x225   : > { %v599_v41 = vsel %vm389_vm6, %v595_v52, %v591_v29  ;;  %v597_v53 = vsel %vm389_vm6, %v591_v29, %v595_v52  ;;  %v614_v57 = vsel %vm402_vm7, %v609_v51, %v605_v28  ;;  %v612_v62 = vsel %vm402_vm7, %v605_v28, %v609_v51 }
 0x226   : > { %v603_v54 = vmul.f32 %v597_v53, %v4285_v20  ;;  %v602_v56 = vmul.f32 %v599_v41, %v4288_v21  ;;  %v616_v4 = vmul.f32 %v614_v57, %v4302_v30 }
 0x228   : > { %v625_v58 = vpop.permute.xlu1 %624  ;;  %v611_v59 = vpop.permute.xlu0 %610  ;;  %v3605_v60 = vpack.c.bf16 %v603_v54, %v601_v11  ;;  %v3607_v61 = vpack.c.bf16 %v602_v56, %v600_v55 }
 0x229   : > { %v613_v63 = vsel %vm402_vm7, %v607_v32, %v611_v59  ;;  %v615_v2 = vsel %vm402_vm7, %v611_v59, %v607_v32  ;;  %v628_v7 = vsel %vm415_vm10, %v621_v31, %v625_v58  ;;  %v630_v9 = vsel %vm415_vm10, %v625_v58, %v621_v31 }
 0x22a   : > { %v618_v5 = vmul.f32 %v615_v2, %v4302_v30  ;;  %3606 = vmatprep.subr.bf16.mxu1 %v3605_v60  ;;  %v3609_v6 = vpack.c.bf16 %v613_v63, %v612_v62  ;;  %v632_v26 = vmul.f32 %v630_v9, %v4329_v46  ;;  %v633_v27 = vmul.f32 %v628_v7, %v4326_v45 }
 0x22b   : > { %3608 = vmatpush1.bf16.msra.mxu1 %v3607_v61 }
 0x22c   : > { %v641_v12 = vpop.permute.xlu1 %640  ;;  %3610 = vmatprep.subr.bf16.mxu1 %v3609_v6  ;;  %v627_v13 = vpop.permute.xlu0 %626  ;;  %v3611_v14 = vpack.c.bf16 %v618_v5, %v616_v4 }
 0x22d   : > { %v629_v16 = vsel %vm415_vm10, %v623_v34, %v627_v13  ;;  %v631_v25 = vsel %vm415_vm10, %v627_v13, %v623_v34  ;;  %v644_v31 = vsel %vm428_vm12, %v637_v33, %v641_v12  ;;  %v646_v32 = vsel %vm428_vm12, %v641_v12, %v637_v33 }
 0x22e   : > { %v634_v28 = vmul.f32 %v631_v25, %v4329_v46  ;;  %v635_v29 = vmul.f32 %v629_v16, %v4326_v45  ;;  %v648_v41 = vmul.f32 %v646_v32, %v4338_v49  ;;  %v649_v53 = vmul.f32 %v644_v31, %v4285_v20 }
 0x22f   : > { %3612 = vmatpush1.bf16.msra.mxu1 %v3611_v14 }
 0x230   : > { %v701_v43 = vpop.permute.xlu1 %700  ;;  %v643_v47 = vpop.permute.xlu0 %642  ;;  %v3613_v50 = vpack.c.bf16 %v635_v29, %v633_v27  ;;  %v3615_v51 = vpack.c.bf16 %v634_v28, %v632_v26 }
 0x231   : > { %v645_v34 = vsel %vm428_vm12, %v639_v36, %v643_v47  ;;  %v647_v52 = vsel %vm428_vm12, %v643_v47, %v639_v36 }
 0x232   : > { %v650_v11 = vmul.f32 %v647_v52, %v4338_v49  ;;  %v651_v54 = vmul.f32 %v645_v34, %v4285_v20  ;;  %3614 = vmatprep.subr.bf16.mxu1 %v3613_v50 }
 0x233   : > { %3616 = vmatpush1.bf16.msra.mxu1 %v3615_v51 }
 0x234   : > { %v657_v33 = vpop.permute.xlu1 %656  ;;  %v703_v55 = vpop.permute.xlu0 %702  ;;  %v3617_v56 = vpack.c.bf16 %v651_v54, %v649_v53  ;;  %v3619_v57 = vpack.c.bf16 %v650_v11, %v648_v41  ;;  %v585_v54 = vld [vmem:[%s6821_s3] sm:$0xff] }
 0x235   : > { %v660_v58 = vsel %vm441_vm13, %v4519_v35, %v657_v33  ;;  %v662_v36 = vsel %vm441_vm13, %v657_v33, %v4519_v35 }
 0x236   : > { %3618 = vmatprep.subr.bf16.mxu1 %v3617_v56  ;;  %v664_v63 = vmul.f32 %v660_v58, %v4374_v15  ;;  %v665_v2 = vmul.f32 %v662_v36, %v4326_v45 }
 0x237   : > { %3620 = vmatpush1.bf16.msra.mxu1 %v3619_v57 }
 0x238   : > { %v673_v59 = vpop.permute.xlu1 %672  ;;  %3622 = vmatprep.subr.bf16.mxu1 %v3621_v24  ;;  %v659_v60 = vpop.permute.xlu0 %658 }
 0x239   : > { %v661_v61 = vsel %vm441_vm13, %v4523_v38, %v659_v60  ;;  %v663_v62 = vsel %vm441_vm13, %v659_v60, %v4523_v38  ;;  %v676_v18 = vsel %vm454_vm4, %v4521_v37, %v673_v59  ;;  %v678_v19 = vsel %vm454_vm4, %v673_v59, %v4521_v37 }
 0x23a   : > { %v666_v35 = vmul.f32 %v661_v61, %v4374_v15  ;;  %v667_v4 = vmul.f32 %v663_v62, %v4326_v45  ;;  %v680_v12 = vmul.f32 %v676_v18, %v4338_v49  ;;  %v681_v37 = vmul.f32 %v678_v19, %v4384_v23 }
 0x23b   : > { %3624 = vmatpush1.bf16.msra.mxu1 %v3623_v22 }
 0x23c   : > { %v689_v24 = vpop.permute.xlu1 %688  ;;  %v675_v38 = vpop.permute.xlu0 %674  ;;  %v3625_v5 = vpack.c.bf16 %v667_v4, %v665_v2  ;;  %v3627_v6 = vpack.c.bf16 %v666_v35, %v664_v63 }
 0x23d   : > { %v677_v7 = vsel %vm454_vm4, %v4527_v42, %v675_v38  ;;  %v679_v9 = vsel %vm454_vm4, %v675_v38, %v4527_v42  ;;  %v694_v17 = vsel %vm467_vm5, %v689_v24, %v4525_v39  ;;  %v692_v32 = vsel %vm467_vm5, %v4525_v39, %v689_v24 }
 0x23e   : > { %v682_v13 = vmul.f32 %v677_v7, %v4338_v49  ;;  %v683_v8 = vmul.f32 %v679_v9, %v4384_v23  ;;  %3626 = vmatprep.subr.bf16.mxu1 %v3625_v5  ;;  %v697_v26 = vmul.f32 %v694_v17, %v4402_v40 }
 0x23f   : > { %3628 = vmatpush1.bf16.msra.mxu1 %v3627_v6 }
 0x240   : > { %v705_v22 = vpop.permute.xlu1 %704  ;;  %v691_v14 = vpop.permute.xlu0 %690  ;;  %v3629_v16 = vpack.c.bf16 %v683_v8, %v681_v37  ;;  %v3631_v25 = vpack.c.bf16 %v682_v13, %v680_v12 }
 0x241   : > { %v695_v42 = vsel %vm467_vm5, %v691_v14, %v4529_v44  ;;  %v693_v27 = vsel %vm467_vm5, %v4529_v44, %v691_v14  ;;  %v708_v29 = vsel %vm480_vm11, %v701_v43, %v705_v22  ;;  %v710_v31 = vsel %vm480_vm11, %v705_v22, %v701_v43 }
 0x242   : > { %v699_v28 = vmul.f32 %v695_v42, %v4402_v40  ;;  %3630 = vmatprep.subr.bf16.mxu1 %v3629_v16  ;;  %v3635_v34 = vpack.c.bf16 %v693_v27, %v692_v32  ;;  %v712_v52 = vmul.f32 %v708_v29, %v4374_v15  ;;  %v713_v41 = vmul.f32 %v710_v31, %v4413_v48 }
 0x243   : > { %3632 = vmatpush1.bf16.msra.mxu1 %v3631_v25 }
 0x244   : > { %v707_v47 = vpop.permute.xlu0 %706  ;;  %v3633_v50 = vpack.c.bf16 %v699_v28, %v697_v26 }
 0x245   : > { %v709_v51 = vsel %vm480_vm11, %v703_v55, %v707_v47  ;;  %v711_v44 = vsel %vm480_vm11, %v707_v47, %v703_v55 }
 0x246   : > { %v714_v43 = vmul.f32 %v709_v51, %v4374_v15  ;;  %v715_v53 = vmul.f32 %v711_v44, %v4413_v48  ;;  %3634 = vmatprep.subr.bf16.mxu1 %v3633_v50 }
 0x247   : > { %3636 = vmatpush1.bf16.msra.mxu1 %v3635_v34 }
 0x248   : > { %v3637_v39 = vpack.c.bf16 %v715_v53, %v713_v41  ;;  %v3639_v11 = vpack.c.bf16 %v714_v43, %v712_v52  ;;  %v3489_v52 = vld [vmem:[%s6820_s2 + $0x10] sm:$0xff]  ;;  %v3486_v41 = vld [vmem:[%s6819_s1 + $0x28] sm:$0xff]  ;;  %v3490_v43 = vld [vmem:[%s6820_s2 + $0x18] sm:$0xff] }
 0x249   : > { %3493 = vmatprep.mubr.msk.f32.mxu0 %vm497_vm1, %v3486_v41 }
 0x24a   : > { %3638 = vmatprep.subr.bf16.mxu1 %v3637_v39 }
 0x24b   : > { %3640 = vmatpush1.bf16.msra.mxu1 %v3639_v11 }
 0x24e   : > { %789 = vmatmul.mubr.f32.vlgmr.msra.gmra.mrb[0].mxu1 %v585_v54 }
 0x251   : > { %v719_v33 = vpop.permute.xlu1 %718 }
 0x321   : > { %v790_v55 = vpop.f32.mrb[0].mxu1 }
 0x322   : > { %v791_v56 = vadd.f32 %v790_v55, %v719_v33  ;;  %v792_v57 = vpop.f32.mrb[1].mxu1 }
 0x323   : > { %v793_v58 = vadd.f32 %v792_v57, %v719_v33 }
 0x324   : > { %v3482_v36 = vmul.f32 -1.442695, %v791_v56 }
 0x325   : > { %v3483_v59 = vmul.f32 -1.442695, %v793_v58 }
 0x326   : > { %4048 = vpow2.f32 %v3482_v36 }
 0x327   : > { %4050 = vpow2.f32 %v3483_v59 }
 0x330   : > { %v4049_v60 = vpop.eup %4048 }
 0x331   : > { %v4051_v61 = vpop.eup %4050  ;;  %v801_v62 = vadd.f32 1.0, %v4049_v60 }
 0x332   : > { %v802_v63 = vadd.f32 1.0, %v4051_v61 }
 0x333   : > { %4052 = vrcp.f32 %v801_v62 }
 0x334   : > { %4054 = vrcp.f32 %v802_v63 }
 0x33d   : > { %v4053_v2 = vpop.eup %4052 }
 0x33e   : > { %v4055_v35 = vpop.eup %4054  ;;  %v839_v4 = vrot.slane %v4053_v2, 5  ;;  %v812_v18 = vmax.f32 %v4053_v2, 0.05 }
 0x33f   : > { %v809_v19 = vcombine.low %v4053_v2, %v4055_v35  ;;  %v813_v24 = vmax.f32 %v4055_v35, 0.05  ;;  %v840_v25 = vrot.slane %v4055_v35, 5 }
 0x340   : > { %v4646_v38 = vsel %vm374_vm0, %v4213_v1, %v839_v4  ;;  %4056 = vrcp.f32 %v812_v18 }
 0x341   : > { %862 = vrot.lane.b32.xlu0 %v4646_v38, %s4132_s11  ;;  %4058 = vrcp.f32 %v813_v24  ;;  %v811_v8 = vsub.f32 %v4213_v1, %v809_v19  ;;  %v4700_v47 = vsel %vm374_vm0, %v4219_v3, %v840_v25 }
 0x345   : > { %878 = vrot.lane.b32.xlu0 %v4646_v38, %s4133_s16 }
 0x349   : > { %894 = vrot.lane.b32.xlu0 %v4646_v38, %s4134_s17 }
 0x34a   : > { %v4057_v5 = vpop.eup %4056 }
 0x34b   : > { %v4059_v6 = vpop.eup %4058 }
 0x34c   : > { %v818_v7 = vcombine.low %v4057_v5, %v4059_v6  ;;  %v819_v9 = vcombine.high %v4057_v5, %v4059_v6 }
 0x34d   : > { %910 = vrot.lane.b32.xlu0 %v4646_v38, %s4135_s18 }
 0x34e   : > { %v3484_v37 = vrot.slane %v818_v7, 11  ;;  %v825_v13 = vrot.slane %v819_v9, 7 }
 0x350   : > { %v826_v17 = vsel %vm4657_vm2, %v3484_v37, %v825_v13 }
 0x351   : > { %926 = vrot.lane.b32.xlu0 %v4646_v38, %s4136_s19  ;;  %v828_v22 = vmul.f32 %v826_v17, %v811_v8 }
 0x353   : > { %v4667_v14 = vadd.f32 %v828_v22, %v809_v19 }
 0x355   : > { %942 = vrot.lane.b32.xlu0 %v4646_v38, %s4137_s20  ;;  %v843_v16 = vrot.slane %v4667_v14, 7  ;;  %v4674_v1 = vcombine.high %v4667_v14, %v4667_v14  ;;  %v832_v42 = vrot.slane %v4667_v14, 2  ;;  %v3509_v14 = vld [vmem:[%s6819_s1 + $0x48] sm:$0xff] }
 0x357   : > { %v4683_v26 = vsel %vm820_vm9, %v839_v4, %v843_v16  ;;  %v844_v27 = vrot.slane %v4674_v1, 7  ;;  %v833_v28 = vrot.slane %v4674_v1, 2  ;;  %v837_v29 = vsel %vm836_vm8, %v4053_v2, %v832_v42  ;;  %v3512_v1 = vld [vmem:[%s6820_s2 + $0x20] sm:$0xff] }
 0x358   : > { %v852_v31 = vsel %vm851_vm3, %v4683_v26, 0.0  ;;  %v3660_v32 = vpack.c.bf16 %v4683_v26, %v4646_v38  ;;  %3404 = vst [vmem:[%s4679_s24] sm:$0xff] %v837_v29 }
 0x359   : > { %958 = vrot.lane.b32.xlu0 %v4646_v38, %s4138_s21  ;;  %864 = vrot.lane.b32.xlu1 %v852_v31, %s4132_s11  ;;  %v4703_v50 = vsel %vm820_vm9, %v840_v25, %v844_v27  ;;  %v838_v51 = vsel %vm836_vm8, %v4055_v35, %v833_v28 }
 0x35a   : > { %v3657_v44 = vpack.c.bf16 %v4703_v50, %v4700_v47  ;;  %3405 = vst [vmem:[%s4679_s24 + $0x8] sm:$0xff] %v838_v51  ;;  %v853_v34 = vsel %vm851_vm3, %v4703_v50, 0.0 }
 0x35d   : > { %866 = vrot.lane.b32.xlu0 %v4700_v47, %s4132_s11  ;;  %880 = vrot.lane.b32.xlu1 %v852_v31, %s4133_s16 }
 0x361   : > { %882 = vrot.lane.b32.xlu0 %v4700_v47, %s4133_s16  ;;  %896 = vrot.lane.b32.xlu1 %v852_v31, %s4134_s17 }
 0x365   : > { %898 = vrot.lane.b32.xlu0 %v4700_v47, %s4134_s17  ;;  %912 = vrot.lane.b32.xlu1 %v852_v31, %s4135_s18 }
 0x369   : > { %914 = vrot.lane.b32.xlu0 %v4700_v47, %s4135_s18  ;;  %928 = vrot.lane.b32.xlu1 %v852_v31, %s4136_s19 }
 0x36d   : > { %974 = vrot.lane.b32.xlu0 %v4646_v38, %s4139_s22  ;;  %944 = vrot.lane.b32.xlu1 %v852_v31, %s4137_s20 }
 0x371   : > { %930 = vrot.lane.b32.xlu0 %v4700_v47, %s4136_s19  ;;  %960 = vrot.lane.b32.xlu1 %v852_v31, %s4138_s21 }
 0x375   : > { %946 = vrot.lane.b32.xlu0 %v4700_v47, %s4137_s20  ;;  %868 = vrot.lane.b32.xlu1 %v853_v34, %s4132_s11 }
 0x379   : > { %962 = vrot.lane.b32.xlu0 %v4700_v47, %s4138_s21  ;;  %884 = vrot.lane.b32.xlu1 %v853_v34, %s4133_s16 }
 0x37d   : > { %978 = vrot.lane.b32.xlu0 %v4700_v47, %s4139_s22  ;;  %900 = vrot.lane.b32.xlu1 %v853_v34, %s4134_s17 }
 0x381   : > { %992 = vperm.xlu0 %4045, %v3489_v52   ;;  %916 = vrot.lane.b32.xlu1 %v853_v34, %s4135_s18 }
 0x385   : > { %976 = vrot.lane.b32.xlu1 %v852_v31, %s4139_s22 }
 0x389   : > { %932 = vrot.lane.b32.xlu1 %v853_v34, %s4136_s19 }
 0x38d   : > { %948 = vrot.lane.b32.xlu1 %v853_v34, %s4137_s20 }
 0x391   : > { %964 = vrot.lane.b32.xlu1 %v853_v34, %s4138_s21 }
 0x395   : > { %980 = vrot.lane.b32.xlu1 %v853_v34, %s4139_s22 }
 0x399   : > { %997 = vperm.xlu1 %4046, %v3490_v43  }
 0x3b3   : > { %v863_v53 = vpop.permute.xlu0 %862 }
 0x3b7   : > { %v879_v39 = vpop.permute.xlu0 %878 }
 0x3bb   : > { %v895_v11 = vpop.permute.xlu0 %894 }
 0x3bf   : > { %v911_v54 = vpop.permute.xlu0 %910 }
 0x3c3   : > { %v4756_v33 = vpop.permute.xlu0 %926 }
 0x3c7   : > { %v4758_v55 = vpop.permute.xlu0 %942 }
 0x3cb   : > { %v865_v56 = vpop.permute.xlu1 %864  ;;  %v4760_v57 = vpop.permute.xlu0 %958 }
 0x3cf   : > { %v881_v58 = vpop.permute.xlu1 %880  ;;  %v867_v36 = vpop.permute.xlu0 %866 }
 0x3d0   : > { %v870_v18 = vsel %vm389_vm6, %v863_v53, %v867_v36  ;;  %v872_v19 = vsel %vm389_vm6, %v867_v36, %v863_v53 }
 0x3d1   : > { %v874_v7 = vmul.f32 %v872_v19, %v4288_v21  ;;  %v875_v9 = vmul.f32 %v870_v18, %v4285_v20 }
 0x3d3   : > { %v897_v59 = vpop.permute.xlu1 %896  ;;  %v883_v61 = vpop.permute.xlu0 %882 }
 0x3d4   : > { %v888_v8 = vsel %vm402_vm7, %v883_v61, %v879_v39  ;;  %v886_v27 = vsel %vm402_vm7, %v879_v39, %v883_v61 }
 0x3d5   : > { %v890_v51 = vmul.f32 %v888_v8, %v4302_v30 }
 0x3d7   : > { %v913_v60 = vpop.permute.xlu1 %912  ;;  %v899_v63 = vpop.permute.xlu0 %898 }
 0x3d8   : > { %v902_v41 = vsel %vm415_vm10, %v895_v11, %v899_v63  ;;  %v904_v43 = vsel %vm415_vm10, %v899_v63, %v895_v11 }
 0x3d9   : > { %v906_v36 = vmul.f32 %v904_v43, %v4329_v46  ;;  %v907_v61 = vmul.f32 %v902_v41, %v4326_v45 }
 0x3db   : > { %v4762_v62 = vpop.permute.xlu1 %928  ;;  %v915_v4 = vpop.permute.xlu0 %914 }
 0x3dc   : > { %v918_v11 = vsel %vm428_vm12, %v911_v54, %v915_v4  ;;  %v920_v63 = vsel %vm428_vm12, %v915_v4, %v911_v54 }
 0x3df   : > { %v4764_v2 = vpop.permute.xlu1 %944  ;;  %v4782_v17 = vpop.permute.xlu0 %974 }
 0x3e3   : > { %v4766_v35 = vpop.permute.xlu1 %960  ;;  %v931_v18 = vpop.permute.xlu0 %930 }
 0x3e7   : > { %v869_v24 = vpop.permute.xlu1 %868  ;;  %v947_v54 = vpop.permute.xlu0 %946 }
 0x3e8   : > { %v871_v5 = vsel %vm389_vm6, %v865_v56, %v869_v24  ;;  %v873_v6 = vsel %vm389_vm6, %v869_v24, %v865_v56  ;;  %v950_v50 = vsel %vm454_vm4, %v4758_v55, %v947_v54 }
 0x3e9   : > { %v876_v37 = vmul.f32 %v873_v6, %v4288_v21  ;;  %v877_v13 = vmul.f32 %v871_v5, %v4285_v20 }
 0x3eb   : > { %v3643_v22 = vpack.c.bf16 %v876_v37, %v874_v7  ;;  %v885_v16 = vpop.permute.xlu1 %884  ;;  %v3641_v25 = vpack.c.bf16 %v877_v13, %v875_v9  ;;  %v922_v37 = vmul.f32 %v920_v63, %v4338_v49  ;;  %v923_v13 = vmul.f32 %v918_v11, %v4285_v20  ;;  %v963_v41 = vpop.permute.xlu0 %962 }
 0x3ec   : > { %v887_v29 = vsel %vm402_vm7, %v881_v58, %v885_v16  ;;  %v889_v31 = vsel %vm402_vm7, %v885_v16, %v881_v58 }
 0x3ed   : > { %v892_v34 = vmul.f32 %v889_v31, %v4302_v30  ;;  %3642 = vmatprep.subr.bf16.mxu0 %v3641_v25  ;;  %v3645_v52 = vpack.c.bf16 %v887_v29, %v886_v27  ;;  %v936_v29 = vsel %vm441_vm13, %v931_v18, %v4756_v33 }
 0x3ee   : > { %3644 = vmatpush1.bf16.msra.mxu0 %v3643_v22 }
 0x3ef   : > { %v3647_v53 = vpack.c.bf16 %v892_v34, %v890_v51  ;;  %3646 = vmatprep.subr.bf16.mxu0 %v3645_v52  ;;  %v901_v39 = vpop.permute.xlu1 %900 }
 0x3f0   : > { %v903_v56 = vsel %vm415_vm10, %v897_v59, %v901_v39  ;;  %v905_v58 = vsel %vm415_vm10, %v901_v39, %v897_v59 }
 0x3f1   : > { %v908_v19 = vmul.f32 %v905_v58, %v4329_v46  ;;  %v909_v24 = vmul.f32 %v903_v56, %v4326_v45 }
 0x3f2   : > { %3648 = vmatpush1.bf16.msra.mxu0 %v3647_v53 }
 0x3f3   : > { %v3651_v5 = vpack.c.bf16 %v908_v19, %v906_v36  ;;  %v917_v6 = vpop.permute.xlu1 %916  ;;  %v3649_v7 = vpack.c.bf16 %v909_v24, %v907_v61  ;;  %v954_v36 = vmul.f32 %v950_v50, %v4338_v49  ;;  %v979_v61 = vpop.permute.xlu0 %978 }
 0x3f4   : > { %v919_v59 = vsel %vm428_vm12, %v913_v60, %v917_v6  ;;  %v921_v9 = vsel %vm428_vm12, %v917_v6, %v913_v60  ;;  %v934_v60 = vsel %vm441_vm13, %v4756_v33, %v931_v18  ;;  %v939_v33 = vmul.f32 %v936_v29, %v4326_v45  ;;  %v3487_v29 = vld [vmem:[%s6819_s1 + $0x30] sm:$0xff] }
 0x3f5   : > { %v924_v8 = vmul.f32 %v921_v9, %v4338_v49  ;;  %v925_v22 = vmul.f32 %v919_v59, %v4285_v20  ;;  %3650 = vmatprep.subr.bf16.mxu0 %v3649_v7  ;;  %v938_v52 = vmul.f32 %v934_v60, %v4374_v15  ;;  %v982_v6 = vsel %vm480_vm11, %v4782_v17, %v979_v61  ;;  %v3485_v60 = vld [vmem:[%s6819_s1 + $0x20] sm:$0xff] }
 0x3f6   : > { %3652 = vmatpush1.bf16.msra.mxu0 %v3651_v5  ;;  %v984_v7 = vsel %vm480_vm11, %v979_v61, %v4782_v17  ;;  %v966_v59 = vsel %vm467_vm5, %v4760_v57, %v963_v41 }
 0x3f7   : > { %v3655_v4 = vpack.c.bf16 %v924_v8, %v922_v37  ;;  %v977_v16 = vpop.permute.xlu1 %976  ;;  %v3653_v25 = vpack.c.bf16 %v925_v22, %v923_v13  ;;  %v986_v22 = vmul.f32 %v982_v6, %v4374_v15 }
 0x3f9   : > { %3654 = vmatprep.subr.bf16.mxu0 %v3653_v25 }
 0x3fa   : > { %3656 = vmatpush1.bf16.msra.mxu0 %v3655_v4 }
 0x3fb   : > { %3659 = vmatprep.subr.msk.bf16.mxu0 %vm4818_vm14, %v3657_v44  ;;  %v933_v31 = vpop.permute.xlu1 %932  ;;  %v952_v44 = vsel %vm454_vm4, %v947_v54, %v4758_v55  ;;  %v987_v54 = vmul.f32 %v984_v7, %v4413_v48 }
 0x3fc   : > { %v935_v51 = vsel %vm441_vm13, %v4762_v62, %v933_v31  ;;  %v937_v34 = vsel %vm441_vm13, %v933_v31, %v4762_v62  ;;  %v955_v55 = vmul.f32 %v952_v44, %v4384_v23 }
 0x3fd   : > { %v940_v43 = vmul.f32 %v935_v51, %v4374_v15  ;;  %v941_v47 = vmul.f32 %v937_v34, %v4326_v45 }
 0x3fe   : > { %3662 = vmatpush1.bf16.msk.msra.mxu0 %vm4818_vm14, %v3660_v32  ;;  %v968_v32 = vsel %vm467_vm5, %v963_v41, %v4760_v57 }
 0x3ff   : > { %v3665_v62 = vpack.c.bf16 %v940_v43, %v938_v52  ;;  %v949_v53 = vpop.permute.xlu1 %948  ;;  %v3663_v39 = vpack.c.bf16 %v941_v47, %v939_v33  ;;  %v971_v11 = vmul.f32 %v968_v32, %v4402_v40 }
 0x400   : > { %v951_v56 = vsel %vm454_vm4, %v4764_v2, %v949_v53  ;;  %v953_v58 = vsel %vm454_vm4, %v949_v53, %v4764_v2  ;;  %v993_v31 = vpop.permute.xlu0 %992 }
 0x401   : > { %v956_v38 = vmul.f32 %v951_v56, %v4338_v49  ;;  %v957_v26 = vmul.f32 %v953_v58, %v4384_v23  ;;  %3664 = vmatprep.subr.bf16.mxu0 %v3663_v39 }
 0x402   : > { %3666 = vmatpush1.bf16.msra.mxu0 %v3665_v62 }
 0x403   : > { %v3669_v18 = vpack.c.bf16 %v956_v38, %v954_v36  ;;  %v965_v19 = vpop.permute.xlu1 %964  ;;  %v3667_v24 = vpack.c.bf16 %v957_v26, %v955_v55  ;;  %v3496_v55 = vld [vmem:[%s6821_s3 + $0x18] sm:$0xff]  ;;  %v3497_v38 = vld [vmem:[%s6822_s4 + $0x8] sm:$0xff] }
 0x404   : > { %v969_v2 = vsel %vm467_vm5, %v965_v19, %v4766_v35  ;;  %v967_v63 = vsel %vm467_vm5, %v4766_v35, %v965_v19  ;;  %3498 = vmatprep.mubr.msk.f32.mxu1 %vm497_vm1, %v3496_v55 }
 0x405   : > { %v973_v5 = vmul.f32 %v969_v2, %v4402_v40  ;;  %3668 = vmatprep.subr.bf16.mxu0 %v3667_v24  ;;  %v3673_v13 = vpack.c.bf16 %v967_v63, %v966_v59 }
 0x406   : > { %3670 = vmatpush1.bf16.msra.mxu0 %v3669_v18 }
 0x407   : > { %v981_v9 = vpop.permute.xlu1 %980  ;;  %v3671_v37 = vpack.c.bf16 %v973_v5, %v971_v11 }
 0x408   : > { %v983_v35 = vsel %vm480_vm11, %v977_v16, %v981_v9  ;;  %v985_v8 = vsel %vm480_vm11, %v981_v9, %v977_v16  ;;  %v3488_v16 = vld [vmem:[%s6819_s1 + $0x38] sm:$0xff] }
 0x409   : > { %v988_v17 = vmul.f32 %v983_v35, %v4374_v15  ;;  %v989_v4 = vmul.f32 %v985_v8, %v4413_v48  ;;  %3672 = vmatprep.subr.bf16.mxu0 %v3671_v37 }
 0x40a   : > { %3674 = vmatpush1.bf16.msra.mxu0 %v3673_v13 }
 0x40b   : > { %v3677_v57 = vpack.c.bf16 %v988_v17, %v986_v22  ;;  %v3675_v25 = vpack.c.bf16 %v989_v4, %v987_v54 }
 0x40d   : > { %3676 = vmatprep.subr.bf16.mxu0 %v3675_v25 }
 0x40e   : > { %3678 = vmatpush1.bf16.msra.mxu0 %v3677_v57 }
 0x411   : > { %1071 = vmatmul.mubr.f32.vlgmr.msra.gmra.mrb[4].mxu0 %v3485_v60 }
 0x412   : > { %3494 = vmatprep.mubr.msk.f32.mxu0 %vm497_vm1, %v3488_v16 }
 0x415   : > { %1077 = vmatmul.mubr.f32.gmra.mrb[6].mxu0 %v3487_v29 }
 0x418   : > { %v998_v41 = vpop.permute.xlu1 %997 }
 0x4e4   : > { %v1072_v51 = vpop.f32.mrb[4].mxu0 }
 0x4e5   : > { %v1073_v34 = vadd.f32 %v1072_v51, %v993_v31  ;;  %v1074_v52 = vpop.f32.mrb[5].mxu0 }
 0x4e6   : > { %v1075_v43 = vadd.f32 %v1074_v52, %v993_v31 }
 0x4e7   : > { %v4902_v33 = vmax.f32 %v1073_v34, 0.0 }
 0x4e8   : > { %v1078_v47 = vpop.f32.mrb[6].mxu0  ;;  %v4908_v39 = vmax.f32 %v1075_v43, 0.0 }
 0x4e9   : > { %v1079_v50 = vadd.f32 %v1078_v47, %v998_v41  ;;  %v1080_v44 = vpop.f32.mrb[7].mxu0  ;;  %1092 = vrot.lane.b32.xlu0 %v4902_v33, %s4132_s11 }
 0x4ea   : > { %v1081_v62 = vadd.f32 %v1080_v44, %v998_v41 }
 0x4eb   : > { %v4906_v53 = vmax.f32 %v1079_v50, 0.0 }
 0x4ec   : > { %v4910_v56 = vmax.f32 %v1081_v62, 0.0 }
 0x4ed   : > { %1108 = vrot.lane.b32.xlu0 %v4902_v33, %s4133_s16  ;;  %1094 = vrot.lane.b32.xlu1 %v4906_v53, %s4132_s11  ;;  %v3697_v58 = vpack.c.bf16 %v4906_v53, %v4902_v33 }
 0x4ee   : > { %v3695_v36 = vpack.c.bf16 %v4910_v56, %v4908_v39 }
 0x4f1   : > { %1124 = vrot.lane.b32.xlu0 %v4902_v33, %s4134_s17  ;;  %1110 = vrot.lane.b32.xlu1 %v4906_v53, %s4133_s16 }
 0x4f5   : > { %1140 = vrot.lane.b32.xlu0 %v4902_v33, %s4135_s18  ;;  %1126 = vrot.lane.b32.xlu1 %v4906_v53, %s4134_s17 }
 0x4f9   : > { %1156 = vrot.lane.b32.xlu0 %v4902_v33, %s4136_s19  ;;  %1142 = vrot.lane.b32.xlu1 %v4906_v53, %s4135_s18 }
 0x4fd   : > { %1172 = vrot.lane.b32.xlu0 %v4902_v33, %s4137_s20  ;;  %1158 = vrot.lane.b32.xlu1 %v4906_v53, %s4136_s19 }
 0x501   : > { %1188 = vrot.lane.b32.xlu0 %v4902_v33, %s4138_s21  ;;  %1174 = vrot.lane.b32.xlu1 %v4906_v53, %s4137_s20 }
 0x505   : > { %1096 = vrot.lane.b32.xlu0 %v4908_v39, %s4132_s11  ;;  %1190 = vrot.lane.b32.xlu1 %v4906_v53, %s4138_s21 }
 0x509   : > { %1112 = vrot.lane.b32.xlu0 %v4908_v39, %s4133_s16  ;;  %1098 = vrot.lane.b32.xlu1 %v4910_v56, %s4132_s11 }
 0x50d   : > { %1128 = vrot.lane.b32.xlu0 %v4908_v39, %s4134_s17  ;;  %1114 = vrot.lane.b32.xlu1 %v4910_v56, %s4133_s16 }
 0x511   : > { %1144 = vrot.lane.b32.xlu0 %v4908_v39, %s4135_s18  ;;  %1130 = vrot.lane.b32.xlu1 %v4910_v56, %s4134_s17 }
 0x515   : > { %1204 = vrot.lane.b32.xlu0 %v4902_v33, %s4139_s22  ;;  %1146 = vrot.lane.b32.xlu1 %v4910_v56, %s4135_s18 }
 0x519   : > { %1160 = vrot.lane.b32.xlu0 %v4908_v39, %s4136_s19  ;;  %1206 = vrot.lane.b32.xlu1 %v4906_v53, %s4139_s22 }
 0x51d   : > { %1176 = vrot.lane.b32.xlu0 %v4908_v39, %s4137_s20  ;;  %1162 = vrot.lane.b32.xlu1 %v4910_v56, %s4136_s19 }
 0x521   : > { %1192 = vrot.lane.b32.xlu0 %v4908_v39, %s4138_s21  ;;  %1178 = vrot.lane.b32.xlu1 %v4910_v56, %s4137_s20 }
 0x525   : > { %1208 = vrot.lane.b32.xlu0 %v4908_v39, %s4139_s22  ;;  %1194 = vrot.lane.b32.xlu1 %v4910_v56, %s4138_s21 }
 0x529   : > { %1222 = vperm.xlu0 %4045, %v3497_v38   ;;  %1210 = vrot.lane.b32.xlu1 %v4910_v56, %s4139_s22 }
 0x55b   : > { %v1093_v26 = vpop.permute.xlu0 %1092 }
 0x55f   : > { %v1109_v32 = vpop.permute.xlu0 %1108  ;;  %v1095_v61 = vpop.permute.xlu1 %1094 }
 0x563   : > { %v1125_v18 = vpop.permute.xlu0 %1124  ;;  %v1111_v19 = vpop.permute.xlu1 %1110 }
 0x567   : > { %v1141_v24 = vpop.permute.xlu0 %1140  ;;  %v1127_v2 = vpop.permute.xlu1 %1126 }
 0x56b   : > { %v4985_v11 = vpop.permute.xlu0 %1156  ;;  %v1143_v63 = vpop.permute.xlu1 %1142 }
 0x56f   : > { %v4987_v5 = vpop.permute.xlu0 %1172  ;;  %v4989_v6 = vpop.permute.xlu1 %1158 }
 0x573   : > { %v4991_v7 = vpop.permute.xlu0 %1188  ;;  %v4993_v59 = vpop.permute.xlu1 %1174 }
 0x577   : > { %v1097_v9 = vpop.permute.xlu0 %1096  ;;  %v4995_v37 = vpop.permute.xlu1 %1190 }
 0x578   : > { %v1100_v13 = vsel %vm389_vm6, %v1093_v26, %v1097_v9  ;;  %v1102_v35 = vsel %vm389_vm6, %v1097_v9, %v1093_v26 }
 0x579   : > { %v1104_v4 = vmul.f32 %v1102_v35, %v4288_v21  ;;  %v1105_v57 = vmul.f32 %v1100_v13, %v4285_v20 }
 0x57b   : > { %v1113_v8 = vpop.permute.xlu0 %1112  ;;  %v1099_v22 = vpop.permute.xlu1 %1098 }
 0x57c   : > { %v1101_v54 = vsel %vm389_vm6, %v1095_v61, %v1099_v22  ;;  %v1103_v17 = vsel %vm389_vm6, %v1099_v22, %v1095_v61  ;;  %v1118_v16 = vsel %vm402_vm7, %v1113_v8, %v1109_v32  ;;  %v1116_v52 = vsel %vm402_vm7, %v1109_v32, %v1113_v8 }
 0x57d   : > { %v1106_v25 = vmul.f32 %v1103_v17, %v4288_v21  ;;  %v1107_v60 = vmul.f32 %v1101_v54, %v4285_v20  ;;  %v1120_v47 = vmul.f32 %v1118_v16, %v4302_v30 }
 0x57f   : > { %v3681_v29 = vpack.c.bf16 %v1106_v25, %v1104_v4  ;;  %v1129_v31 = vpop.permute.xlu0 %1128  ;;  %v1115_v51 = vpop.permute.xlu1 %1114  ;;  %v3679_v34 = vpack.c.bf16 %v1107_v60, %v1105_v57 }
 0x580   : > { %v1117_v41 = vsel %vm402_vm7, %v1111_v19, %v1115_v51  ;;  %v1119_v43 = vsel %vm402_vm7, %v1115_v51, %v1111_v19  ;;  %v1132_v62 = vsel %vm415_vm10, %v1125_v18, %v1129_v31  ;;  %v1134_v55 = vsel %vm415_vm10, %v1129_v31, %v1125_v18 }
 0x581   : > { %v1122_v50 = vmul.f32 %v1119_v43, %v4302_v30  ;;  %3680 = vmatprep.subr.bf16.mxu1 %v3679_v34  ;;  %v3683_v44 = vpack.c.bf16 %v1117_v41, %v1116_v52  ;;  %v1136_v9 = vmul.f32 %v1134_v55, %v4329_v46  ;;  %v1137_v13 = vmul.f32 %v1132_v62, %v4326_v45 }
 0x582   : > { %3682 = vmatpush1.bf16.msra.mxu1 %v3681_v29 }
 0x583   : > { %v3685_v38 = vpack.c.bf16 %v1122_v50, %v1120_v47  ;;  %v1145_v26 = vpop.permute.xlu0 %1144  ;;  %3684 = vmatprep.subr.bf16.mxu1 %v3683_v44  ;;  %v1131_v32 = vpop.permute.xlu1 %1130 }
 0x584   : > { %v1133_v61 = vsel %vm415_vm10, %v1127_v2, %v1131_v32  ;;  %v1135_v19 = vsel %vm415_vm10, %v1131_v32, %v1127_v2  ;;  %v1148_v18 = vsel %vm428_vm12, %v1141_v24, %v1145_v26  ;;  %v1150_v22 = vsel %vm428_vm12, %v1145_v26, %v1141_v24 }
 0x585   : > { %v1138_v35 = vmul.f32 %v1135_v19, %v4329_v46  ;;  %v1139_v8 = vmul.f32 %v1133_v61, %v4326_v45  ;;  %v1152_v60 = vmul.f32 %v1150_v22, %v4338_v49  ;;  %v1153_v16 = vmul.f32 %v1148_v18, %v4285_v20 }
 0x586   : > { %3686 = vmatpush1.bf16.msra.mxu1 %v3685_v38 }
 0x587   : > { %v3689_v54 = vpack.c.bf16 %v1138_v35, %v1136_v9  ;;  %v1205_v17 = vpop.permute.xlu0 %1204  ;;  %v1147_v4 = vpop.permute.xlu1 %1146  ;;  %v3687_v57 = vpack.c.bf16 %v1139_v8, %v1137_v13 }
 0x588   : > { %v1149_v2 = vsel %vm428_vm12, %v1143_v63, %v1147_v4  ;;  %v1151_v25 = vsel %vm428_vm12, %v1147_v4, %v1143_v63 }
 0x589   : > { %v1154_v29 = vmul.f32 %v1151_v25, %v4338_v49  ;;  %v1155_v31 = vmul.f32 %v1149_v2, %v4285_v20  ;;  %3688 = vmatprep.subr.bf16.mxu1 %v3687_v57 }
 0x58a   : > { %3690 = vmatpush1.bf16.msra.mxu1 %v3689_v54 }
 0x58b   : > { %v3693_v24 = vpack.c.bf16 %v1154_v29, %v1152_v60  ;;  %v1161_v51 = vpop.permute.xlu0 %1160  ;;  %v1207_v34 = vpop.permute.xlu1 %1206  ;;  %v3691_v52 = vpack.c.bf16 %v1155_v31, %v1153_v16 }
 0x58c   : > { %v1164_v41 = vsel %vm441_vm13, %v4985_v11, %v1161_v51  ;;  %v1166_v63 = vsel %vm441_vm13, %v1161_v51, %v4985_v11 }
 0x58d   : > { %3692 = vmatprep.subr.bf16.mxu1 %v3691_v52  ;;  %v1168_v62 = vmul.f32 %v1164_v41, %v4374_v15  ;;  %v1169_v55 = vmul.f32 %v1166_v63, %v4326_v45  ;;  %v3495_v63 = vld [vmem:[%s6821_s3 + $0x10] sm:$0xff] }
 0x58e   : > { %3694 = vmatpush1.bf16.msra.mxu1 %v3693_v24 }
 0x58f   : > { %v1177_v43 = vpop.permute.xlu0 %1176  ;;  %3696 = vmatprep.subr.bf16.mxu1 %v3695_v36  ;;  %v1163_v47 = vpop.permute.xlu1 %1162 }
 0x590   : > { %v1165_v50 = vsel %vm441_vm13, %v4989_v6, %v1163_v47  ;;  %v1167_v44 = vsel %vm441_vm13, %v1163_v47, %v4989_v6  ;;  %v1180_v39 = vsel %vm454_vm4, %v4987_v5, %v1177_v43  ;;  %v1182_v56 = vsel %vm454_vm4, %v1177_v43, %v4987_v5 }
 0x591   : > { %v1170_v11 = vmul.f32 %v1165_v50, %v4374_v15  ;;  %v1171_v38 = vmul.f32 %v1167_v44, %v4326_v45  ;;  %v1184_v9 = vmul.f32 %v1180_v39, %v4338_v49  ;;  %v1185_v5 = vmul.f32 %v1182_v56, %v4384_v23 }
 0x592   : > { %3698 = vmatpush1.bf16.msra.mxu1 %v3697_v58 }
 0x593   : > { %v3701_v36 = vpack.c.bf16 %v1170_v11, %v1168_v62  ;;  %v1193_v6 = vpop.permute.xlu0 %1192  ;;  %v1179_v26 = vpop.permute.xlu1 %1178  ;;  %v3699_v32 = vpack.c.bf16 %v1171_v38, %v1169_v55 }
 0x594   : > { %v1181_v61 = vsel %vm454_vm4, %v4993_v59, %v1179_v26  ;;  %v1183_v19 = vsel %vm454_vm4, %v1179_v26, %v4993_v59  ;;  %v1198_v53 = vsel %vm467_vm5, %v1193_v6, %v4991_v7  ;;  %v1196_v25 = vsel %vm467_vm5, %v4991_v7, %v1193_v6 }
 0x595   : > { %v1186_v13 = vmul.f32 %v1181_v61, %v4338_v49  ;;  %v1187_v33 = vmul.f32 %v1183_v19, %v4384_v23  ;;  %3700 = vmatprep.subr.bf16.mxu1 %v3699_v32  ;;  %v1201_v22 = vmul.f32 %v1198_v53, %v4402_v40  ;;  %v4120_v19 = vld [vmem:[%s4208_s15] sm:$0x77] }
 0x596   : > { %3702 = vmatpush1.bf16.msra.mxu1 %v3701_v36 }
 0x597   : > { %v3705_v58 = vpack.c.bf16 %v1186_v13, %v1184_v9  ;;  %v1209_v35 = vpop.permute.xlu0 %1208  ;;  %v1195_v8 = vpop.permute.xlu1 %1194  ;;  %v3703_v18 = vpack.c.bf16 %v1187_v33, %v1185_v5 }
 0x598   : > { %v1199_v59 = vsel %vm467_vm5, %v1195_v8, %v4995_v37  ;;  %v1197_v54 = vsel %vm467_vm5, %v4995_v37, %v1195_v8  ;;  %v1212_v57 = vsel %vm480_vm11, %v1205_v17, %v1209_v35  ;;  %v1214_v2 = vsel %vm480_vm11, %v1209_v35, %v1205_v17 }
 0x599   : > { %v1203_v4 = vmul.f32 %v1199_v59, %v4402_v40  ;;  %3704 = vmatprep.subr.bf16.mxu1 %v3703_v18  ;;  %v3709_v29 = vpack.c.bf16 %v1197_v54, %v1196_v25  ;;  %v1216_v24 = vmul.f32 %v1212_v57, %v4374_v15  ;;  %v1217_v51 = vmul.f32 %v1214_v2, %v4413_v48 }
 0x59a   : > { %3706 = vmatpush1.bf16.msra.mxu1 %v3705_v58 }
 0x59b   : > { %v1211_v60 = vpop.permute.xlu1 %1210  ;;  %v3707_v16 = vpack.c.bf16 %v1203_v4, %v1201_v22 }
 0x59c   : > { %v1213_v37 = vsel %vm480_vm11, %v1207_v34, %v1211_v60  ;;  %v1215_v31 = vsel %vm480_vm11, %v1211_v60, %v1207_v34 }
 0x59d   : > { %v1218_v17 = vmul.f32 %v1213_v37, %v4374_v15  ;;  %v1219_v52 = vmul.f32 %v1215_v31, %v4413_v48  ;;  %3708 = vmatprep.subr.bf16.mxu1 %v3707_v16 }
 0x59e   : > { %3710 = vmatpush1.bf16.msra.mxu1 %v3709_v29 }
 0x59f   : > { %v3713_v7 = vpack.c.bf16 %v1218_v17, %v1216_v24  ;;  %v3711_v41 = vpack.c.bf16 %v1219_v52, %v1217_v51  ;;  %v1349_v24 = vld [vmem:[%s6824_s6] sm:$0xff]  ;;  %v1348_v51 = vld [vmem:[%s6823_s5 + $0x8] sm:$0xff] }
 0x5a0   : > { %3504 = vmatprep.mubr.msk.f32.mxu0 %vm497_vm1, %v1348_v51 }
 0x5a1   : > { %3712 = vmatprep.subr.bf16.mxu1 %v3711_v41 }
 0x5a2   : > { %3714 = vmatpush1.bf16.msra.mxu1 %v3713_v7 }
 0x5a5   : > { %1293 = vmatmul.mubr.f32.vlgmr.msra.gmra.mrb[2].mxu1 %v3495_v63 }
 0x5a6   : > { %1698 = vmatprep.mubr.f32.mxu1 %v4131_v0 }
 0x5a8   : > { %v1223_v34 = vpop.permute.xlu0 %1222 }
 0x678   : > { %v1294_v43 = vpop.f32.mrb[2].mxu1 }
 0x679   : > { %v1295_v47 = vadd.f32 %v1294_v43, %v1223_v34  ;;  %v1296_v50 = vpop.f32.mrb[3].mxu1 }
 0x67a   : > { %v1297_v44 = vadd.f32 %v1296_v50, %v1223_v34 }
 0x67b   : > { %v3499_v62 = vmul.f32 -1.442695, %v1295_v47 }
 0x67c   : > { %v3500_v55 = vmul.f32 -1.442695, %v1297_v44 }
 0x67d   : > { %4060 = vpow2.f32 %v3499_v62 }
 0x67e   : > { %4062 = vpow2.f32 %v3500_v55 }
 0x687   : > { %v4061_v11 = vpop.eup %4060 }
 0x688   : > { %v4063_v38 = vpop.eup %4062  ;;  %v1305_v39 = vadd.f32 1.0, %v4061_v11 }
 0x689   : > { %v1306_v56 = vadd.f32 1.0, %v4063_v38 }
 0x68a   : > { %4064 = vrcp.f32 %v1305_v39 }
 0x68b   : > { %4066 = vrcp.f32 %v1306_v56 }
 0x694   : > { %v5111_v36 = vpop.eup %4064 }
 0x695   : > { %v5113_v6 = vpop.eup %4066  ;;  %v5116_v26 = vrot.slane %v5111_v36, 5  ;;  %v1316_v32 = vmax.f32 %v5111_v36, 0.05 }
 0x696   : > { %v1317_v61 = vmax.f32 %v5113_v6, 0.05  ;;  %v1313_v33 = vcombine.low %v5111_v36, %v5113_v6  ;;  %v5148_v25 = vrot.slane %v5113_v6, 5 }
 0x697   : > { %v5123_v9 = vsel %vm374_vm0, %v4120_v19, %v5116_v26  ;;  %4068 = vrcp.f32 %v1316_v32 }
 0x698   : > { %1350 = vrot.lane.b32.xlu1 %v5123_v9, %s4132_s11  ;;  %4070 = vrcp.f32 %v1317_v61  ;;  %v1315_v18 = vsub.f32 %v4120_v19, %v1313_v33  ;;  %v5156_v60 = vsel %vm374_vm0, %v4219_v3, %v5148_v25 }
 0x69c   : > { %1366 = vrot.lane.b32.xlu1 %v5123_v9, %s4133_s16 }
 0x6a0   : > { %1382 = vrot.lane.b32.xlu1 %v5123_v9, %s4134_s17 }
 0x6a1   : > { %v4069_v5 = vpop.eup %4068 }
 0x6a2   : > { %v4071_v13 = vpop.eup %4070 }
 0x6a3   : > { %v1322_v53 = vcombine.low %v4069_v5, %v4071_v13  ;;  %v1323_v58 = vcombine.high %v4069_v5, %v4071_v13 }
 0x6a4   : > { %1398 = vrot.lane.b32.xlu1 %v5123_v9, %s4135_s18 }
 0x6a5   : > { %v3501_v35 = vrot.slane %v1322_v53, 11  ;;  %v1326_v8 = vrot.slane %v1323_v58, 7 }
 0x6a7   : > { %v1327_v59 = vsel %vm4657_vm2, %v3501_v35, %v1326_v8 }
 0x6a8   : > { %1414 = vrot.lane.b32.xlu1 %v5123_v9, %s4136_s19  ;;  %v1329_v22 = vmul.f32 %v1327_v59, %v1315_v18 }
 0x6aa   : > { %v1330_v54 = vadd.f32 %v1329_v22, %v1313_v33 }
 0x6ac   : > { %1430 = vrot.lane.b32.xlu1 %v5123_v9, %s4137_s20  ;;  %v1337_v4 = vrot.slane %v1330_v54, 7  ;;  %v1336_v16 = vcombine.high %v1330_v54, %v1330_v54 }
 0x6ae   : > { %v5143_v57 = vsel %vm820_vm9, %v5116_v26, %v1337_v4  ;;  %v1338_v29 = vrot.slane %v1336_v16, 7 }
 0x6af   : > { %v1345_v2 = vsel %vm851_vm3, %v5143_v57, 0.0 }
 0x6b0   : > { %1446 = vrot.lane.b32.xlu1 %v5123_v9, %s4138_s21  ;;  %1352 = vrot.lane.b32.xlu0 %v1345_v2, %s4132_s11  ;;  %v5178_v37 = vsel %vm820_vm9, %v5148_v25, %v1338_v29 }
 0x6b1   : > { %v1346_v31 = vsel %vm851_vm3, %v5178_v37, 0.0 }
 0x6b4   : > { %1354 = vrot.lane.b32.xlu1 %v5156_v60, %s4132_s11  ;;  %1368 = vrot.lane.b32.xlu0 %v1345_v2, %s4133_s16 }
 0x6b8   : > { %1370 = vrot.lane.b32.xlu1 %v5156_v60, %s4133_s16  ;;  %1384 = vrot.lane.b32.xlu0 %v1345_v2, %s4134_s17 }
 0x6bc   : > { %1386 = vrot.lane.b32.xlu1 %v5156_v60, %s4134_s17  ;;  %1400 = vrot.lane.b32.xlu0 %v1345_v2, %s4135_s18 }
 0x6c0   : > { %1402 = vrot.lane.b32.xlu1 %v5156_v60, %s4135_s18  ;;  %1416 = vrot.lane.b32.xlu0 %v1345_v2, %s4136_s19 }
 0x6c4   : > { %1462 = vrot.lane.b32.xlu1 %v5123_v9, %s4139_s22  ;;  %1432 = vrot.lane.b32.xlu0 %v1345_v2, %s4137_s20 }
 0x6c8   : > { %1418 = vrot.lane.b32.xlu1 %v5156_v60, %s4136_s19  ;;  %1448 = vrot.lane.b32.xlu0 %v1345_v2, %s4138_s21 }
 0x6cc   : > { %1434 = vrot.lane.b32.xlu1 %v5156_v60, %s4137_s20  ;;  %1356 = vrot.lane.b32.xlu0 %v1346_v31, %s4132_s11 }
 0x6d0   : > { %1450 = vrot.lane.b32.xlu1 %v5156_v60, %s4138_s21  ;;  %1372 = vrot.lane.b32.xlu0 %v1346_v31, %s4133_s16 }
 0x6d4   : > { %1466 = vrot.lane.b32.xlu1 %v5156_v60, %s4139_s22  ;;  %1388 = vrot.lane.b32.xlu0 %v1346_v31, %s4134_s17 }
 0x6d8   : > { %1480 = vperm.xlu1 %4046, %v1349_v24   ;;  %1404 = vrot.lane.b32.xlu0 %v1346_v31, %s4135_s18 }
 0x6dc   : > { %1464 = vrot.lane.b32.xlu0 %v1345_v2, %s4139_s22 }
 0x6e0   : > { %1420 = vrot.lane.b32.xlu0 %v1346_v31, %s4136_s19 }
 0x6e4   : > { %1436 = vrot.lane.b32.xlu0 %v1346_v31, %s4137_s20 }
 0x6e8   : > { %1452 = vrot.lane.b32.xlu0 %v1346_v31, %s4138_s21 }
 0x6ec   : > { %1468 = vrot.lane.b32.xlu0 %v1346_v31, %s4139_s22 }
 0x70a   : > { %v1351_v17 = vpop.permute.xlu1 %1350 }
 0x70e   : > { %v1367_v52 = vpop.permute.xlu1 %1366 }
 0x712   : > { %v1383_v7 = vpop.permute.xlu1 %1382 }
 0x716   : > { %v1399_v41 = vpop.permute.xlu1 %1398 }
 0x71a   : > { %v5204_v63 = vpop.permute.xlu1 %1414 }
 0x71e   : > { %v5206_v34 = vpop.permute.xlu1 %1430 }
 0x722   : > { %v1353_v43 = vpop.permute.xlu0 %1352  ;;  %v5208_v47 = vpop.permute.xlu1 %1446 }
 0x726   : > { %v1369_v50 = vpop.permute.xlu0 %1368  ;;  %v1355_v44 = vpop.permute.xlu1 %1354 }
 0x727   : > { %v1358_v19 = vsel %vm389_vm6, %v1351_v17, %v1355_v44  ;;  %v1360_v5 = vsel %vm389_vm6, %v1355_v44, %v1351_v17 }
 0x728   : > { %v5225_v58 = vmul.f32 %v1360_v5, %v4288_v21  ;;  %v5228_v35 = vmul.f32 %v1358_v19, %v4285_v20 }
 0x72a   : > { %v1385_v62 = vpop.permute.xlu0 %1384  ;;  %v1371_v11 = vpop.permute.xlu1 %1370 }
 0x72b   : > { %v1376_v59 = vsel %vm402_vm7, %v1371_v11, %v1367_v52  ;;  %v5240_v16 = vsel %vm402_vm7, %v1367_v52, %v1371_v11 }
 0x72c   : > { %v5247_v24 = vmul.f32 %v1376_v59, %v4302_v30 }
 0x72e   : > { %v1401_v55 = vpop.permute.xlu0 %1400  ;;  %v1387_v39 = vpop.permute.xlu1 %1386 }
 0x72f   : > { %v1392_v52 = vsel %vm415_vm10, %v1387_v39, %v1383_v7 }
 0x730   : > { %v5261_v5 = vmul.f32 %v1392_v52, %v4329_v46 }
 0x732   : > { %v5210_v38 = vpop.permute.xlu0 %1416  ;;  %v1403_v61 = vpop.permute.xlu1 %1402 }
 0x736   : > { %v5212_v56 = vpop.permute.xlu0 %1432  ;;  %v5234_v22 = vpop.permute.xlu1 %1462 }
 0x73a   : > { %v5214_v32 = vpop.permute.xlu0 %1448 }
 0x73e   : > { %v1357_v13 = vpop.permute.xlu0 %1356 }
 0x73f   : > { %v1359_v33 = vsel %vm389_vm6, %v1353_v43, %v1357_v13  ;;  %v1361_v53 = vsel %vm389_vm6, %v1357_v13, %v1353_v43  ;;  %v1390_v43 = vsel %vm415_vm10, %v1383_v7, %v1387_v39 }
 0x740   : > { %v1364_v8 = vmul.f32 %v1361_v53, %v4288_v21  ;;  %v1365_v18 = vmul.f32 %v1359_v33, %v4285_v20  ;;  %v5264_v13 = vmul.f32 %v1390_v43, %v4326_v45  ;;  %v1419_v33 = vpop.permute.xlu1 %1418  ;;  %v1406_v53 = vsel %vm428_vm12, %v1399_v41, %v1403_v61 }
 0x741   : > { %v1422_v52 = vsel %vm441_vm13, %v5204_v63, %v1419_v33 }
 0x742   : > { %v3717_v54 = vpack.c.bf16 %v1364_v8, %v5225_v58  ;;  %v1373_v4 = vpop.permute.xlu0 %1372  ;;  %v3715_v2 = vpack.c.bf16 %v1365_v18, %v5228_v35  ;;  %v1408_v8 = vsel %vm428_vm12, %v1403_v61, %v1399_v41 }
 0x743   : > { %v1375_v29 = vsel %vm402_vm7, %v1369_v50, %v1373_v4  ;;  %v1377_v31 = vsel %vm402_vm7, %v1373_v4, %v1369_v50 }
 0x744   : > { %v1380_v51 = vmul.f32 %v1377_v31, %v4302_v30  ;;  %3716 = vmatprep.subr.bf16.mxu0 %v3715_v2  ;;  %v3719_v17 = vpack.c.bf16 %v1375_v29, %v5240_v16  ;;  %v5279_v2 = vmul.f32 %v1408_v8, %v4338_v49  ;;  %v5282_v29 = vmul.f32 %v1406_v53, %v4285_v20  ;;  %v1435_v31 = vpop.permute.xlu1 %1434 }
 0x745   : > { %3718 = vmatpush1.bf16.msra.mxu0 %v3717_v54  ;;  %v1438_v8 = vsel %vm454_vm4, %v5206_v34, %v1435_v31 }
 0x746   : > { %v3721_v44 = vpack.c.bf16 %v1380_v51, %v5247_v24  ;;  %3720 = vmatprep.subr.bf16.mxu0 %v3719_v17  ;;  %v1389_v11 = vpop.permute.xlu0 %1388 }
 0x747   : > { %v1391_v50 = vsel %vm415_vm10, %v1385_v62, %v1389_v11  ;;  %v1393_v19 = vsel %vm415_vm10, %v1389_v11, %v1385_v62 }
 0x748   : > { %v1396_v7 = vmul.f32 %v1393_v19, %v4329_v46  ;;  %v1397_v39 = vmul.f32 %v1391_v50, %v4326_v45  ;;  %v3734_v19 = vpack.c.bf16 %v5143_v57, %v5123_v9 }
 0x749   : > { %3722 = vmatpush1.bf16.msra.mxu0 %v3721_v44  ;;  %v1424_v44 = vsel %vm441_vm13, %v1419_v33, %v5204_v63  ;;  %v1451_v33 = vpop.permute.xlu1 %1450 }
 0x74a   : > { %v3725_v62 = vpack.c.bf16 %v1396_v7, %v5261_v5  ;;  %v1405_v18 = vpop.permute.xlu0 %1404  ;;  %v3723_v59 = vpack.c.bf16 %v1397_v39, %v5264_v13  ;;  %v5307_v7 = vmul.f32 %v1422_v52, %v4374_v15  ;;  %v5310_v63 = vmul.f32 %v1424_v44, %v4326_v45 }
 0x74b   : > { %v1407_v54 = vsel %vm428_vm12, %v1401_v55, %v1405_v18  ;;  %v1409_v4 = vsel %vm428_vm12, %v1405_v18, %v1401_v55  ;;  %v3731_v55 = vpack.c.bf16 %v5178_v37, %v5156_v60 }
 0x74c   : > { %v1412_v41 = vmul.f32 %v1409_v4, %v4338_v49  ;;  %v1413_v61 = vmul.f32 %v1407_v54, %v4285_v20  ;;  %3724 = vmatprep.subr.bf16.mxu0 %v3723_v59  ;;  %v5331_v4 = vmul.f32 %v1438_v8, %v4338_v49 }
 0x74d   : > { %3726 = vmatpush1.bf16.msra.mxu0 %v3725_v62 }
 0x74e   : > { %v3729_v51 = vpack.c.bf16 %v1412_v41, %v5279_v2  ;;  %v1465_v17 = vpop.permute.xlu0 %1464  ;;  %v3727_v43 = vpack.c.bf16 %v1413_v61, %v5282_v29 }
 0x750   : > { %3728 = vmatprep.subr.bf16.mxu0 %v3727_v43 }
 0x751   : > { %3730 = vmatpush1.bf16.msra.mxu0 %v3729_v51  ;;  %v1467_v51 = vpop.permute.xlu1 %1466 }
 0x752   : > { %3733 = vmatprep.subr.msk.bf16.mxu0 %vm4818_vm14, %v3731_v55  ;;  %v1421_v11 = vpop.permute.xlu0 %1420 }
 0x753   : > { %v1423_v50 = vsel %vm441_vm13, %v5210_v38, %v1421_v11  ;;  %v1425_v37 = vsel %vm441_vm13, %v1421_v11, %v5210_v38  ;;  %v1440_v38 = vsel %vm454_vm4, %v1435_v31, %v5206_v34  ;;  %v1456_v31 = vsel %vm467_vm5, %v1451_v33, %v5208_v47 }
 0x754   : > { %v1428_v39 = vmul.f32 %v1423_v50, %v4374_v15  ;;  %v1429_v53 = vmul.f32 %v1425_v37, %v4326_v45  ;;  %v5334_v34 = vmul.f32 %v1440_v38, %v4384_v23  ;;  %v5347_v44 = vmul.f32 %v1456_v31, %v4402_v40 }
 0x755   : > { %3736 = vmatpush1.bf16.msk.msra.mxu0 %vm4818_vm14, %v3734_v19  ;;  %v1470_v37 = vsel %vm480_vm11, %v5234_v22, %v1467_v51  ;;  %v1472_v19 = vsel %vm480_vm11, %v1467_v51, %v5234_v22 }
 0x756   : > { %v3739_v57 = vpack.c.bf16 %v1428_v39, %v5307_v7  ;;  %v1437_v62 = vpop.permute.xlu0 %1436  ;;  %v3737_v18 = vpack.c.bf16 %v1429_v53, %v5310_v63  ;;  %v5362_v39 = vsel %vm467_vm5, %v5208_v47, %v1451_v33  ;;  %v5374_v22 = vmul.f32 %v1472_v19, %v4413_v48 }
 0x757   : > { %v1439_v59 = vsel %vm454_vm4, %v5212_v56, %v1437_v62  ;;  %v1441_v54 = vsel %vm454_vm4, %v1437_v62, %v5212_v56  ;;  %v5371_v62 = vmul.f32 %v1470_v37, %v4374_v15 }
 0x758   : > { %v1444_v41 = vmul.f32 %v1439_v59, %v4338_v49  ;;  %v1445_v61 = vmul.f32 %v1441_v54, %v4384_v23  ;;  %3738 = vmatprep.subr.bf16.mxu0 %v3737_v18  ;;  %v1481_v54 = vpop.permute.xlu1 %1480 }
 0x759   : > { %3740 = vmatpush1.bf16.msra.mxu0 %v3739_v57 }
 0x75a   : > { %v3743_v43 = vpack.c.bf16 %v1444_v41, %v5331_v4  ;;  %v1453_v56 = vpop.permute.xlu0 %1452  ;;  %v3741_v55 = vpack.c.bf16 %v1445_v61, %v5334_v34 }
 0x75b   : > { %v1457_v52 = vsel %vm467_vm5, %v1453_v56, %v5214_v32  ;;  %v1455_v11 = vsel %vm467_vm5, %v5214_v32, %v1453_v56 }
 0x75c   : > { %v1461_v50 = vmul.f32 %v1457_v52, %v4402_v40  ;;  %3742 = vmatprep.subr.bf16.mxu0 %v3741_v55  ;;  %v3747_v8 = vpack.c.bf16 %v1455_v11, %v5362_v39  ;;  %v1560_v55 = vld [vmem:[%s6826_s8] sm:$0xff] }
 0x75d   : > { %3744 = vmatpush1.bf16.msra.mxu0 %v3743_v43 }
 0x75e   : > { %v1469_v53 = vpop.permute.xlu0 %1468  ;;  %v3745_v32 = vpack.c.bf16 %v1461_v50, %v5347_v44 }
 0x75f   : > { %v1471_v38 = vsel %vm480_vm11, %v1465_v17, %v1469_v53  ;;  %v1473_v57 = vsel %vm480_vm11, %v1469_v53, %v1465_v17  ;;  %v1347_v17 = vld [vmem:[%s6823_s5] sm:$0xff] }
 0x760   : > { %v1476_v47 = vmul.f32 %v1471_v38, %v4374_v15  ;;  %v1477_v33 = vmul.f32 %v1473_v57, %v4413_v48  ;;  %3746 = vmatprep.subr.bf16.mxu0 %v3745_v32 }
 0x761   : > { %3748 = vmatpush1.bf16.msra.mxu0 %v3747_v8 }
 0x762   : > { %v3751_v18 = vpack.c.bf16 %v1476_v47, %v5371_v62  ;;  %v3749_v59 = vpack.c.bf16 %v1477_v33, %v5374_v22 }
 0x764   : > { %3750 = vmatprep.subr.bf16.mxu0 %v3749_v59 }
 0x765   : > { %3752 = vmatpush1.bf16.msra.mxu0 %v3751_v18 }
 0x768   : > { %1551 = vmatmul.mubr.f32.vlgmr.msra.gmra.mrb[8].mxu0 %v1347_v17 }
 0x83b   : > { %v1552_v41 = vpop.f32.mrb[8].mxu0 }
 0x83c   : > { %v1553_v61 = vadd.f32 %v1552_v41, %v1481_v54  ;;  %v1554_v31 = vpop.f32.mrb[9].mxu0 }
 0x83d   : > { %v1555_v51 = vadd.f32 %v1554_v31, %v1481_v54 }
 0x83e   : > { %v5383_v43 = vmax.f32 %v1553_v61, 0.0 }
 0x83f   : > { %v1558_v56 = vmax.f32 %v1555_v51, 0.0 }
 0x840   : > { %1561 = vrot.lane.b32.xlu0 %v5383_v43, %s4132_s11 }
 0x841   : > { %1563 = vrot.lane.b32.xlu1 %v1558_v56, %s4132_s11 }
 0x844   : > { %1569 = vrot.lane.b32.xlu0 %v5383_v43, %s4133_s16 }
 0x845   : > { %1571 = vrot.lane.b32.xlu1 %v1558_v56, %s4133_s16 }
 0x848   : > { %1577 = vrot.lane.b32.xlu0 %v5383_v43, %s4134_s17 }
 0x849   : > { %1579 = vrot.lane.b32.xlu1 %v1558_v56, %s4134_s17 }
 0x84c   : > { %1585 = vrot.lane.b32.xlu0 %v5383_v43, %s4135_s18 }
 0x84d   : > { %1587 = vrot.lane.b32.xlu1 %v1558_v56, %s4135_s18 }
 0x850   : > { %1593 = vrot.lane.b32.xlu0 %v5383_v43, %s4136_s19 }
 0x851   : > { %1595 = vrot.lane.b32.xlu1 %v1558_v56, %s4136_s19 }
 0x854   : > { %1601 = vrot.lane.b32.xlu0 %v5383_v43, %s4137_s20 }
 0x855   : > { %1603 = vrot.lane.b32.xlu1 %v1558_v56, %s4137_s20 }
 0x858   : > { %1609 = vrot.lane.b32.xlu0 %v5383_v43, %s4138_s21 }
 0x859   : > { %1611 = vrot.lane.b32.xlu1 %v1558_v56, %s4138_s21 }
 0x85c   : > { %1617 = vrot.lane.b32.xlu0 %v5383_v43, %s4139_s22 }
 0x85d   : > { %1619 = vrot.lane.b32.xlu1 %v1558_v56, %s4139_s22 }
 0x860   : > { %1627 = vperm.xlu0 %4045, %v1560_v55  }
 0x8b2   : > { %v1562_v52 = vpop.permute.xlu0 %1561 }
 0x8b3   : > { %v1564_v11 = vpop.permute.xlu1 %1563 }
 0x8b4   : > { %v1565_v50 = vsel %vm389_vm6, %v1562_v52, %v1564_v11  ;;  %v1566_v37 = vsel %vm389_vm6, %v1564_v11, %v1562_v52 }
 0x8b5   : > { %v1568_v53 = vmul.f32 %v1565_v50, %v4285_v20  ;;  %v1567_v57 = vmul.f32 %v1566_v37, %v4288_v21 }
 0x8b6   : > { %v1570_v19 = vpop.permute.xlu0 %1569 }
 0x8b7   : > { %v1572_v32 = vpop.permute.xlu1 %1571 }
 0x8b8   : > { %v1573_v8 = vsel %vm402_vm7, %v1570_v19, %v1572_v32  ;;  %v1574_v38 = vsel %vm402_vm7, %v1572_v32, %v1570_v19 }
 0x8b9   : > { %v1575_v47 = vmul.f32 %v1574_v38, %v4302_v30  ;;  %v3753_v33 = vpack.c.bf16 %v1573_v8, %v1568_v53 }
 0x8ba   : > { %v1578_v18 = vpop.permute.xlu0 %1577 }
 0x8bb   : > { %v3755_v59 = vpack.c.bf16 %v1575_v47, %v1567_v57  ;;  %v1580_v17 = vpop.permute.xlu1 %1579  ;;  %3754 = vmatprep.subr.bf16.mxu1 %v3753_v33 }
 0x8bc   : > { %v1581_v54 = vsel %vm415_vm10, %v1578_v18, %v1580_v17  ;;  %v1582_v41 = vsel %vm415_vm10, %v1580_v17, %v1578_v18 }
 0x8bd   : > { %3756 = vmatpush1.bf16.msra.mxu1 %v3755_v59  ;;  %v1583_v52 = vmul.f32 %v1582_v41, %v4329_v46  ;;  %v1584_v11 = vmul.f32 %v1581_v54, %v4326_v45 }
 0x8be   : > { %v1586_v61 = vpop.permute.xlu0 %1585 }
 0x8bf   : > { %v1588_v31 = vpop.permute.xlu1 %1587 }
 0x8c0   : > { %v1589_v51 = vsel %vm428_vm12, %v1586_v61, %v1588_v31  ;;  %v1590_v55 = vsel %vm428_vm12, %v1588_v31, %v1586_v61 }
 0x8c1   : > { %v1591_v50 = vmul.f32 %v1590_v55, %v4338_v49  ;;  %v1592_v37 = vmul.f32 %v1589_v51, %v4285_v20 }
 0x8c2   : > { %v1594_v19 = vpop.permute.xlu0 %1593 }
 0x8c3   : > { %v3759_v53 = vpack.c.bf16 %v1591_v50, %v1583_v52  ;;  %v1596_v32 = vpop.permute.xlu1 %1595  ;;  %v3757_v8 = vpack.c.bf16 %v1592_v37, %v1584_v11 }
 0x8c4   : > { %v1597_v38 = vsel %vm441_vm13, %v1594_v19, %v1596_v32  ;;  %v1598_v57 = vsel %vm441_vm13, %v1596_v32, %v1594_v19 }
 0x8c5   : > { %v1599_v47 = vmul.f32 %v1597_v38, %v4374_v15  ;;  %v1600_v33 = vmul.f32 %v1598_v57, %v4326_v45  ;;  %3758 = vmatprep.subr.bf16.mxu1 %v3757_v8 }
 0x8c6   : > { %3760 = vmatpush1.bf16.msra.mxu1 %v3759_v53  ;;  %v1602_v18 = vpop.permute.xlu0 %1601 }
 0x8c7   : > { %v3763_v59 = vpack.c.bf16 %v1599_v47, %v5383_v43  ;;  %v1604_v17 = vpop.permute.xlu1 %1603  ;;  %v3761_v54 = vpack.c.bf16 %v1600_v33, %v1558_v56  ;;  %v1559_v47 = vld [vmem:[%s6825_s7] sm:$0xff] }
 0x8c8   : > { %v1606_v41 = vsel %vm454_vm4, %v1604_v17, %v1602_v18  ;;  %v1605_v31 = vsel %vm454_vm4, %v1602_v18, %v1604_v17 }
 0x8c9   : > { %3762 = vmatprep.subr.bf16.mxu1 %v3761_v54  ;;  %v1608_v52 = vmul.f32 %v1606_v41, %v4384_v23  ;;  %v1607_v11 = vmul.f32 %v1605_v31, %v4338_v49 }
 0x8ca   : > { %3764 = vmatpush1.bf16.msra.mxu1 %v3763_v59  ;;  %v1610_v61 = vpop.permute.xlu0 %1609 }
 0x8cb   : > { %v1612_v51 = vpop.permute.xlu1 %1611 }
 0x8cc   : > { %v1614_v55 = vsel %vm467_vm5, %v1612_v51, %v1610_v61  ;;  %v1613_v43 = vsel %vm467_vm5, %v1610_v61, %v1612_v51 }
 0x8cd   : > { %v1616_v56 = vmul.f32 %v1614_v55, %v4402_v40  ;;  %v3767_v53 = vpack.c.bf16 %v1613_v43, %v1607_v11 }
 0x8ce   : > { %v1618_v50 = vpop.permute.xlu0 %1617 }
 0x8cf   : > { %v1620_v37 = vpop.permute.xlu1 %1619  ;;  %v3765_v19 = vpack.c.bf16 %v1616_v56, %v1608_v52 }
 0x8d0   : > { %v1622_v32 = vsel %vm480_vm11, %v1620_v37, %v1618_v50  ;;  %v1621_v8 = vsel %vm480_vm11, %v1618_v50, %v1620_v37 }
 0x8d1   : > { %3766 = vmatprep.subr.bf16.mxu1 %v3765_v19  ;;  %v1624_v38 = vmul.f32 %v1622_v32, %v4413_v48  ;;  %v1623_v57 = vmul.f32 %v1621_v8, %v4374_v15 }
 0x8d2   : > { %3768 = vmatpush1.bf16.msra.mxu1 %v3767_v53 }
 0x8d3   : > { %1650 = vmatprep.subr.mxu1 %v1624_v38 }
 0x8d6   : > { %1651 = vmatpush1.msra.mxu1 %v1623_v57 }
 0x8d7   : > { %3505 = vmatmul.mubr.msk.f32.vlgmr.msra.gmra.mrb[4].mxu1 %vm6828_vm15, %v1559_v47 }
 0x8d8   : > { %3516 = vmatprep.mubr.msk.f32.mxu1 %vm497_vm1, %v3509_v14 }
 0x8df   : > { %v1628_v33 = vpop.permute.xlu0 %1627 }
 0x9aa   : > { %v1700_v18 = vpop.f32.mrb[4].mxu1 }
 0x9ab   : > { %v1701_v59 = vadd.f32 %v1700_v18, %v1628_v33  ;;  %v1702_v17 = vpop.f32.mrb[5].mxu1 }
 0x9ac   : > { %v1703_v54 = vadd.f32 %v1702_v17, %v1628_v33 }
 0x9ad   : > { %v3506_v41 = vmul.f32 -1.442695, %v1701_v59 }
 0x9ae   : > { %v3507_v61 = vmul.f32 -1.442695, %v1703_v54 }
 0x9af   : > { %4072 = vpow2.f32 %v3506_v41 }
 0x9b0   : > { %4074 = vpow2.f32 %v3507_v61 }
 0x9b9   : > { %v4073_v31 = vpop.eup %4072 }
 0x9ba   : > { %v4075_v51 = vpop.eup %4074  ;;  %v1711_v55 = vadd.f32 1.0, %v4073_v31 }
 0x9bb   : > { %v1712_v52 = vadd.f32 1.0, %v4075_v51 }
 0x9bc   : > { %4076 = vrcp.f32 %v1711_v55 }
 0x9bd   : > { %4078 = vrcp.f32 %v1712_v52 }
 0x9c6   : > { %v4077_v43 = vpop.eup %4076 }
 0x9c7   : > { %v4079_v56 = vpop.eup %4078  ;;  %v1719_v11 = vrot.slane %v4077_v43, 2  ;;  %v1725_v50 = vrot.slane %v4077_v43, 7 }
 0x9c8   : > { %v1720_v37 = vrot.slane %v4079_v56, 2  ;;  %v1726_v19 = vrot.slane %v4079_v56, 7 }
 0x9c9   : > { %v1723_v53 = vsel %vm836_vm8, %v5111_v36, %v1719_v11  ;;  %v3365_v32 = vrot.slane %v1719_v11, 7  ;;  %v5467_v8 = vsel %vm820_vm9, %v5116_v26, %v1725_v50 }
 0x9ca   : > { %v3363_v38 = vrot.slane %v1723_v53, 7  ;;  %v1724_v57 = vsel %vm836_vm8, %v5113_v6, %v1720_v37  ;;  %v3367_v47 = vrot.slane %v1720_v37, 7  ;;  %v1731_v33 = vsel %vm851_vm3, %v5467_v8, 0.0 }
 0x9cb   : > { %v3364_v18 = vrot.slane %v1724_v57, 7  ;;  %1741 = vrot.lane.b32.xlu1 %v1731_v33, %s4132_s11  ;;  %v5476_v36 = vsel %vm820_vm9, %v5148_v25, %v1726_v19 }
 0x9cc   : > { %v5479_v59 = vsel %vm820_vm9, %v3363_v38, %v3365_v32  ;;  %v3398_v26 = vsel %vm820_vm9, %v832_v42, %v3363_v38  ;;  %v1732_v6 = vsel %vm851_vm3, %v5476_v36, 0.0  ;;  %v3513_v42 = vld [vmem:[%s6820_s2 + $0x28] sm:$0xff] }
 0x9cd   : > { %3406 = vst [vmem:[%s4679_s24 + $0x10] sm:$0xff] %v3398_v26  ;;  %v5488_v17 = vsel %vm820_vm9, %v3364_v18, %v3367_v47  ;;  %v3399_v54 = vsel %vm820_vm9, %v833_v28, %v3364_v18  ;;  %1743 = vrot.lane.b32.xlu0 %v1732_v6, %s4132_s11 }
 0x9ce   : > { %3407 = vst [vmem:[%s4679_s24 + $0x18] sm:$0xff] %v3399_v54 }
 0x9cf   : > { %1749 = vrot.lane.b32.xlu1 %v1731_v33, %s4133_s16 }
 0x9d1   : > { %1751 = vrot.lane.b32.xlu0 %v1732_v6, %s4133_s16 }
 0x9d3   : > { %1757 = vrot.lane.b32.xlu1 %v1731_v33, %s4134_s17 }
 0x9d5   : > { %1759 = vrot.lane.b32.xlu0 %v1732_v6, %s4134_s17 }
 0x9d7   : > { %1765 = vrot.lane.b32.xlu1 %v1731_v33, %s4135_s18 }
 0x9d9   : > { %1767 = vrot.lane.b32.xlu0 %v1732_v6, %s4135_s18 }
 0x9db   : > { %1773 = vrot.lane.b32.xlu1 %v1731_v33, %s4136_s19 }
 0x9dd   : > { %1775 = vrot.lane.b32.xlu0 %v1732_v6, %s4136_s19 }
 0x9df   : > { %1781 = vrot.lane.b32.xlu1 %v1731_v33, %s4137_s20 }
 0x9e1   : > { %1783 = vrot.lane.b32.xlu0 %v1732_v6, %s4137_s20 }
 0x9e3   : > { %1789 = vrot.lane.b32.xlu1 %v1731_v33, %s4138_s21 }
 0x9e5   : > { %1791 = vrot.lane.b32.xlu0 %v1732_v6, %s4138_s21 }
 0x9e7   : > { %1797 = vrot.lane.b32.xlu1 %v1731_v33, %s4139_s22 }
 0x9e9   : > { %1799 = vrot.lane.b32.xlu0 %v1732_v6, %s4139_s22 }
 0x9eb   : > { %1807 = vperm.xlu1 %4046, %v3512_v1  }
 0x9ed   : > { %1812 = vperm.xlu0 %4045, %v3513_v42  }
 0xa3d   : > { %v1742_v28 = vpop.permute.xlu1 %1741 }
 0xa3f   : > { %v1744_v25 = vpop.permute.xlu0 %1743 }
 0xa40   : > { %v1745_v41 = vsel %vm389_vm6, %v1742_v28, %v1744_v25  ;;  %v1746_v61 = vsel %vm389_vm6, %v1744_v25, %v1742_v28 }
 0xa41   : > { %v1747_v31 = vmul.f32 %v1746_v61, %v4288_v21  ;;  %v1748_v51 = vmul.f32 %v1745_v41, %v4285_v20  ;;  %v1750_v55 = vpop.permute.xlu1 %1749 }
 0xa43   : > { %v3771_v52 = vpack.c.bf16 %v1747_v31, %v5225_v58  ;;  %v1752_v43 = vpop.permute.xlu0 %1751  ;;  %v3769_v56 = vpack.c.bf16 %v1748_v51, %v5228_v35  ;;  %v3785_v31 = vpack.c.bf16 %v5476_v36, %v5156_v60 }
 0xa44   : > { %v1753_v11 = vsel %vm402_vm7, %v1750_v55, %v1752_v43  ;;  %v1754_v50 = vsel %vm402_vm7, %v1752_v43, %v1750_v55  ;;  %v3788_v55 = vpack.c.bf16 %v5467_v8, %v5123_v9 }
 0xa45   : > { %v1755_v37 = vmul.f32 %v1754_v50, %v4302_v30  ;;  %3770 = vmatprep.subr.bf16.mxu1 %v3769_v56  ;;  %v1758_v19 = vpop.permute.xlu1 %1757  ;;  %v3773_v53 = vpack.c.bf16 %v1753_v11, %v5240_v16 }
 0xa46   : > { %3772 = vmatpush1.bf16.msra.mxu1 %v3771_v52 }
 0xa47   : > { %v3775_v32 = vpack.c.bf16 %v1755_v37, %v5247_v24  ;;  %v1760_v38 = vpop.permute.xlu0 %1759  ;;  %3774 = vmatprep.subr.bf16.mxu1 %v3773_v53 }
 0xa48   : > { %v1761_v58 = vsel %vm415_vm10, %v1758_v19, %v1760_v38  ;;  %v1762_v35 = vsel %vm415_vm10, %v1760_v38, %v1758_v19 }
 0xa49   : > { %v1763_v57 = vmul.f32 %v1762_v35, %v4329_v46  ;;  %v1764_v47 = vmul.f32 %v1761_v58, %v4326_v45  ;;  %v1766_v33 = vpop.permute.xlu1 %1765 }
 0xa4a   : > { %3776 = vmatpush1.bf16.msra.mxu1 %v3775_v32 }
 0xa4b   : > { %v3779_v18 = vpack.c.bf16 %v1763_v57, %v5261_v5  ;;  %v1768_v16 = vpop.permute.xlu0 %1767  ;;  %v3777_v26 = vpack.c.bf16 %v1764_v47, %v5264_v13 }
 0xa4c   : > { %v1769_v24 = vsel %vm428_vm12, %v1766_v33, %v1768_v16  ;;  %v1770_v6 = vsel %vm428_vm12, %v1768_v16, %v1766_v33  ;;  %v3508_v33 = vld [vmem:[%s6819_s1 + $0x40] sm:$0xff] }
 0xa4d   : > { %v1771_v54 = vmul.f32 %v1770_v6, %v4338_v49  ;;  %v1772_v14 = vmul.f32 %v1769_v24, %v4285_v20  ;;  %3778 = vmatprep.subr.bf16.mxu1 %v3777_v26  ;;  %v1774_v1 = vpop.permute.xlu1 %1773 }
 0xa4e   : > { %3780 = vmatpush1.bf16.msra.mxu1 %v3779_v18 }
 0xa4f   : > { %v3783_v42 = vpack.c.bf16 %v1771_v54, %v5279_v2  ;;  %v1776_v28 = vpop.permute.xlu0 %1775  ;;  %v3781_v5 = vpack.c.bf16 %v1772_v14, %v5282_v29 }
 0xa50   : > { %v1778_v13 = vsel %vm441_vm13, %v1776_v28, %v1774_v1  ;;  %v1777_v25 = vsel %vm441_vm13, %v1774_v1, %v1776_v28 }
 0xa51   : > { %v1780_v41 = vmul.f32 %v1778_v13, %v4326_v45  ;;  %3782 = vmatprep.subr.bf16.mxu1 %v3781_v5  ;;  %v1782_v61 = vpop.permute.xlu1 %1781  ;;  %v1779_v2 = vmul.f32 %v1777_v25, %v4374_v15 }
 0xa52   : > { %3784 = vmatpush1.bf16.msra.mxu1 %v3783_v42 }
 0xa53   : > { %v1784_v51 = vpop.permute.xlu0 %1783  ;;  %3787 = vmatprep.subr.msk.bf16.mxu1 %vm4818_vm14, %v3785_v31  ;;  %v3791_v60 = vpack.c.bf16 %v1780_v41, %v5310_v63  ;;  %v3793_v11 = vpack.c.bf16 %v1779_v2, %v5307_v7  ;;  %v3520_v31 = vld [vmem:[%s6822_s4 + $0x10] sm:$0xff] }
 0xa54   : > { %v1786_v29 = vsel %vm454_vm4, %v1784_v51, %v1782_v61  ;;  %v1785_v52 = vsel %vm454_vm4, %v1782_v61, %v1784_v51  ;;  %v3519_v61 = vld [vmem:[%s6821_s3 + $0x28] sm:$0xff] }
 0xa55   : > { %v1788_v43 = vmul.f32 %v1786_v29, %v4384_v23  ;;  %v1790_v56 = vpop.permute.xlu1 %1789  ;;  %v1787_v50 = vmul.f32 %v1785_v52, %v4338_v49  ;;  %3521 = vmatprep.mubr.msk.f32.mxu0 %vm497_vm1, %v3519_v61 }
 0xa56   : > { %3790 = vmatpush1.bf16.msk.msra.mxu1 %vm4818_vm14, %v3788_v55 }
 0xa57   : > { %v1792_v36 = vpop.permute.xlu0 %1791  ;;  %3792 = vmatprep.subr.bf16.mxu1 %v3791_v60  ;;  %v3795_v19 = vpack.c.bf16 %v1788_v43, %v5334_v34  ;;  %v3797_v63 = vpack.c.bf16 %v1787_v50, %v5331_v4 }
 0xa58   : > { %v1794_v9 = vsel %vm467_vm5, %v1792_v36, %v1790_v56  ;;  %v1793_v7 = vsel %vm467_vm5, %v1790_v56, %v1792_v36 }
 0xa59   : > { %v1796_v8 = vmul.f32 %v1794_v9, %v4402_v40  ;;  %v1798_v37 = vpop.permute.xlu1 %1797  ;;  %v3801_v34 = vpack.c.bf16 %v1793_v7, %v5362_v39  ;;  %v3510_v39 = vld [vmem:[%s6819_s1 + $0x50] sm:$0xff] }
 0xa5a   : > { %3794 = vmatpush1.bf16.msra.mxu1 %v3793_v11 }
 0xa5b   : > { %v1800_v53 = vpop.permute.xlu0 %1799  ;;  %3796 = vmatprep.subr.bf16.mxu1 %v3795_v19  ;;  %v3799_v35 = vpack.c.bf16 %v1796_v8, %v5347_v44  ;;  %v3511_v44 = vld [vmem:[%s6819_s1 + $0x58] sm:$0xff] }
 0xa5c   : > { %v1802_v32 = vsel %vm480_vm11, %v1800_v53, %v1798_v37  ;;  %v1801_v38 = vsel %vm480_vm11, %v1798_v37, %v1800_v53 }
 0xa5d   : > { %v1804_v58 = vmul.f32 %v1802_v32, %v4413_v48  ;;  %v1803_v57 = vmul.f32 %v1801_v38, %v4374_v15 }
 0xa5e   : > { %3798 = vmatpush1.bf16.msra.mxu1 %v3797_v63 }
 0xa5f   : > { %3800 = vmatprep.subr.bf16.mxu1 %v3799_v35  ;;  %v3803_v4 = vpack.c.bf16 %v1804_v58, %v5374_v22  ;;  %v3805_v47 = vpack.c.bf16 %v1803_v57, %v5371_v62 }
 0xa62   : > { %3802 = vmatpush1.bf16.msra.mxu1 %v3801_v34 }
 0xa63   : > { %3804 = vmatprep.subr.bf16.mxu1 %v3803_v4 }
 0xa66   : > { %3806 = vmatpush1.bf16.msra.mxu1 %v3805_v47 }
 0xa69   : > { %1886 = vmatmul.mubr.f32.vlgmr.msra.gmra.mrb[6].mxu1 %v3508_v33 }
 0xa6a   : > { %3517 = vmatprep.mubr.msk.f32.mxu1 %vm497_vm1, %v3511_v44  ;;  %v1808_v22 = vpop.permute.xlu1 %1807 }
 0xa6c   : > { %v1813_v24 = vpop.permute.xlu0 %1812 }
 0xa6d   : > { %1892 = vmatmul.mubr.f32.gmra.mrb[8].mxu1 %v3510_v39 }
 0xb3c   : > { %v1887_v18 = vpop.f32.mrb[6].mxu1 }
 0xb3d   : > { %v1888_v62 = vadd.f32 %v1887_v18, %v1808_v22  ;;  %v1889_v16 = vpop.f32.mrb[7].mxu1 }
 0xb3e   : > { %v1890_v6 = vadd.f32 %v1889_v16, %v1808_v22 }
 0xb3f   : > { %v5599_v26 = vmax.f32 %v1888_v62, 0.0 }
 0xb40   : > { %v1893_v54 = vpop.f32.mrb[8].mxu1  ;;  %v5605_v5 = vmax.f32 %v1890_v6, 0.0 }
 0xb41   : > { %v1894_v14 = vadd.f32 %v1893_v54, %v1813_v24  ;;  %v1895_v1 = vpop.f32.mrb[9].mxu1  ;;  %1907 = vrot.lane.b32.xlu1 %v5599_v26, %s4132_s11 }
 0xb42   : > { %v1896_v42 = vadd.f32 %v1895_v1, %v1813_v24 }
 0xb43   : > { %v5603_v28 = vmax.f32 %v1894_v14, 0.0 }
 0xb44   : > { %v5607_v13 = vmax.f32 %v1896_v42, 0.0 }
 0xb45   : > { %1909 = vrot.lane.b32.xlu0 %v5603_v28, %s4132_s11  ;;  %1923 = vrot.lane.b32.xlu1 %v5599_v26, %s4133_s16  ;;  %v3825_v25 = vpack.c.bf16 %v5603_v28, %v5599_v26 }
 0xb46   : > { %v3823_v41 = vpack.c.bf16 %v5607_v13, %v5605_v5 }
 0xb49   : > { %1925 = vrot.lane.b32.xlu0 %v5603_v28, %s4133_s16  ;;  %1939 = vrot.lane.b32.xlu1 %v5599_v26, %s4134_s17 }
 0xb4d   : > { %1941 = vrot.lane.b32.xlu0 %v5603_v28, %s4134_s17  ;;  %1955 = vrot.lane.b32.xlu1 %v5599_v26, %s4135_s18 }
 0xb51   : > { %1957 = vrot.lane.b32.xlu0 %v5603_v28, %s4135_s18  ;;  %1971 = vrot.lane.b32.xlu1 %v5599_v26, %s4136_s19 }
 0xb55   : > { %1973 = vrot.lane.b32.xlu0 %v5603_v28, %s4136_s19  ;;  %1987 = vrot.lane.b32.xlu1 %v5599_v26, %s4137_s20 }
 0xb59   : > { %1989 = vrot.lane.b32.xlu0 %v5603_v28, %s4137_s20  ;;  %2003 = vrot.lane.b32.xlu1 %v5599_v26, %s4138_s21 }
 0xb5d   : > { %2005 = vrot.lane.b32.xlu0 %v5603_v28, %s4138_s21  ;;  %1911 = vrot.lane.b32.xlu1 %v5605_v5, %s4132_s11 }
 0xb61   : > { %1913 = vrot.lane.b32.xlu0 %v5607_v13, %s4132_s11  ;;  %1927 = vrot.lane.b32.xlu1 %v5605_v5, %s4133_s16 }
 0xb65   : > { %1929 = vrot.lane.b32.xlu0 %v5607_v13, %s4133_s16  ;;  %1943 = vrot.lane.b32.xlu1 %v5605_v5, %s4134_s17 }
 0xb69   : > { %1945 = vrot.lane.b32.xlu0 %v5607_v13, %s4134_s17  ;;  %1959 = vrot.lane.b32.xlu1 %v5605_v5, %s4135_s18 }
 0xb6d   : > { %1961 = vrot.lane.b32.xlu0 %v5607_v13, %s4135_s18  ;;  %2019 = vrot.lane.b32.xlu1 %v5599_v26, %s4139_s22 }
 0xb71   : > { %2021 = vrot.lane.b32.xlu0 %v5603_v28, %s4139_s22  ;;  %1975 = vrot.lane.b32.xlu1 %v5605_v5, %s4136_s19 }
 0xb75   : > { %1977 = vrot.lane.b32.xlu0 %v5607_v13, %s4136_s19  ;;  %1991 = vrot.lane.b32.xlu1 %v5605_v5, %s4137_s20 }
 0xb79   : > { %1993 = vrot.lane.b32.xlu0 %v5607_v13, %s4137_s20  ;;  %2007 = vrot.lane.b32.xlu1 %v5605_v5, %s4138_s21 }
 0xb7d   : > { %2009 = vrot.lane.b32.xlu0 %v5607_v13, %s4138_s21  ;;  %2023 = vrot.lane.b32.xlu1 %v5605_v5, %s4139_s22 }
 0xb81   : > { %2025 = vrot.lane.b32.xlu0 %v5607_v13, %s4139_s22  ;;  %2037 = vperm.xlu1 %4046, %v3520_v31  }
 0xbb3   : > { %v1908_v51 = vpop.permute.xlu1 %1907 }
 0xbb7   : > { %v1910_v2 = vpop.permute.xlu0 %1909  ;;  %v1924_v29 = vpop.permute.xlu1 %1923 }
 0xbbb   : > { %v1926_v55 = vpop.permute.xlu0 %1925  ;;  %v1940_v52 = vpop.permute.xlu1 %1939 }
 0xbbf   : > { %v1942_v43 = vpop.permute.xlu0 %1941  ;;  %v1956_v56 = vpop.permute.xlu1 %1955 }
 0xbc3   : > { %v1958_v60 = vpop.permute.xlu0 %1957  ;;  %v5682_v36 = vpop.permute.xlu1 %1971 }
 0xbc7   : > { %v5684_v11 = vpop.permute.xlu0 %1973  ;;  %v5686_v50 = vpop.permute.xlu1 %1987 }
 0xbcb   : > { %v5688_v9 = vpop.permute.xlu0 %1989  ;;  %v5690_v8 = vpop.permute.xlu1 %2003 }
 0xbcf   : > { %v5692_v37 = vpop.permute.xlu0 %2005  ;;  %v1912_v19 = vpop.permute.xlu1 %1911 }
 0xbd0   : > { %v1915_v53 = vsel %vm389_vm6, %v1908_v51, %v1912_v19  ;;  %v1917_v63 = vsel %vm389_vm6, %v1912_v19, %v1908_v51 }
 0xbd1   : > { %v1919_v35 = vmul.f32 %v1917_v63, %v4288_v21  ;;  %v1920_v34 = vmul.f32 %v1915_v53, %v4285_v20 }
 0xbd3   : > { %v1914_v32 = vpop.permute.xlu0 %1913  ;;  %v1928_v7 = vpop.permute.xlu1 %1927 }
 0xbd4   : > { %v1916_v38 = vsel %vm389_vm6, %v1910_v2, %v1914_v32  ;;  %v1918_v58 = vsel %vm389_vm6, %v1914_v32, %v1910_v2  ;;  %v1933_v47 = vsel %vm402_vm7, %v1928_v7, %v1924_v29  ;;  %v1931_v18 = vsel %vm402_vm7, %v1924_v29, %v1928_v7 }
 0xbd5   : > { %v1921_v57 = vmul.f32 %v1918_v58, %v4288_v21  ;;  %v1922_v4 = vmul.f32 %v1916_v38, %v4285_v20  ;;  %v1935_v24 = vmul.f32 %v1933_v47, %v4302_v30 }
 0xbd7   : > { %v3809_v33 = vpack.c.bf16 %v1921_v57, %v1919_v35  ;;  %v1930_v44 = vpop.permute.xlu0 %1929  ;;  %v1944_v39 = vpop.permute.xlu1 %1943  ;;  %v3807_v22 = vpack.c.bf16 %v1922_v4, %v1920_v34 }
 0xbd8   : > { %v1932_v62 = vsel %vm402_vm7, %v1926_v55, %v1930_v44  ;;  %v1934_v16 = vsel %vm402_vm7, %v1930_v44, %v1926_v55  ;;  %v1947_v14 = vsel %vm415_vm10, %v1940_v52, %v1944_v39  ;;  %v1949_v1 = vsel %vm415_vm10, %v1944_v39, %v1940_v52 }
 0xbd9   : > { %v1937_v6 = vmul.f32 %v1934_v16, %v4302_v30  ;;  %3808 = vmatprep.subr.bf16.mxu0 %v3807_v22  ;;  %v3811_v54 = vpack.c.bf16 %v1932_v62, %v1931_v18  ;;  %v1951_v29 = vmul.f32 %v1949_v1, %v4329_v46  ;;  %v1952_v55 = vmul.f32 %v1947_v14, %v4326_v45 }
 0xbda   : > { %3810 = vmatpush1.bf16.msra.mxu0 %v3809_v33 }
 0xbdb   : > { %v3813_v42 = vpack.c.bf16 %v1937_v6, %v1935_v24  ;;  %v1946_v61 = vpop.permute.xlu0 %1945  ;;  %3812 = vmatprep.subr.bf16.mxu0 %v3811_v54  ;;  %v1960_v31 = vpop.permute.xlu1 %1959 }
 0xbdc   : > { %v1948_v51 = vsel %vm415_vm10, %v1942_v43, %v1946_v61  ;;  %v1950_v2 = vsel %vm415_vm10, %v1946_v61, %v1942_v43  ;;  %v1963_v52 = vsel %vm428_vm12, %v1956_v56, %v1960_v31  ;;  %v1965_v63 = vsel %vm428_vm12, %v1960_v31, %v1956_v56 }
 0xbdd   : > { %v1953_v19 = vmul.f32 %v1950_v2, %v4329_v46  ;;  %v1954_v53 = vmul.f32 %v1948_v51, %v4326_v45  ;;  %v1967_v34 = vmul.f32 %v1965_v63, %v4338_v49  ;;  %v1968_v57 = vmul.f32 %v1963_v52, %v4285_v20 }
 0xbde   : > { %3814 = vmatpush1.bf16.msra.mxu0 %v3813_v42 }
 0xbdf   : > { %v3817_v32 = vpack.c.bf16 %v1953_v19, %v1951_v29  ;;  %v1962_v7 = vpop.permute.xlu0 %1961  ;;  %v2020_v38 = vpop.permute.xlu1 %2019  ;;  %v3815_v58 = vpack.c.bf16 %v1954_v53, %v1952_v55 }
 0xbe0   : > { %v1964_v43 = vsel %vm428_vm12, %v1958_v60, %v1962_v7  ;;  %v1966_v35 = vsel %vm428_vm12, %v1962_v7, %v1958_v60 }
 0xbe1   : > { %v1969_v4 = vmul.f32 %v1966_v35, %v4338_v49  ;;  %v1970_v47 = vmul.f32 %v1964_v43, %v4285_v20  ;;  %3816 = vmatprep.subr.bf16.mxu0 %v3815_v58 }
 0xbe2   : > { %3818 = vmatpush1.bf16.msra.mxu0 %v3817_v32 }
 0xbe3   : > { %v3821_v56 = vpack.c.bf16 %v1969_v4, %v1967_v34  ;;  %v2022_v33 = vpop.permute.xlu0 %2021  ;;  %v1976_v44 = vpop.permute.xlu1 %1975  ;;  %v3819_v39 = vpack.c.bf16 %v1970_v47, %v1968_v57 }
 0xbe4   : > { %v1979_v22 = vsel %vm441_vm13, %v5682_v36, %v1976_v44  ;;  %v1981_v60 = vsel %vm441_vm13, %v1976_v44, %v5682_v36 }
 0xbe5   : > { %3820 = vmatprep.subr.bf16.mxu0 %v3819_v39  ;;  %v1983_v6 = vmul.f32 %v1979_v22, %v4374_v15  ;;  %v1984_v54 = vmul.f32 %v1981_v60, %v4326_v45  ;;  %v3518_v39 = vld [vmem:[%s6821_s3 + $0x20] sm:$0xff] }
 0xbe6   : > { %3822 = vmatpush1.bf16.msra.mxu0 %v3821_v56 }
 0xbe7   : > { %v1978_v18 = vpop.permute.xlu0 %1977  ;;  %3824 = vmatprep.subr.bf16.mxu0 %v3823_v41  ;;  %v1992_v62 = vpop.permute.xlu1 %1991 }
 0xbe8   : > { %v1980_v16 = vsel %vm441_vm13, %v5684_v11, %v1978_v18  ;;  %v1982_v24 = vsel %vm441_vm13, %v1978_v18, %v5684_v11  ;;  %v1995_v5 = vsel %vm454_vm4, %v5686_v50, %v1992_v62  ;;  %v1997_v13 = vsel %vm454_vm4, %v1992_v62, %v5686_v50 }
 0xbe9   : > { %v1985_v36 = vmul.f32 %v1980_v16, %v4374_v15  ;;  %v1986_v14 = vmul.f32 %v1982_v24, %v4326_v45  ;;  %v1999_v51 = vmul.f32 %v1995_v5, %v4338_v49  ;;  %v2000_v50 = vmul.f32 %v1997_v13, %v4384_v23 }
 0xbea   : > { %3826 = vmatpush1.bf16.msra.mxu0 %v3825_v25 }
 0xbeb   : > { %v3829_v41 = vpack.c.bf16 %v1985_v36, %v1983_v6  ;;  %v1994_v11 = vpop.permute.xlu0 %1993  ;;  %v2008_v1 = vpop.permute.xlu1 %2007  ;;  %v3827_v42 = vpack.c.bf16 %v1986_v14, %v1984_v54 }
 0xbec   : > { %v1996_v61 = vsel %vm454_vm4, %v5688_v9, %v1994_v11  ;;  %v1998_v31 = vsel %vm454_vm4, %v1994_v11, %v5688_v9  ;;  %v2013_v28 = vsel %vm467_vm5, %v2008_v1, %v5690_v8  ;;  %v2011_v58 = vsel %vm467_vm5, %v5690_v8, %v2008_v1 }
 0xbed   : > { %v2001_v2 = vmul.f32 %v1996_v61, %v4338_v49  ;;  %v2002_v26 = vmul.f32 %v1998_v31, %v4384_v23  ;;  %3828 = vmatprep.subr.bf16.mxu0 %v3827_v42  ;;  %v2016_v53 = vmul.f32 %v2013_v28, %v4402_v40  ;;  %v4121_v42 = vld [vmem:[%s4208_s15] sm:$0x77] }
 0xbee   : > { %3830 = vmatpush1.bf16.msra.mxu0 %v3829_v41 }
 0xbef   : > { %v3833_v25 = vpack.c.bf16 %v2001_v2, %v1999_v51  ;;  %v2010_v29 = vpop.permute.xlu0 %2009  ;;  %v2024_v55 = vpop.permute.xlu1 %2023  ;;  %v3831_v19 = vpack.c.bf16 %v2002_v26, %v2000_v50 }
 0xbf0   : > { %v2014_v9 = vsel %vm467_vm5, %v2010_v29, %v5692_v37  ;;  %v2012_v52 = vsel %vm467_vm5, %v5692_v37, %v2010_v29  ;;  %v2027_v32 = vsel %vm480_vm11, %v2020_v38, %v2024_v55  ;;  %v2029_v7 = vsel %vm480_vm11, %v2024_v55, %v2020_v38 }
 0xbf1   : > { %v2018_v63 = vmul.f32 %v2014_v9, %v4402_v40  ;;  %3832 = vmatprep.subr.bf16.mxu0 %v3831_v19  ;;  %v3837_v34 = vpack.c.bf16 %v2012_v52, %v2011_v58  ;;  %v2031_v4 = vmul.f32 %v2027_v32, %v4374_v15  ;;  %v2032_v47 = vmul.f32 %v2029_v7, %v4413_v48 }
 0xbf2   : > { %3834 = vmatpush1.bf16.msra.mxu0 %v3833_v25 }
 0xbf3   : > { %v2026_v43 = vpop.permute.xlu0 %2025  ;;  %v3835_v35 = vpack.c.bf16 %v2018_v63, %v2016_v53 }
 0xbf4   : > { %v2028_v37 = vsel %vm480_vm11, %v2022_v33, %v2026_v43  ;;  %v2030_v57 = vsel %vm480_vm11, %v2026_v43, %v2022_v33 }
 0xbf5   : > { %v2033_v38 = vmul.f32 %v2028_v37, %v4374_v15  ;;  %v2034_v56 = vmul.f32 %v2030_v57, %v4413_v48  ;;  %3836 = vmatprep.subr.bf16.mxu0 %v3835_v35  ;;  %v3527_v37 = vld [vmem:[%s6824_s6 + $0x8] sm:$0xff]  ;;  %v3526_v57 = vld [vmem:[%s6823_s5 + $0x18] sm:$0xff] }
 0xbf6   : > { %3838 = vmatpush1.bf16.msra.mxu0 %v3837_v34  ;;  %3530 = vmatprep.mubr.msk.f32.mxu1 %vm497_vm1, %v3526_v57 }
 0xbf7   : > { %v3841_v8 = vpack.c.bf16 %v2033_v38, %v2031_v4  ;;  %v3839_v44 = vpack.c.bf16 %v2034_v56, %v2032_v47 }
 0xbf9   : > { %3840 = vmatprep.subr.bf16.mxu0 %v3839_v44 }
 0xbfa   : > { %3842 = vmatpush1.bf16.msra.mxu0 %v3841_v8 }
 0xbfd   : > { %2108 = vmatmul.mubr.f32.vlgmr.msra.gmra.mrb[10].mxu0 %v3518_v39 }
 0xbfe   : > { %2516 = vmatprep.mubr.f32.mxu0 %v4131_v0 }
 0xc00   : > { %v2038_v33 = vpop.permute.xlu1 %2037 }
 0xcd0   : > { %v2109_v22 = vpop.f32.mrb[10].mxu0 }
 0xcd1   : > { %v2110_v60 = vadd.f32 %v2109_v22, %v2038_v33  ;;  %v2111_v18 = vpop.f32.mrb[11].mxu0 }
 0xcd2   : > { %v2112_v62 = vadd.f32 %v2111_v18, %v2038_v33 }
 0xcd3   : > { %v3522_v16 = vmul.f32 -1.442695, %v2110_v60 }
 0xcd4   : > { %v3523_v24 = vmul.f32 -1.442695, %v2112_v62 }
 0xcd5   : > { %4080 = vpow2.f32 %v3522_v16 }
 0xcd6   : > { %4082 = vpow2.f32 %v3523_v24 }
 0xcdf   : > { %v4081_v6 = vpop.eup %4080 }
 0xce0   : > { %v4083_v54 = vpop.eup %4082  ;;  %v2120_v36 = vadd.f32 1.0, %v4081_v6 }
 0xce1   : > { %v2121_v14 = vadd.f32 1.0, %v4083_v54 }
 0xce2   : > { %4084 = vrcp.f32 %v2120_v36 }
 0xce3   : > { %4086 = vrcp.f32 %v2121_v14 }
 0xcec   : > { %v5808_v5 = vpop.eup %4084 }
 0xced   : > { %v5810_v13 = vpop.eup %4086  ;;  %v5813_v41 = vrot.slane %v5808_v5, 5  ;;  %v2131_v11 = vmax.f32 %v5808_v5, 0.05 }
 0xcee   : > { %v2132_v1 = vmax.f32 %v5810_v13, 0.05  ;;  %v2128_v50 = vcombine.low %v5808_v5, %v5810_v13  ;;  %v5845_v32 = vrot.slane %v5810_v13, 5 }
 0xcef   : > { %v5820_v61 = vsel %vm374_vm0, %v4121_v42, %v5813_v41  ;;  %4088 = vrcp.f32 %v2131_v11 }
 0xcf0   : > { %2167 = vrot.lane.b32.xlu0 %v5820_v61, %s4132_s11  ;;  %4090 = vrcp.f32 %v2132_v1  ;;  %v2130_v29 = vsub.f32 %v4121_v42, %v2128_v50  ;;  %v5853_v7 = vsel %vm374_vm0, %v4219_v3, %v5845_v32 }
 0xcf4   : > { %2183 = vrot.lane.b32.xlu0 %v5820_v61, %s4133_s16 }
 0xcf8   : > { %2199 = vrot.lane.b32.xlu0 %v5820_v61, %s4134_s17 }
 0xcf9   : > { %v4089_v31 = vpop.eup %4088 }
 0xcfa   : > { %v4091_v51 = vpop.eup %4090 }
 0xcfb   : > { %v2137_v2 = vcombine.low %v4089_v31, %v4091_v51  ;;  %v2138_v26 = vcombine.high %v4089_v31, %v4091_v51 }
 0xcfc   : > { %2215 = vrot.lane.b32.xlu0 %v5820_v61, %s4135_s18 }
 0xcfd   : > { %v3524_v28 = vrot.slane %v2137_v2, 11  ;;  %v2141_v25 = vrot.slane %v2138_v26, 7 }
 0xcff   : > { %v2142_v55 = vsel %vm4657_vm2, %v3524_v28, %v2141_v25 }
 0xd00   : > { %2231 = vrot.lane.b32.xlu0 %v5820_v61, %s4136_s19  ;;  %v2144_v19 = vmul.f32 %v2142_v55, %v2130_v29 }
 0xd02   : > { %v2145_v9 = vadd.f32 %v2144_v19, %v2128_v50 }
 0xd04   : > { %2247 = vrot.lane.b32.xlu0 %v5820_v61, %s4137_s20  ;;  %v2152_v53 = vrot.slane %v2145_v9, 7  ;;  %v2151_v58 = vcombine.high %v2145_v9, %v2145_v9 }
 0xd06   : > { %v5840_v52 = vsel %vm820_vm9, %v5813_v41, %v2152_v53  ;;  %v2153_v43 = vrot.slane %v2151_v58, 7 }
 0xd07   : > { %v2160_v63 = vsel %vm851_vm3, %v5840_v52, 0.0 }
 0xd08   : > { %2263 = vrot.lane.b32.xlu0 %v5820_v61, %s4138_s21  ;;  %2169 = vrot.lane.b32.xlu1 %v2160_v63, %s4132_s11  ;;  %v5875_v35 = vsel %vm820_vm9, %v5845_v32, %v2153_v43 }
 0xd09   : > { %v2161_v34 = vsel %vm851_vm3, %v5875_v35, 0.0 }
 0xd0c   : > { %2171 = vrot.lane.b32.xlu0 %v5853_v7, %s4132_s11  ;;  %2185 = vrot.lane.b32.xlu1 %v2160_v63, %s4133_s16 }
 0xd10   : > { %2187 = vrot.lane.b32.xlu0 %v5853_v7, %s4133_s16  ;;  %2201 = vrot.lane.b32.xlu1 %v2160_v63, %s4134_s17 }
 0xd14   : > { %2203 = vrot.lane.b32.xlu0 %v5853_v7, %s4134_s17  ;;  %2217 = vrot.lane.b32.xlu1 %v2160_v63, %s4135_s18 }
 0xd18   : > { %2219 = vrot.lane.b32.xlu0 %v5853_v7, %s4135_s18  ;;  %2233 = vrot.lane.b32.xlu1 %v2160_v63, %s4136_s19 }
 0xd1c   : > { %2279 = vrot.lane.b32.xlu0 %v5820_v61, %s4139_s22  ;;  %2249 = vrot.lane.b32.xlu1 %v2160_v63, %s4137_s20 }
 0xd20   : > { %2235 = vrot.lane.b32.xlu0 %v5853_v7, %s4136_s19  ;;  %2265 = vrot.lane.b32.xlu1 %v2160_v63, %s4138_s21 }
 0xd24   : > { %2251 = vrot.lane.b32.xlu0 %v5853_v7, %s4137_s20  ;;  %2173 = vrot.lane.b32.xlu1 %v2161_v34, %s4132_s11 }
 0xd28   : > { %2267 = vrot.lane.b32.xlu0 %v5853_v7, %s4138_s21  ;;  %2189 = vrot.lane.b32.xlu1 %v2161_v34, %s4133_s16 }
 0xd2c   : > { %2283 = vrot.lane.b32.xlu0 %v5853_v7, %s4139_s22  ;;  %2205 = vrot.lane.b32.xlu1 %v2161_v34, %s4134_s17 }
 0xd30   : > { %2297 = vperm.xlu0 %4045, %v3527_v37   ;;  %2221 = vrot.lane.b32.xlu1 %v2161_v34, %s4135_s18 }
 0xd34   : > { %2281 = vrot.lane.b32.xlu1 %v2160_v63, %s4139_s22 }
 0xd38   : > { %2237 = vrot.lane.b32.xlu1 %v2161_v34, %s4136_s19 }
 0xd3c   : > { %2253 = vrot.lane.b32.xlu1 %v2161_v34, %s4137_s20 }
 0xd40   : > { %2269 = vrot.lane.b32.xlu1 %v2161_v34, %s4138_s21 }
 0xd44   : > { %2285 = vrot.lane.b32.xlu1 %v2161_v34, %s4139_s22 }
 0xd62   : > { %v2168_v4 = vpop.permute.xlu0 %2167 }
 0xd66   : > { %v2184_v47 = vpop.permute.xlu0 %2183 }
 0xd6a   : > { %v2200_v38 = vpop.permute.xlu0 %2199 }
 0xd6e   : > { %v2216_v56 = vpop.permute.xlu0 %2215 }
 0xd72   : > { %v5901_v8 = vpop.permute.xlu0 %2231 }
 0xd76   : > { %v5903_v44 = vpop.permute.xlu0 %2247 }
 0xd7a   : > { %v2170_v39 = vpop.permute.xlu1 %2169  ;;  %v5905_v33 = vpop.permute.xlu0 %2263 }
 0xd7e   : > { %v2186_v22 = vpop.permute.xlu1 %2185  ;;  %v2172_v60 = vpop.permute.xlu0 %2171 }
 0xd7f   : > { %v2175_v11 = vsel %vm389_vm6, %v2168_v4, %v2172_v60  ;;  %v2177_v1 = vsel %vm389_vm6, %v2172_v60, %v2168_v4 }
 0xd80   : > { %v5922_v50 = vmul.f32 %v2177_v1, %v4288_v21  ;;  %v5925_v2 = vmul.f32 %v2175_v11, %v4285_v20 }
 0xd82   : > { %v2202_v18 = vpop.permute.xlu1 %2201  ;;  %v2188_v16 = vpop.permute.xlu0 %2187 }
 0xd83   : > { %v2193_v25 = vsel %vm402_vm7, %v2188_v16, %v2184_v47  ;;  %v5937_v53 = vsel %vm402_vm7, %v2184_v47, %v2188_v16 }
 0xd84   : > { %v5944_v43 = vmul.f32 %v2193_v25, %v4302_v30 }
 0xd86   : > { %v2218_v62 = vpop.permute.xlu1 %2217  ;;  %v2204_v6 = vpop.permute.xlu0 %2203 }
 0xd87   : > { %v2207_v57 = vsel %vm415_vm10, %v2200_v38, %v2204_v6  ;;  %v2209_v4 = vsel %vm415_vm10, %v2204_v6, %v2200_v38 }
 0xd88   : > { %v5958_v16 = vmul.f32 %v2209_v4, %v4329_v46  ;;  %v5961_v11 = vmul.f32 %v2207_v57, %v4326_v45 }
 0xd8a   : > { %v5907_v24 = vpop.permute.xlu1 %2233  ;;  %v2220_v14 = vpop.permute.xlu0 %2219 }
 0xd8e   : > { %v5909_v54 = vpop.permute.xlu1 %2249  ;;  %v5931_v29 = vpop.permute.xlu0 %2279 }
 0xd92   : > { %v5911_v36 = vpop.permute.xlu1 %2265  ;;  %v2236_v1 = vpop.permute.xlu0 %2235 }
 0xd93   : > { %v2241_v57 = vsel %vm441_vm13, %v2236_v1, %v5901_v8 }
 0xd96   : > { %v2174_v42 = vpop.permute.xlu1 %2173 }
 0xd97   : > { %v2176_v31 = vsel %vm389_vm6, %v2170_v39, %v2174_v42  ;;  %v2178_v51 = vsel %vm389_vm6, %v2174_v42, %v2170_v39  ;;  %v2223_v42 = vsel %vm428_vm12, %v2216_v56, %v2220_v14 }
 0xd98   : > { %v2181_v26 = vmul.f32 %v2178_v51, %v4288_v21  ;;  %v2182_v28 = vmul.f32 %v2176_v31, %v4285_v20  ;;  %v2225_v31 = vsel %vm428_vm12, %v2220_v14, %v2216_v56 }
 0xd9a   : > { %v3845_v55 = vpack.c.bf16 %v2181_v26, %v5922_v50  ;;  %v2190_v19 = vpop.permute.xlu1 %2189  ;;  %v3843_v9 = vpack.c.bf16 %v2182_v28, %v5925_v2 }
 0xd9b   : > { %v2192_v63 = vsel %vm402_vm7, %v2186_v22, %v2190_v19  ;;  %v2194_v58 = vsel %vm402_vm7, %v2190_v19, %v2186_v22  ;;  %v5979_v19 = vmul.f32 %v2223_v42, %v4285_v20 }
 0xd9c   : > { %v2197_v34 = vmul.f32 %v2194_v58, %v4302_v30  ;;  %3844 = vmatprep.subr.bf16.mxu1 %v3843_v9  ;;  %v3847_v37 = vpack.c.bf16 %v2192_v63, %v5937_v53  ;;  %v2252_v9 = vpop.permute.xlu0 %2251 }
 0xd9d   : > { %3846 = vmatpush1.bf16.msra.mxu1 %v3845_v55  ;;  %v5976_v55 = vmul.f32 %v2225_v31, %v4338_v49 }
 0xd9e   : > { %v3849_v47 = vpack.c.bf16 %v2197_v34, %v5944_v43  ;;  %3848 = vmatprep.subr.bf16.mxu1 %v3847_v37  ;;  %v2206_v39 = vpop.permute.xlu1 %2205  ;;  %v2239_v37 = vsel %vm441_vm13, %v5901_v8, %v2236_v1  ;;  %v6007_v8 = vmul.f32 %v2241_v57, %v4326_v45 }
 0xd9f   : > { %v2208_v22 = vsel %vm415_vm10, %v2202_v18, %v2206_v39  ;;  %v2210_v60 = vsel %vm415_vm10, %v2206_v39, %v2202_v18  ;;  %v3862_v39 = vpack.c.bf16 %v5840_v52, %v5820_v61 }
 0xda0   : > { %v2213_v38 = vmul.f32 %v2210_v60, %v4329_v46  ;;  %v2214_v6 = vmul.f32 %v2208_v22, %v4326_v45  ;;  %v6004_v22 = vmul.f32 %v2239_v37, %v4374_v15  ;;  %v2268_v60 = vpop.permute.xlu0 %2267 }
 0xda1   : > { %3850 = vmatpush1.bf16.msra.mxu1 %v3849_v47 }
 0xda2   : > { %v3853_v18 = vpack.c.bf16 %v2213_v38, %v5958_v16  ;;  %v2222_v51 = vpop.permute.xlu1 %2221  ;;  %v3851_v26 = vpack.c.bf16 %v2214_v6, %v5961_v11  ;;  %v2255_v6 = vsel %vm454_vm4, %v5903_v44, %v2252_v9 }
 0xda3   : > { %v2224_v28 = vsel %vm428_vm12, %v2218_v62, %v2222_v51  ;;  %v2226_v25 = vsel %vm428_vm12, %v2222_v51, %v2218_v62  ;;  %v3859_v62 = vpack.c.bf16 %v5875_v35, %v5853_v7 }
 0xda4   : > { %v2229_v56 = vmul.f32 %v2226_v25, %v4338_v49  ;;  %v2230_v14 = vmul.f32 %v2224_v28, %v4285_v20  ;;  %3852 = vmatprep.subr.bf16.mxu1 %v3851_v26  ;;  %v6028_v26 = vmul.f32 %v2255_v6, %v4338_v49 }
 0xda5   : > { %3854 = vmatpush1.bf16.msra.mxu1 %v3853_v18 }
 0xda6   : > { %v3857_v63 = vpack.c.bf16 %v2229_v56, %v5976_v55  ;;  %v2282_v58 = vpop.permute.xlu1 %2281  ;;  %v3855_v34 = vpack.c.bf16 %v2230_v14, %v5979_v19  ;;  %v2273_v56 = vsel %vm467_vm5, %v2268_v60, %v5905_v33  ;;  %v2284_v14 = vpop.permute.xlu0 %2283 }
 0xda8   : > { %3856 = vmatprep.subr.bf16.mxu1 %v3855_v34 }
 0xda9   : > { %3858 = vmatpush1.bf16.msra.mxu1 %v3857_v63 }
 0xdaa   : > { %3861 = vmatprep.subr.msk.bf16.mxu1 %vm4818_vm14, %v3859_v62  ;;  %v2238_v4 = vpop.permute.xlu1 %2237  ;;  %v6044_v62 = vmul.f32 %v2273_v56, %v4402_v40 }
 0xdab   : > { %v2240_v47 = vsel %vm441_vm13, %v5907_v24, %v2238_v4  ;;  %v2242_v35 = vsel %vm441_vm13, %v2238_v4, %v5907_v24  ;;  %v2257_v24 = vsel %vm454_vm4, %v2252_v9, %v5903_v44  ;;  %v2287_v4 = vsel %vm480_vm11, %v5931_v29, %v2284_v14 }
 0xdac   : > { %v2245_v1 = vmul.f32 %v2240_v47, %v4374_v15  ;;  %v2246_v38 = vmul.f32 %v2242_v35, %v4326_v45  ;;  %v6031_v44 = vmul.f32 %v2257_v24, %v4384_v23  ;;  %v2289_v47 = vsel %vm480_vm11, %v2284_v14, %v5931_v29 }
 0xdad   : > { %3864 = vmatpush1.bf16.msk.msra.mxu1 %vm4818_vm14, %v3862_v39  ;;  %v6059_v35 = vsel %vm467_vm5, %v5905_v33, %v2268_v60  ;;  %v6068_v24 = vmul.f32 %v2287_v4, %v4374_v15  ;;  %v6071_v29 = vmul.f32 %v2289_v47, %v4413_v48 }
 0xdae   : > { %v3867_v52 = vpack.c.bf16 %v2245_v1, %v6004_v22  ;;  %v2254_v42 = vpop.permute.xlu1 %2253  ;;  %v3865_v31 = vpack.c.bf16 %v2246_v38, %v6007_v8 }
 0xdaf   : > { %v2256_v18 = vsel %vm454_vm4, %v5909_v54, %v2254_v42  ;;  %v2258_v51 = vsel %vm454_vm4, %v2254_v42, %v5909_v54 }
 0xdb0   : > { %v2261_v28 = vmul.f32 %v2256_v18, %v4338_v49  ;;  %v2262_v25 = vmul.f32 %v2258_v51, %v4384_v23  ;;  %3866 = vmatprep.subr.bf16.mxu1 %v3865_v31  ;;  %v2298_v31 = vpop.permute.xlu0 %2297 }
 0xdb1   : > { %3868 = vmatpush1.bf16.msra.mxu1 %v3867_v52 }
 0xdb2   : > { %v3871_v9 = vpack.c.bf16 %v2261_v28, %v6028_v26  ;;  %v2270_v54 = vpop.permute.xlu1 %2269  ;;  %v3869_v63 = vpack.c.bf16 %v2262_v25, %v6031_v44 }
 0xdb3   : > { %v2274_v34 = vsel %vm467_vm5, %v2270_v54, %v5911_v36  ;;  %v2272_v37 = vsel %vm467_vm5, %v5911_v36, %v2270_v54 }
 0xdb4   : > { %v2278_v57 = vmul.f32 %v2274_v34, %v4402_v40  ;;  %3870 = vmatprep.subr.bf16.mxu1 %v3869_v63  ;;  %v3875_v1 = vpack.c.bf16 %v2272_v37, %v6059_v35 }
 0xdb5   : > { %3872 = vmatpush1.bf16.msra.mxu1 %v3871_v9  ;;  %v3532_v9 = vld [vmem:[%s6826_s8 + $0x8] sm:$0xff] }
 0xdb6   : > { %v2286_v39 = vpop.permute.xlu1 %2285  ;;  %v3873_v36 = vpack.c.bf16 %v2278_v57, %v6044_v62 }
 0xdb7   : > { %v2288_v38 = vsel %vm480_vm11, %v2282_v58, %v2286_v39  ;;  %v2290_v6 = vsel %vm480_vm11, %v2286_v39, %v2282_v58  ;;  %v3525_v58 = vld [vmem:[%s6823_s5 + $0x10] sm:$0xff] }
 0xdb8   : > { %v2293_v33 = vmul.f32 %v2288_v38, %v4374_v15  ;;  %v2294_v60 = vmul.f32 %v2290_v6, %v4413_v48  ;;  %3874 = vmatprep.subr.bf16.mxu1 %v3873_v36 }
 0xdb9   : > { %3876 = vmatpush1.bf16.msra.mxu1 %v3875_v1 }
 0xdba   : > { %v3879_v52 = vpack.c.bf16 %v2293_v33, %v6068_v24  ;;  %v3877_v42 = vpack.c.bf16 %v2294_v60, %v6071_v29 }
 0xdbc   : > { %3878 = vmatprep.subr.bf16.mxu1 %v3877_v42 }
 0xdbd   : > { %3880 = vmatpush1.bf16.msra.mxu1 %v3879_v52 }
 0xdc0   : > { %2368 = vmatmul.mubr.f32.vlgmr.msra.gmra.mrb[10].mxu1 %v3525_v58 }
 0xe93   : > { %v2369_v18 = vpop.f32.mrb[10].mxu1 }
 0xe94   : > { %v2370_v51 = vadd.f32 %v2369_v18, %v2298_v31  ;;  %v2371_v28 = vpop.f32.mrb[11].mxu1 }
 0xe95   : > { %v2372_v25 = vadd.f32 %v2371_v28, %v2298_v31 }
 0xe96   : > { %v6080_v56 = vmax.f32 %v2370_v51, 0.0 }
 0xe97   : > { %v2375_v14 = vmax.f32 %v2372_v25, 0.0 }
 0xe98   : > { %2380 = vrot.lane.b32.xlu1 %v6080_v56, %s4132_s11 }
 0xe99   : > { %2382 = vrot.lane.b32.xlu0 %v2375_v14, %s4132_s11 }
 0xe9c   : > { %2388 = vrot.lane.b32.xlu1 %v6080_v56, %s4133_s16 }
 0xe9d   : > { %2390 = vrot.lane.b32.xlu0 %v2375_v14, %s4133_s16 }
 0xea0   : > { %2396 = vrot.lane.b32.xlu1 %v6080_v56, %s4134_s17 }
 0xea1   : > { %2398 = vrot.lane.b32.xlu0 %v2375_v14, %s4134_s17 }
 0xea4   : > { %2404 = vrot.lane.b32.xlu1 %v6080_v56, %s4135_s18 }
 0xea5   : > { %2406 = vrot.lane.b32.xlu0 %v2375_v14, %s4135_s18 }
 0xea8   : > { %2412 = vrot.lane.b32.xlu1 %v6080_v56, %s4136_s19 }
 0xea9   : > { %2414 = vrot.lane.b32.xlu0 %v2375_v14, %s4136_s19 }
 0xeac   : > { %2420 = vrot.lane.b32.xlu1 %v6080_v56, %s4137_s20 }
 0xead   : > { %2422 = vrot.lane.b32.xlu0 %v2375_v14, %s4137_s20 }
 0xeb0   : > { %2428 = vrot.lane.b32.xlu1 %v6080_v56, %s4138_s21 }
 0xeb1   : > { %2430 = vrot.lane.b32.xlu0 %v2375_v14, %s4138_s21 }
 0xeb4   : > { %2436 = vrot.lane.b32.xlu1 %v6080_v56, %s4139_s22 }
 0xeb5   : > { %2438 = vrot.lane.b32.xlu0 %v2375_v14, %s4139_s22 }
 0xeb8   : > { %2446 = vperm.xlu1 %4046, %v3532_v9  }
 0xf0a   : > { %v2381_v54 = vpop.permute.xlu1 %2380 }
 0xf0b   : > { %v2383_v63 = vpop.permute.xlu0 %2382 }
 0xf0c   : > { %v2384_v34 = vsel %vm389_vm6, %v2381_v54, %v2383_v63  ;;  %v2385_v37 = vsel %vm389_vm6, %v2383_v63, %v2381_v54 }
 0xf0d   : > { %v2387_v4 = vmul.f32 %v2384_v34, %v4285_v20  ;;  %v2386_v1 = vmul.f32 %v2385_v37, %v4288_v21 }
 0xf0e   : > { %v2389_v57 = vpop.permute.xlu1 %2388 }
 0xf0f   : > { %v2391_v47 = vpop.permute.xlu0 %2390 }
 0xf10   : > { %v2392_v39 = vsel %vm402_vm7, %v2389_v57, %v2391_v47  ;;  %v2393_v36 = vsel %vm402_vm7, %v2391_v47, %v2389_v57 }
 0xf11   : > { %v2394_v38 = vmul.f32 %v2393_v36, %v4302_v30  ;;  %v3881_v6 = vpack.c.bf16 %v2392_v39, %v2387_v4 }
 0xf12   : > { %v2397_v33 = vpop.permute.xlu1 %2396 }
 0xf13   : > { %v3883_v60 = vpack.c.bf16 %v2394_v38, %v2386_v1  ;;  %v2399_v52 = vpop.permute.xlu0 %2398  ;;  %3882 = vmatprep.subr.bf16.mxu0 %v3881_v6 }
 0xf14   : > { %v2400_v42 = vsel %vm415_vm10, %v2397_v33, %v2399_v52  ;;  %v2401_v58 = vsel %vm415_vm10, %v2399_v52, %v2397_v33 }
 0xf15   : > { %3884 = vmatpush1.bf16.msra.mxu0 %v3883_v60  ;;  %v2402_v25 = vmul.f32 %v2401_v58, %v4329_v46  ;;  %v2403_v9 = vmul.f32 %v2400_v42, %v4326_v45 }
 0xf16   : > { %v2405_v31 = vpop.permute.xlu1 %2404 }
 0xf17   : > { %v2407_v18 = vpop.permute.xlu0 %2406 }
 0xf18   : > { %v2408_v51 = vsel %vm428_vm12, %v2405_v31, %v2407_v18  ;;  %v2409_v28 = vsel %vm428_vm12, %v2407_v18, %v2405_v31 }
 0xf19   : > { %v2410_v54 = vmul.f32 %v2409_v28, %v4338_v49  ;;  %v2411_v63 = vmul.f32 %v2408_v51, %v4285_v20 }
 0xf1a   : > { %v2413_v34 = vpop.permute.xlu1 %2412 }
 0xf1b   : > { %v3887_v37 = vpack.c.bf16 %v2410_v54, %v2402_v25  ;;  %v2415_v57 = vpop.permute.xlu0 %2414  ;;  %v3885_v4 = vpack.c.bf16 %v2411_v63, %v2403_v9 }
 0xf1c   : > { %v2416_v47 = vsel %vm441_vm13, %v2413_v34, %v2415_v57  ;;  %v2417_v39 = vsel %vm441_vm13, %v2415_v57, %v2413_v34 }
 0xf1d   : > { %v2418_v36 = vmul.f32 %v2416_v47, %v4374_v15  ;;  %v2419_v1 = vmul.f32 %v2417_v39, %v4326_v45  ;;  %3886 = vmatprep.subr.bf16.mxu0 %v3885_v4  ;;  %v3531_v47 = vld [vmem:[%s6825_s7 + $0x8] sm:$0xff] }
 0xf1e   : > { %3888 = vmatpush1.bf16.msra.mxu0 %v3887_v37  ;;  %v2421_v38 = vpop.permute.xlu1 %2420 }
 0xf1f   : > { %v3891_v6 = vpack.c.bf16 %v2418_v36, %v6080_v56  ;;  %v2423_v33 = vpop.permute.xlu0 %2422  ;;  %v3889_v60 = vpack.c.bf16 %v2419_v1, %v2375_v14 }
 0xf20   : > { %v2425_v52 = vsel %vm454_vm4, %v2423_v33, %v2421_v38  ;;  %v2424_v58 = vsel %vm454_vm4, %v2421_v38, %v2423_v33 }
 0xf21   : > { %3890 = vmatprep.subr.bf16.mxu0 %v3889_v60  ;;  %v2427_v51 = vmul.f32 %v2425_v52, %v4384_v23  ;;  %v2426_v28 = vmul.f32 %v2424_v58, %v4338_v49 }
 0xf22   : > { %3892 = vmatpush1.bf16.msra.mxu0 %v3891_v6  ;;  %v2429_v42 = vpop.permute.xlu1 %2428 }
 0xf23   : > { %v2431_v31 = vpop.permute.xlu0 %2430 }
 0xf24   : > { %v2433_v18 = vsel %vm467_vm5, %v2431_v31, %v2429_v42  ;;  %v2432_v56 = vsel %vm467_vm5, %v2429_v42, %v2431_v31 }
 0xf25   : > { %v2435_v14 = vmul.f32 %v2433_v18, %v4402_v40  ;;  %v3895_v63 = vpack.c.bf16 %v2432_v56, %v2426_v28 }
 0xf26   : > { %v2437_v25 = vpop.permute.xlu1 %2436 }
 0xf27   : > { %v2439_v9 = vpop.permute.xlu0 %2438  ;;  %v3893_v54 = vpack.c.bf16 %v2435_v14, %v2427_v51 }
 0xf28   : > { %v2441_v34 = vsel %vm480_vm11, %v2439_v9, %v2437_v25  ;;  %v2440_v37 = vsel %vm480_vm11, %v2437_v25, %v2439_v9 }
 0xf29   : > { %3894 = vmatprep.subr.bf16.mxu0 %v3893_v54  ;;  %v2443_v57 = vmul.f32 %v2441_v34, %v4413_v48  ;;  %v2442_v4 = vmul.f32 %v2440_v37, %v4374_v15 }
 0xf2a   : > { %3896 = vmatpush1.bf16.msra.mxu0 %v3895_v63 }
 0xf2b   : > { %2468 = vmatprep.subr.mxu0 %v2443_v57 }
 0xf2e   : > { %2469 = vmatpush1.msra.mxu0 %v2442_v4 }
 0xf2f   : > { %3533 = vmatmul.mubr.msk.f32.vlgmr.msra.gmra.mrb[12].mxu0 %vm6828_vm15, %v3531_v47  ;;  %vm3375_vm15 = vcmask 1041408  }
 0xf37   : > { %v2447_v39 = vpop.permute.xlu1 %2446 }
0x1002   : > { %v2518_v36 = vpop.f32.mrb[12].mxu0 }
0x1003   : > { %v2519_v1 = vadd.f32 %v2518_v36, %v2447_v39  ;;  %v2520_v38 = vpop.f32.mrb[13].mxu0 }
0x1004   : > { %v2521_v6 = vadd.f32 %v2520_v38, %v2447_v39 }
0x1005   : > { %v3534_v33 = vmul.f32 -1.442695, %v2519_v1 }
0x1006   : > { %v3535_v60 = vmul.f32 -1.442695, %v2521_v6 }
0x1007   : > { %4092 = vpow2.f32 %v3534_v33 }
0x1008   : > { %4094 = vpow2.f32 %v3535_v60 }
0x1011   : > { %v4093_v52 = vpop.eup %4092 }
0x1012   : > { %v4095_v42 = vpop.eup %4094  ;;  %v2529_v58 = vadd.f32 1.0, %v4093_v52 }
0x1013   : > { %v2530_v31 = vadd.f32 1.0, %v4095_v42 }
0x1014   : > { %4096 = vrcp.f32 %v2529_v58 }
0x1015   : > { %4098 = vrcp.f32 %v2530_v31 }
0x101e   : > { %v4097_v18 = vpop.eup %4096 }
0x101f   : > { %v4099_v51 = vpop.eup %4098  ;;  %v2537_v56 = vrot.slane %v4097_v18, 2  ;;  %v2543_v14 = vrot.slane %v4097_v18, 7 }
0x1020   : > { %v2538_v28 = vrot.slane %v4099_v51, 2  ;;  %v2544_v25 = vrot.slane %v4099_v51, 7 }
0x1021   : > { %v2541_v9 = vsel %vm836_vm8, %v5808_v5, %v2537_v56  ;;  %v3378_v54 = vrot.slane %v2537_v56, 6  ;;  %v6164_v63 = vsel %vm820_vm9, %v5813_v41, %v2543_v14 }
0x1022   : > { %v3376_v34 = vrot.slane %v2541_v9, 6  ;;  %v2542_v37 = vsel %vm836_vm8, %v5810_v13, %v2538_v28  ;;  %v3380_v57 = vrot.slane %v2538_v28, 6  ;;  %v2549_v4 = vsel %vm851_vm3, %v6164_v63, 0.0 }
0x1023   : > { %v3377_v47 = vrot.slane %v2542_v37, 6  ;;  %2559 = vrot.lane.b32.xlu0 %v2549_v4, %s4132_s11  ;;  %v6173_v5 = vsel %vm820_vm9, %v5845_v32, %v2544_v25  ;;  %v3541_v32 = vld [vmem:[%s6820_s2 + $0x38] sm:$0xff] }
0x1024   : > { %v2550_v41 = vsel %vm851_vm3, %v6173_v5, 0.0  ;;  %v6177_v39 = vsel %vm3375_vm15, %v3376_v34, %v3378_v54  ;;  %v3400_v36 = vsel %vm3375_vm15, %v5479_v59, %v3376_v34  ;;  %v3537_v59 = vld [vmem:[%s6819_s1 + $0x68] sm:$0xff] }
0x1025   : > { %2561 = vrot.lane.b32.xlu1 %v2550_v41, %s4132_s11  ;;  %v3401_v13 = vsel %vm3375_vm15, %v5488_v17, %v3377_v47  ;;  %3408 = vst [vmem:[%s4679_s24 + $0x20] sm:$0xff] %v3400_v36  ;;  %v6183_v1 = vsel %vm3375_vm15, %v3377_v47, %v3380_v57  ;;  %3544 = vmatprep.mubr.msk.f32.mxu0 %vm497_vm1, %v3537_v59  ;;  %v3540_v17 = vld [vmem:[%s6820_s2 + $0x30] sm:$0xff] }
0x1026   : > { %3409 = vst [vmem:[%s4679_s24 + $0x28] sm:$0xff] %v3401_v13 }
0x1027   : > { %2567 = vrot.lane.b32.xlu0 %v2549_v4, %s4133_s16 }
0x1029   : > { %2569 = vrot.lane.b32.xlu1 %v2550_v41, %s4133_s16 }
0x102b   : > { %2575 = vrot.lane.b32.xlu0 %v2549_v4, %s4134_s17 }
0x102d   : > { %2577 = vrot.lane.b32.xlu1 %v2550_v41, %s4134_s17 }
0x102f   : > { %2583 = vrot.lane.b32.xlu0 %v2549_v4, %s4135_s18 }
0x1031   : > { %2585 = vrot.lane.b32.xlu1 %v2550_v41, %s4135_s18 }
0x1033   : > { %2591 = vrot.lane.b32.xlu0 %v2549_v4, %s4136_s19 }
0x1035   : > { %2593 = vrot.lane.b32.xlu1 %v2550_v41, %s4136_s19 }
0x1037   : > { %2599 = vrot.lane.b32.xlu0 %v2549_v4, %s4137_s20 }
0x1039   : > { %2601 = vrot.lane.b32.xlu1 %v2550_v41, %s4137_s20 }
0x103b   : > { %2607 = vrot.lane.b32.xlu0 %v2549_v4, %s4138_s21 }
0x103d   : > { %2609 = vrot.lane.b32.xlu1 %v2550_v41, %s4138_s21 }
0x103f   : > { %2615 = vrot.lane.b32.xlu0 %v2549_v4, %s4139_s22 }
0x1041   : > { %2617 = vrot.lane.b32.xlu1 %v2550_v41, %s4139_s22 }
0x1043   : > { %2625 = vperm.xlu0 %4045, %v3540_v17  }
0x1045   : > { %2630 = vperm.xlu1 %4046, %v3541_v32  }
0x1095   : > { %v2560_v38 = vpop.permute.xlu0 %2559 }
0x1097   : > { %v2562_v6 = vpop.permute.xlu1 %2561 }
0x1098   : > { %v2563_v33 = vsel %vm389_vm6, %v2560_v38, %v2562_v6  ;;  %v2564_v60 = vsel %vm389_vm6, %v2562_v6, %v2560_v38 }
0x1099   : > { %v2565_v52 = vmul.f32 %v2564_v60, %v4288_v21  ;;  %v2566_v42 = vmul.f32 %v2563_v33, %v4285_v20  ;;  %v2568_v58 = vpop.permute.xlu0 %2567 }
0x109b   : > { %v3899_v31 = vpack.c.bf16 %v2565_v52, %v5922_v50  ;;  %v2570_v18 = vpop.permute.xlu1 %2569  ;;  %v3897_v51 = vpack.c.bf16 %v2566_v42, %v5925_v2  ;;  %v3913_v52 = vpack.c.bf16 %v6173_v5, %v5853_v7 }
0x109c   : > { %v2571_v56 = vsel %vm402_vm7, %v2568_v58, %v2570_v18  ;;  %v2572_v14 = vsel %vm402_vm7, %v2570_v18, %v2568_v58  ;;  %v3916_v58 = vpack.c.bf16 %v6164_v63, %v5820_v61 }
0x109d   : > { %v2573_v28 = vmul.f32 %v2572_v14, %v4302_v30  ;;  %v3901_v25 = vpack.c.bf16 %v2571_v56, %v5937_v53  ;;  %3898 = vmatprep.subr.bf16.mxu0 %v3897_v51  ;;  %v2576_v9 = vpop.permute.xlu0 %2575 }
0x109e   : > { %3900 = vmatpush1.bf16.msra.mxu0 %v3899_v31 }
0x109f   : > { %v3903_v54 = vpack.c.bf16 %v2573_v28, %v5944_v43  ;;  %v2578_v34 = vpop.permute.xlu1 %2577  ;;  %3902 = vmatprep.subr.bf16.mxu0 %v3901_v25 }
0x10a0   : > { %v2579_v50 = vsel %vm415_vm10, %v2576_v9, %v2578_v34  ;;  %v2580_v2 = vsel %vm415_vm10, %v2578_v34, %v2576_v9 }
0x10a1   : > { %v2581_v37 = vmul.f32 %v2580_v2, %v4329_v46  ;;  %v2582_v57 = vmul.f32 %v2579_v50, %v4326_v45  ;;  %v2584_v4 = vpop.permute.xlu0 %2583 }
0x10a2   : > { %3904 = vmatpush1.bf16.msra.mxu0 %v3903_v54 }
0x10a3   : > { %v3907_v53 = vpack.c.bf16 %v2581_v37, %v5958_v16  ;;  %v2586_v47 = vpop.permute.xlu1 %2585  ;;  %v3905_v41 = vpack.c.bf16 %v2582_v57, %v5961_v11 }
0x10a4   : > { %v2587_v43 = vsel %vm428_vm12, %v2584_v4, %v2586_v47  ;;  %v2588_v36 = vsel %vm428_vm12, %v2586_v47, %v2584_v4  ;;  %v3536_v4 = vld [vmem:[%s6819_s1 + $0x60] sm:$0xff] }
0x10a5   : > { %v2589_v13 = vmul.f32 %v2588_v36, %v4338_v49  ;;  %v2590_v59 = vmul.f32 %v2587_v43, %v4285_v20  ;;  %3906 = vmatprep.subr.bf16.mxu0 %v3905_v41  ;;  %v2592_v17 = vpop.permute.xlu0 %2591 }
0x10a6   : > { %3908 = vmatpush1.bf16.msra.mxu0 %v3907_v53 }
0x10a7   : > { %v3911_v32 = vpack.c.bf16 %v2589_v13, %v5976_v55  ;;  %v2594_v38 = vpop.permute.xlu1 %2593  ;;  %v3909_v16 = vpack.c.bf16 %v2590_v59, %v5979_v19 }
0x10a8   : > { %v2596_v11 = vsel %vm441_vm13, %v2594_v38, %v2592_v17  ;;  %v2595_v6 = vsel %vm441_vm13, %v2592_v17, %v2594_v38 }
0x10a9   : > { %v2598_v33 = vmul.f32 %v2596_v11, %v4326_v45  ;;  %3910 = vmatprep.subr.bf16.mxu0 %v3909_v16  ;;  %v2600_v60 = vpop.permute.xlu0 %2599  ;;  %v2597_v55 = vmul.f32 %v2595_v6, %v4374_v15 }
0x10aa   : > { %3912 = vmatpush1.bf16.msra.mxu0 %v3911_v32 }
0x10ab   : > { %v2602_v42 = vpop.permute.xlu1 %2601  ;;  %3915 = vmatprep.subr.msk.bf16.mxu0 %vm4818_vm14, %v3913_v52  ;;  %v3919_v7 = vpack.c.bf16 %v2598_v33, %v6007_v8  ;;  %v3921_v56 = vpack.c.bf16 %v2597_v55, %v6004_v22  ;;  %v3548_v52 = vld [vmem:[%s6822_s4 + $0x18] sm:$0xff] }
0x10ac   : > { %v2604_v19 = vsel %vm454_vm4, %v2602_v42, %v2600_v60  ;;  %v2603_v31 = vsel %vm454_vm4, %v2600_v60, %v2602_v42  ;;  %v3547_v60 = vld [vmem:[%s6821_s3 + $0x38] sm:$0xff] }
0x10ad   : > { %v2606_v18 = vmul.f32 %v2604_v19, %v4384_v23  ;;  %v2608_v51 = vpop.permute.xlu0 %2607  ;;  %v2605_v14 = vmul.f32 %v2603_v31, %v4338_v49  ;;  %3549 = vmatprep.mubr.msk.f32.mxu1 %vm497_vm1, %v3547_v60 }
0x10ae   : > { %3918 = vmatpush1.bf16.msk.msra.mxu0 %vm4818_vm14, %v3916_v58 }
0x10af   : > { %v2610_v5 = vpop.permute.xlu1 %2609  ;;  %3920 = vmatprep.subr.bf16.mxu0 %v3919_v7  ;;  %v3923_v25 = vpack.c.bf16 %v2606_v18, %v6031_v44  ;;  %v3925_v8 = vpack.c.bf16 %v2605_v14, %v6028_v26 }
0x10b0   : > { %v2612_v61 = vsel %vm467_vm5, %v2610_v5, %v2608_v51  ;;  %v2611_v22 = vsel %vm467_vm5, %v2608_v51, %v2610_v5 }
0x10b1   : > { %v2614_v63 = vmul.f32 %v2612_v61, %v4402_v40  ;;  %v2616_v28 = vpop.permute.xlu0 %2615  ;;  %v3929_v44 = vpack.c.bf16 %v2611_v22, %v6059_v35  ;;  %v3538_v35 = vld [vmem:[%s6819_s1 + $0x70] sm:$0xff] }
0x10b2   : > { %3922 = vmatpush1.bf16.msra.mxu0 %v3921_v56 }
0x10b3   : > { %v2618_v9 = vpop.permute.xlu1 %2617  ;;  %3924 = vmatprep.subr.bf16.mxu0 %v3923_v25  ;;  %v3927_v2 = vpack.c.bf16 %v2614_v63, %v6044_v62  ;;  %v3539_v62 = vld [vmem:[%s6819_s1 + $0x78] sm:$0xff] }
0x10b4   : > { %v2620_v54 = vsel %vm480_vm11, %v2618_v9, %v2616_v28  ;;  %v2619_v34 = vsel %vm480_vm11, %v2616_v28, %v2618_v9 }
0x10b5   : > { %v2622_v50 = vmul.f32 %v2620_v54, %v4413_v48  ;;  %v2621_v37 = vmul.f32 %v2619_v34, %v4374_v15 }
0x10b6   : > { %3926 = vmatpush1.bf16.msra.mxu0 %v3925_v8 }
0x10b7   : > { %3928 = vmatprep.subr.bf16.mxu0 %v3927_v2  ;;  %v3931_v26 = vpack.c.bf16 %v2622_v50, %v6071_v29  ;;  %v3933_v57 = vpack.c.bf16 %v2621_v37, %v6068_v24 }
0x10ba   : > { %3930 = vmatpush1.bf16.msra.mxu0 %v3929_v44 }
0x10bb   : > { %3932 = vmatprep.subr.bf16.mxu0 %v3931_v26 }
0x10be   : > { %3934 = vmatpush1.bf16.msra.mxu0 %v3933_v57 }
0x10c1   : > { %2704 = vmatmul.mubr.f32.vlgmr.msra.gmra.mrb[14].mxu0 %v3536_v4 }
0x10c2   : > { %3545 = vmatprep.mubr.msk.f32.mxu0 %vm497_vm1, %v3539_v62  ;;  %v2626_v29 = vpop.permute.xlu0 %2625 }
0x10c4   : > { %v2631_v43 = vpop.permute.xlu1 %2630 }
0x10c5   : > { %2710 = vmatmul.mubr.f32.gmra.mrb[16].mxu0 %v3538_v35 }
0x1194   : > { %v2705_v53 = vpop.f32.mrb[14].mxu0 }
0x1195   : > { %v2706_v24 = vadd.f32 %v2705_v53, %v2626_v29  ;;  %v2707_v47 = vpop.f32.mrb[15].mxu0 }
0x1196   : > { %v2708_v36 = vadd.f32 %v2707_v47, %v2626_v29 }
0x1197   : > { %v6290_v41 = vmax.f32 %v2706_v24, 0.0 }
0x1198   : > { %v2711_v13 = vpop.f32.mrb[16].mxu0  ;;  %v6296_v16 = vmax.f32 %v2708_v36, 0.0 }
0x1199   : > { %v2712_v59 = vadd.f32 %v2711_v13, %v2631_v43  ;;  %v2713_v17 = vpop.f32.mrb[17].mxu0  ;;  %2725 = vrot.lane.b32.xlu0 %v6290_v41, %s4132_s11 }
0x119a   : > { %v2714_v32 = vadd.f32 %v2713_v17, %v2631_v43 }
0x119b   : > { %v6294_v38 = vmax.f32 %v2712_v59, 0.0 }
0x119c   : > { %v6298_v11 = vmax.f32 %v2714_v32, 0.0 }
0x119d   : > { %2727 = vrot.lane.b32.xlu1 %v6294_v38, %s4132_s11  ;;  %2741 = vrot.lane.b32.xlu0 %v6290_v41, %s4133_s16  ;;  %v3953_v6 = vpack.c.bf16 %v6294_v38, %v6290_v41 }
0x119e   : > { %v3951_v33 = vpack.c.bf16 %v6298_v11, %v6296_v16 }
0x11a1   : > { %2743 = vrot.lane.b32.xlu1 %v6294_v38, %s4133_s16  ;;  %2757 = vrot.lane.b32.xlu0 %v6290_v41, %s4134_s17 }
0x11a5   : > { %2759 = vrot.lane.b32.xlu1 %v6294_v38, %s4134_s17  ;;  %2773 = vrot.lane.b32.xlu0 %v6290_v41, %s4135_s18 }
0x11a9   : > { %2775 = vrot.lane.b32.xlu1 %v6294_v38, %s4135_s18  ;;  %2789 = vrot.lane.b32.xlu0 %v6290_v41, %s4136_s19 }
0x11ad   : > { %2791 = vrot.lane.b32.xlu1 %v6294_v38, %s4136_s19  ;;  %2805 = vrot.lane.b32.xlu0 %v6290_v41, %s4137_s20 }
0x11b1   : > { %2807 = vrot.lane.b32.xlu1 %v6294_v38, %s4137_s20  ;;  %2821 = vrot.lane.b32.xlu0 %v6290_v41, %s4138_s21 }
0x11b5   : > { %2823 = vrot.lane.b32.xlu1 %v6294_v38, %s4138_s21  ;;  %2729 = vrot.lane.b32.xlu0 %v6296_v16, %s4132_s11 }
0x11b9   : > { %2731 = vrot.lane.b32.xlu1 %v6298_v11, %s4132_s11  ;;  %2745 = vrot.lane.b32.xlu0 %v6296_v16, %s4133_s16 }
0x11bd   : > { %2747 = vrot.lane.b32.xlu1 %v6298_v11, %s4133_s16  ;;  %2761 = vrot.lane.b32.xlu0 %v6296_v16, %s4134_s17 }
0x11c1   : > { %2763 = vrot.lane.b32.xlu1 %v6298_v11, %s4134_s17  ;;  %2777 = vrot.lane.b32.xlu0 %v6296_v16, %s4135_s18 }
0x11c5   : > { %2779 = vrot.lane.b32.xlu1 %v6298_v11, %s4135_s18  ;;  %2837 = vrot.lane.b32.xlu0 %v6290_v41, %s4139_s22 }
0x11c9   : > { %2839 = vrot.lane.b32.xlu1 %v6294_v38, %s4139_s22  ;;  %2793 = vrot.lane.b32.xlu0 %v6296_v16, %s4136_s19 }
0x11cd   : > { %2795 = vrot.lane.b32.xlu1 %v6298_v11, %s4136_s19  ;;  %2809 = vrot.lane.b32.xlu0 %v6296_v16, %s4137_s20 }
0x11d1   : > { %2811 = vrot.lane.b32.xlu1 %v6298_v11, %s4137_s20  ;;  %2825 = vrot.lane.b32.xlu0 %v6296_v16, %s4138_s21 }
0x11d5   : > { %2827 = vrot.lane.b32.xlu1 %v6298_v11, %s4138_s21  ;;  %2841 = vrot.lane.b32.xlu0 %v6296_v16, %s4139_s22 }
0x11d9   : > { %2843 = vrot.lane.b32.xlu1 %v6298_v11, %s4139_s22  ;;  %2855 = vperm.xlu0 %4045, %v3548_v52  }
0x120b   : > { %v2726_v42 = vpop.permute.xlu0 %2725 }
0x120f   : > { %v2728_v55 = vpop.permute.xlu1 %2727  ;;  %v2742_v19 = vpop.permute.xlu0 %2741 }
0x1213   : > { %v2744_v58 = vpop.permute.xlu1 %2743  ;;  %v2758_v31 = vpop.permute.xlu0 %2757 }
0x1217   : > { %v2760_v18 = vpop.permute.xlu1 %2759  ;;  %v2774_v51 = vpop.permute.xlu0 %2773 }
0x121b   : > { %v2776_v7 = vpop.permute.xlu1 %2775  ;;  %v6373_v5 = vpop.permute.xlu0 %2789 }
0x121f   : > { %v6375_v56 = vpop.permute.xlu1 %2791  ;;  %v6377_v14 = vpop.permute.xlu0 %2805 }
0x1223   : > { %v6379_v61 = vpop.permute.xlu1 %2807  ;;  %v6381_v63 = vpop.permute.xlu0 %2821 }
0x1227   : > { %v6383_v28 = vpop.permute.xlu1 %2823  ;;  %v2730_v25 = vpop.permute.xlu0 %2729 }
0x1228   : > { %v2733_v9 = vsel %vm389_vm6, %v2726_v42, %v2730_v25  ;;  %v2735_v8 = vsel %vm389_vm6, %v2730_v25, %v2726_v42 }
0x1229   : > { %v2737_v2 = vmul.f32 %v2735_v8, %v4288_v21  ;;  %v2738_v44 = vmul.f32 %v2733_v9, %v4285_v20 }
0x122b   : > { %v2732_v54 = vpop.permute.xlu1 %2731  ;;  %v2746_v22 = vpop.permute.xlu0 %2745 }
0x122c   : > { %v2734_v34 = vsel %vm389_vm6, %v2728_v55, %v2732_v54  ;;  %v2736_v50 = vsel %vm389_vm6, %v2732_v54, %v2728_v55  ;;  %v2751_v57 = vsel %vm402_vm7, %v2746_v22, %v2742_v19  ;;  %v2749_v53 = vsel %vm402_vm7, %v2742_v19, %v2746_v22 }
0x122d   : > { %v2739_v37 = vmul.f32 %v2736_v50, %v4288_v21  ;;  %v2740_v26 = vmul.f32 %v2734_v34, %v4285_v20  ;;  %v2753_v43 = vmul.f32 %v2751_v57, %v4302_v30 }
0x122f   : > { %v3937_v4 = vpack.c.bf16 %v2739_v37, %v2737_v2  ;;  %v2748_v62 = vpop.permute.xlu1 %2747  ;;  %v2762_v35 = vpop.permute.xlu0 %2761  ;;  %v3935_v29 = vpack.c.bf16 %v2740_v26, %v2738_v44 }
0x1230   : > { %v2750_v24 = vsel %vm402_vm7, %v2744_v58, %v2748_v62  ;;  %v2752_v47 = vsel %vm402_vm7, %v2748_v62, %v2744_v58  ;;  %v2765_v59 = vsel %vm415_vm10, %v2758_v31, %v2762_v35  ;;  %v2767_v17 = vsel %vm415_vm10, %v2762_v35, %v2758_v31 }
0x1231   : > { %v2755_v36 = vmul.f32 %v2752_v47, %v4302_v30  ;;  %v3939_v13 = vpack.c.bf16 %v2750_v24, %v2749_v53  ;;  %3936 = vmatprep.subr.bf16.mxu1 %v3935_v29  ;;  %v2769_v19 = vmul.f32 %v2767_v17, %v4329_v46  ;;  %v2770_v58 = vmul.f32 %v2765_v59, %v4326_v45 }
0x1232   : > { %3938 = vmatpush1.bf16.msra.mxu1 %v3937_v4 }
0x1233   : > { %v3941_v32 = vpack.c.bf16 %v2755_v36, %v2753_v43  ;;  %v2764_v60 = vpop.permute.xlu1 %2763  ;;  %3940 = vmatprep.subr.bf16.mxu1 %v3939_v13  ;;  %v2778_v52 = vpop.permute.xlu0 %2777 }
0x1234   : > { %v2766_v42 = vsel %vm415_vm10, %v2760_v18, %v2764_v60  ;;  %v2768_v55 = vsel %vm415_vm10, %v2764_v60, %v2760_v18  ;;  %v2781_v31 = vsel %vm428_vm12, %v2774_v51, %v2778_v52  ;;  %v2783_v8 = vsel %vm428_vm12, %v2778_v52, %v2774_v51 }
0x1235   : > { %v2771_v25 = vmul.f32 %v2768_v55, %v4329_v46  ;;  %v2772_v9 = vmul.f32 %v2766_v42, %v4326_v45  ;;  %v2785_v44 = vmul.f32 %v2783_v8, %v4338_v49  ;;  %v2786_v37 = vmul.f32 %v2781_v31, %v4285_v20 }
0x1236   : > { %3942 = vmatpush1.bf16.msra.mxu1 %v3941_v32 }
0x1237   : > { %v3945_v54 = vpack.c.bf16 %v2771_v25, %v2769_v19  ;;  %v2780_v22 = vpop.permute.xlu1 %2779  ;;  %v2838_v34 = vpop.permute.xlu0 %2837  ;;  %v3943_v50 = vpack.c.bf16 %v2772_v9, %v2770_v58 }
0x1238   : > { %v2782_v18 = vsel %vm428_vm12, %v2776_v7, %v2780_v22  ;;  %v2784_v2 = vsel %vm428_vm12, %v2780_v22, %v2776_v7 }
0x1239   : > { %v2787_v26 = vmul.f32 %v2784_v2, %v4338_v49  ;;  %v2788_v57 = vmul.f32 %v2782_v18, %v4285_v20  ;;  %3944 = vmatprep.subr.bf16.mxu1 %v3943_v50 }
0x123a   : > { %3946 = vmatpush1.bf16.msra.mxu1 %v3945_v54 }
0x123b   : > { %v3949_v51 = vpack.c.bf16 %v2787_v26, %v2785_v44  ;;  %v2840_v4 = vpop.permute.xlu1 %2839  ;;  %v2794_v62 = vpop.permute.xlu0 %2793  ;;  %v3947_v35 = vpack.c.bf16 %v2788_v57, %v2786_v37 }
0x123c   : > { %v2797_v29 = vsel %vm441_vm13, %v6373_v5, %v2794_v62  ;;  %v2799_v7 = vsel %vm441_vm13, %v2794_v62, %v6373_v5 }
0x123d   : > { %3948 = vmatprep.subr.bf16.mxu1 %v3947_v35  ;;  %v2801_v36 = vmul.f32 %v2797_v29, %v4374_v15  ;;  %v2802_v13 = vmul.f32 %v2799_v7, %v4326_v45  ;;  %v3546_v35 = vld [vmem:[%s6821_s3 + $0x30] sm:$0xff] }
0x123e   : > { %3950 = vmatpush1.bf16.msra.mxu1 %v3949_v51 }
0x123f   : > { %v2796_v53 = vpop.permute.xlu1 %2795  ;;  %3952 = vmatprep.subr.bf16.mxu1 %v3951_v33  ;;  %v2810_v24 = vpop.permute.xlu0 %2809 }
0x1240   : > { %v2798_v47 = vsel %vm441_vm13, %v6375_v56, %v2796_v53  ;;  %v2800_v43 = vsel %vm441_vm13, %v2796_v53, %v6375_v56  ;;  %v2813_v16 = vsel %vm454_vm4, %v6377_v14, %v2810_v24  ;;  %v2815_v11 = vsel %vm454_vm4, %v2810_v24, %v6377_v14 }
0x1241   : > { %v2803_v5 = vmul.f32 %v2798_v47, %v4374_v15  ;;  %v2804_v59 = vmul.f32 %v2800_v43, %v4326_v45  ;;  %v2817_v42 = vmul.f32 %v2813_v16, %v4338_v49  ;;  %v2818_v14 = vmul.f32 %v2815_v11, %v4384_v23 }
0x1242   : > { %3954 = vmatpush1.bf16.msra.mxu1 %v3953_v6 }
0x1243   : > { %v3957_v33 = vpack.c.bf16 %v2803_v5, %v2801_v36  ;;  %v2812_v56 = vpop.permute.xlu1 %2811  ;;  %v2826_v17 = vpop.permute.xlu0 %2825  ;;  %v3955_v32 = vpack.c.bf16 %v2804_v59, %v2802_v13 }
0x1244   : > { %v2814_v60 = vsel %vm454_vm4, %v6379_v61, %v2812_v56  ;;  %v2816_v52 = vsel %vm454_vm4, %v2812_v56, %v6379_v61  ;;  %v2831_v38 = vsel %vm467_vm5, %v2826_v17, %v6381_v63  ;;  %v2829_v50 = vsel %vm467_vm5, %v6381_v63, %v2826_v17  ;;  %v4122_v17 = vld [vmem:[%s4208_s15] sm:$0x77] }
0x1245   : > { %v2819_v55 = vmul.f32 %v2814_v60, %v4338_v49  ;;  %v2820_v41 = vmul.f32 %v2816_v52, %v4384_v23  ;;  %3956 = vmatprep.subr.bf16.mxu1 %v3955_v32  ;;  %v2834_v9 = vmul.f32 %v2831_v38, %v4402_v40 }
0x1246   : > { %3958 = vmatpush1.bf16.msra.mxu1 %v3957_v33 }
0x1247   : > { %v3961_v6 = vpack.c.bf16 %v2819_v55, %v2817_v42  ;;  %v2828_v19 = vpop.permute.xlu1 %2827  ;;  %v2842_v58 = vpop.permute.xlu0 %2841  ;;  %v3959_v25 = vpack.c.bf16 %v2820_v41, %v2818_v14 }
0x1248   : > { %v2832_v61 = vsel %vm467_vm5, %v2828_v19, %v6383_v28  ;;  %v2830_v31 = vsel %vm467_vm5, %v6383_v28, %v2828_v19  ;;  %v2845_v54 = vsel %vm480_vm11, %v2838_v34, %v2842_v58  ;;  %v2847_v22 = vsel %vm480_vm11, %v2842_v58, %v2838_v34 }
0x1249   : > { %v2836_v8 = vmul.f32 %v2832_v61, %v4402_v40  ;;  %3960 = vmatprep.subr.bf16.mxu1 %v3959_v25  ;;  %v3965_v44 = vpack.c.bf16 %v2830_v31, %v2829_v50  ;;  %v2849_v26 = vmul.f32 %v2845_v54, %v4374_v15  ;;  %v2850_v57 = vmul.f32 %v2847_v22, %v4413_v48 }
0x124a   : > { %3962 = vmatpush1.bf16.msra.mxu1 %v3961_v6 }
0x124b   : > { %v2844_v18 = vpop.permute.xlu1 %2843  ;;  %v3963_v2 = vpack.c.bf16 %v2836_v8, %v2834_v9 }
0x124c   : > { %v2846_v28 = vsel %vm480_vm11, %v2840_v4, %v2844_v18  ;;  %v2848_v37 = vsel %vm480_vm11, %v2844_v18, %v2840_v4 }
0x124d   : > { %v2851_v34 = vmul.f32 %v2846_v28, %v4374_v15  ;;  %v2852_v51 = vmul.f32 %v2848_v37, %v4413_v48  ;;  %3964 = vmatprep.subr.bf16.mxu1 %v3963_v2  ;;  %v3554_v28 = vld [vmem:[%s6823_s5 + $0x28] sm:$0xff] }
0x124e   : > { %3966 = vmatpush1.bf16.msra.mxu1 %v3965_v44  ;;  %v3555_v44 = vld [vmem:[%s6824_s6 + $0x10] sm:$0xff]  ;;  %3558 = vmatprep.mubr.msk.f32.mxu0 %vm497_vm1, %v3554_v28  ;;  %vm6843_vm1 = vcmask 588800  }
0x124f   : > { %v3969_v63 = vpack.c.bf16 %v2851_v34, %v2849_v26  ;;  %v3967_v62 = vpack.c.bf16 %v2852_v51, %v2850_v57 }
0x1251   : > { %3968 = vmatprep.subr.bf16.mxu1 %v3967_v62 }
0x1252   : > { %3970 = vmatpush1.bf16.msra.mxu1 %v3969_v63 }
0x1255   : > { %2926 = vmatmul.mubr.f32.vlgmr.msra.gmra.mrb[12].mxu1 %v3546_v35 }
0x1256   : > { %3334 = vmatprep.mubr.f32.mxu1 %v4131_v0 }
0x1258   : > { %v2856_v4 = vpop.permute.xlu0 %2855 }
0x1328   : > { %v2927_v29 = vpop.f32.mrb[12].mxu1 }
0x1329   : > { %v2928_v7 = vadd.f32 %v2927_v29, %v2856_v4  ;;  %v2929_v53 = vpop.f32.mrb[13].mxu1 }
0x132a   : > { %v2930_v24 = vadd.f32 %v2929_v53, %v2856_v4 }
0x132b   : > { %v3550_v47 = vmul.f32 -1.442695, %v2928_v7 }
0x132c   : > { %v3551_v43 = vmul.f32 -1.442695, %v2930_v24 }
0x132d   : > { %4100 = vpow2.f32 %v3550_v47 }
0x132e   : > { %4102 = vpow2.f32 %v3551_v43 }
0x1337   : > { %v4101_v36 = vpop.eup %4100 }
0x1338   : > { %v4103_v13 = vpop.eup %4102  ;;  %v2938_v5 = vadd.f32 1.0, %v4101_v36 }
0x1339   : > { %v2939_v59 = vadd.f32 1.0, %v4103_v13 }
0x133a   : > { %4104 = vrcp.f32 %v2938_v5 }
0x133b   : > { %4106 = vrcp.f32 %v2939_v59 }
0x1344   : > { %v6499_v16 = vpop.eup %4104 }
0x1345   : > { %v6501_v11 = vpop.eup %4106  ;;  %v2964_v0 = vrot.slane %v6499_v16, 5  ;;  %v2949_v33 = vmax.f32 %v6499_v16, 0.05 }
0x1346   : > { %v2950_v56 = vmax.f32 %v6501_v11, 0.05  ;;  %v2946_v42 = vcombine.low %v6499_v16, %v6501_v11  ;;  %v2965_v9 = vrot.slane %v6501_v11, 5 }
0x1347   : > { %v6508_v32 = vsel %vm374_vm0, %v4122_v17, %v2964_v0  ;;  %4108 = vrcp.f32 %v2949_v33 }
0x1348   : > { %2985 = vrot.lane.b32.xlu1 %v6508_v32, %s4132_s11  ;;  %4110 = vrcp.f32 %v2950_v56  ;;  %v2948_v6 = vsub.f32 %v4122_v17, %v2946_v42  ;;  %v6539_v50 = vsel %vm374_vm0, %v4219_v3, %v2965_v9 }
0x134c   : > { %3001 = vrot.lane.b32.xlu1 %v6508_v32, %s4133_s16 }
0x1350   : > { %3017 = vrot.lane.b32.xlu1 %v6508_v32, %s4134_s17 }
0x1351   : > { %v4109_v60 = vpop.eup %4108 }
0x1352   : > { %v4111_v52 = vpop.eup %4110 }
0x1353   : > { %v2955_v14 = vcombine.low %v4109_v60, %v4111_v52  ;;  %v2956_v55 = vcombine.high %v4109_v60, %v4111_v52 }
0x1354   : > { %3033 = vrot.lane.b32.xlu1 %v6508_v32, %s4135_s18 }
0x1355   : > { %v3552_v41 = vrot.slane %v2955_v14, 11  ;;  %v2959_v38 = vrot.slane %v2956_v55, 7 }
0x1357   : > { %v2960_v19 = vsel %vm4657_vm2, %v3552_v41, %v2959_v38 }
0x1358   : > { %3049 = vrot.lane.b32.xlu1 %v6508_v32, %s4136_s19  ;;  %v2962_v58 = vmul.f32 %v2960_v19, %v2948_v6 }
0x135a   : > { %v2963_v25 = vadd.f32 %v2962_v58, %v2946_v42 }
0x135c   : > { %3065 = vrot.lane.b32.xlu1 %v6508_v32, %s4137_s20  ;;  %v2970_v61 = vrot.slane %v2963_v25, 7  ;;  %v2969_v31 = vcombine.high %v2963_v25, %v2963_v25 }
0x135e   : > { %v6528_v8 = vsel %vm820_vm9, %v2964_v0, %v2970_v61  ;;  %v2971_v54 = vrot.slane %v2969_v31, 7 }
0x135f   : > { %v2978_v12 = vsel %vm851_vm3, %v6528_v8, 0.0  ;;  %v3990_v22 = vpack.c.bf16 %v6528_v8, %v6508_v32 }
0x1360   : > { %3081 = vrot.lane.b32.xlu1 %v6508_v32, %s4138_s21  ;;  %2987 = vrot.lane.b32.xlu0 %v2978_v12, %s4132_s11  ;;  %v6542_v18 = vsel %vm820_vm9, %v2965_v9, %v2971_v54 }
0x1361   : > { %v3987_v2 = vpack.c.bf16 %v6542_v18, %v6539_v50  ;;  %v2979_v3 = vsel %vm851_vm3, %v6542_v18, 0.0 }
0x1364   : > { %2989 = vrot.lane.b32.xlu1 %v6539_v50, %s4132_s11  ;;  %3003 = vrot.lane.b32.xlu0 %v2978_v12, %s4133_s16 }
0x1368   : > { %3005 = vrot.lane.b32.xlu1 %v6539_v50, %s4133_s16  ;;  %3019 = vrot.lane.b32.xlu0 %v2978_v12, %s4134_s17 }
0x136c   : > { %3021 = vrot.lane.b32.xlu1 %v6539_v50, %s4134_s17  ;;  %3035 = vrot.lane.b32.xlu0 %v2978_v12, %s4135_s18 }
0x1370   : > { %3037 = vrot.lane.b32.xlu1 %v6539_v50, %s4135_s18  ;;  %3051 = vrot.lane.b32.xlu0 %v2978_v12, %s4136_s19 }
0x1374   : > { %3097 = vrot.lane.b32.xlu1 %v6508_v32, %s4139_s22  ;;  %3067 = vrot.lane.b32.xlu0 %v2978_v12, %s4137_s20 }
0x1378   : > { %3053 = vrot.lane.b32.xlu1 %v6539_v50, %s4136_s19  ;;  %3083 = vrot.lane.b32.xlu0 %v2978_v12, %s4138_s21 }
0x137c   : > { %3069 = vrot.lane.b32.xlu1 %v6539_v50, %s4137_s20  ;;  %2991 = vrot.lane.b32.xlu0 %v2979_v3, %s4132_s11 }
0x1380   : > { %3085 = vrot.lane.b32.xlu1 %v6539_v50, %s4138_s21  ;;  %3007 = vrot.lane.b32.xlu0 %v2979_v3, %s4133_s16 }
0x1384   : > { %3101 = vrot.lane.b32.xlu1 %v6539_v50, %s4139_s22  ;;  %3023 = vrot.lane.b32.xlu0 %v2979_v3, %s4134_s17 }
0x1388   : > { %3115 = vperm.xlu1 %4046, %v3555_v44   ;;  %3039 = vrot.lane.b32.xlu0 %v2979_v3, %s4135_s18 }
0x138c   : > { %3099 = vrot.lane.b32.xlu0 %v2978_v12, %s4139_s22 }
0x1390   : > { %3055 = vrot.lane.b32.xlu0 %v2979_v3, %s4136_s19 }
0x1394   : > { %3071 = vrot.lane.b32.xlu0 %v2979_v3, %s4137_s20 }
0x1398   : > { %3087 = vrot.lane.b32.xlu0 %v2979_v3, %s4138_s21 }
0x139c   : > { %3103 = vrot.lane.b32.xlu0 %v2979_v3, %s4139_s22 }
0x13ba   : > { %v2986_v37 = vpop.permute.xlu1 %2985 }
0x13be   : > { %v3002_v26 = vpop.permute.xlu1 %3001 }
0x13c2   : > { %v3018_v57 = vpop.permute.xlu1 %3017 }
0x13c6   : > { %v3034_v34 = vpop.permute.xlu1 %3033 }
0x13ca   : > { %v6588_v51 = vpop.permute.xlu1 %3049 }
0x13ce   : > { %v6590_v63 = vpop.permute.xlu1 %3065 }
0x13d2   : > { %v2988_v62 = vpop.permute.xlu0 %2987  ;;  %v6592_v35 = vpop.permute.xlu1 %3081 }
0x13d6   : > { %v3004_v4 = vpop.permute.xlu0 %3003  ;;  %v2990_v29 = vpop.permute.xlu1 %2989 }
0x13d7   : > { %v2993_v59 = vsel %vm389_vm6, %v2986_v37, %v2990_v29  ;;  %v2995_v0 = vsel %vm389_vm6, %v2990_v29, %v2986_v37 }
0x13d8   : > { %v2997_v60 = vmul.f32 %v2995_v0, %v4288_v21  ;;  %v2998_v52 = vmul.f32 %v2993_v59, %v4285_v20 }
0x13da   : > { %v3020_v7 = vpop.permute.xlu0 %3019  ;;  %v3006_v24 = vpop.permute.xlu1 %3005 }
0x13db   : > { %v3011_v55 = vsel %vm402_vm7, %v3006_v24, %v3002_v26  ;;  %v3009_v58 = vsel %vm402_vm7, %v3002_v26, %v3006_v24 }
0x13dc   : > { %v3013_v9 = vmul.f32 %v3011_v55, %v4302_v30 }
0x13de   : > { %v3036_v53 = vpop.permute.xlu0 %3035  ;;  %v3022_v43 = vpop.permute.xlu1 %3021 }
0x13df   : > { %v3025_v12 = vsel %vm415_vm10, %v3018_v57, %v3022_v43  ;;  %v3027_v3 = vsel %vm415_vm10, %v3022_v43, %v3018_v57 }
0x13e2   : > { %v6594_v47 = vpop.permute.xlu0 %3051  ;;  %v3038_v5 = vpop.permute.xlu1 %3037 }
0x13e3   : > { %v3041_v57 = vsel %vm428_vm12, %v3034_v34, %v3038_v5  ;;  %v3043_v43 = vsel %vm428_vm12, %v3038_v5, %v3034_v34 }
0x13e6   : > { %v6596_v36 = vpop.permute.xlu0 %3067  ;;  %v6614_v41 = vpop.permute.xlu1 %3097 }
0x13ea   : > { %v6598_v13 = vpop.permute.xlu0 %3083  ;;  %v3054_v29 = vpop.permute.xlu1 %3053 }
0x13ee   : > { %v2992_v33 = vpop.permute.xlu0 %2991  ;;  %v3070_v34 = vpop.permute.xlu1 %3069 }
0x13ef   : > { %v2994_v56 = vsel %vm389_vm6, %v2988_v62, %v2992_v33  ;;  %v2996_v17 = vsel %vm389_vm6, %v2992_v33, %v2988_v62  ;;  %v3029_v62 = vmul.f32 %v3027_v3, %v4329_v46  ;;  %v3073_v18 = vsel %vm454_vm4, %v6590_v63, %v3070_v34 }
0x13f0   : > { %v2999_v42 = vmul.f32 %v2996_v17, %v4288_v21  ;;  %v3000_v14 = vmul.f32 %v2994_v56, %v4285_v20 }
0x13f2   : > { %v3973_v38 = vpack.c.bf16 %v2999_v42, %v2997_v60  ;;  %v3008_v6 = vpop.permute.xlu0 %3007  ;;  %v3971_v19 = vpack.c.bf16 %v3000_v14, %v2998_v52  ;;  %v3045_v60 = vmul.f32 %v3043_v43, %v4338_v49  ;;  %v3046_v52 = vmul.f32 %v3041_v57, %v4285_v20 }
0x13f3   : > { %v3010_v25 = vsel %vm402_vm7, %v3004_v4, %v3008_v6  ;;  %v3012_v61 = vsel %vm402_vm7, %v3008_v6, %v3004_v4  ;;  %v3030_v4 = vmul.f32 %v3025_v12, %v4326_v45  ;;  %v3057_v6 = vsel %vm441_vm13, %v6588_v51, %v3054_v29 }
0x13f4   : > { %v3015_v31 = vmul.f32 %v3012_v61, %v4302_v30  ;;  %v3975_v54 = vpack.c.bf16 %v3010_v25, %v3009_v58  ;;  %3972 = vmatprep.subr.bf16.mxu0 %v3971_v19  ;;  %v3061_v61 = vmul.f32 %v3057_v6, %v4374_v15 }
0x13f5   : > { %3974 = vmatpush1.bf16.msra.mxu0 %v3973_v38 }
0x13f6   : > { %v3977_v44 = vpack.c.bf16 %v3015_v31, %v3013_v9  ;;  %3976 = vmatprep.subr.bf16.mxu0 %v3975_v54  ;;  %v3024_v28 = vpop.permute.xlu0 %3023  ;;  %v3086_v9 = vpop.permute.xlu1 %3085 }
0x13f7   : > { %v3026_v37 = vsel %vm415_vm10, %v3020_v7, %v3024_v28  ;;  %v3028_v26 = vsel %vm415_vm10, %v3024_v28, %v3020_v7  ;;  %v3077_v28 = vmul.f32 %v3073_v18, %v4338_v49  ;;  %v3091_v8 = vsel %vm467_vm5, %v3086_v9, %v6592_v35 }
0x13f8   : > { %v3031_v24 = vmul.f32 %v3028_v26, %v4329_v46  ;;  %v3032_v59 = vmul.f32 %v3026_v37, %v4326_v45  ;;  %v3089_v43 = vsel %vm467_vm5, %v6592_v35, %v3086_v9 }
0x13f9   : > { %3978 = vmatpush1.bf16.msra.mxu0 %v3977_v44 }
0x13fa   : > { %v3981_v0 = vpack.c.bf16 %v3031_v24, %v3029_v62  ;;  %v3040_v33 = vpop.permute.xlu0 %3039  ;;  %v3979_v56 = vpack.c.bf16 %v3032_v59, %v3030_v4  ;;  %v3094_v4 = vmul.f32 %v3091_v8, %v4402_v40 }
0x13fb   : > { %v3042_v7 = vsel %vm428_vm12, %v3036_v53, %v3040_v33  ;;  %v3044_v17 = vsel %vm428_vm12, %v3040_v33, %v3036_v53  ;;  %v3059_v53 = vsel %vm441_vm13, %v3054_v29, %v6588_v51 }
0x13fc   : > { %v3047_v42 = vmul.f32 %v3044_v17, %v4338_v49  ;;  %v3048_v14 = vmul.f32 %v3042_v7, %v4285_v20  ;;  %3980 = vmatprep.subr.bf16.mxu0 %v3979_v56  ;;  %v3062_v51 = vmul.f32 %v3059_v53, %v4326_v45 }
0x13fd   : > { %3982 = vmatpush1.bf16.msra.mxu0 %v3981_v0 }
0x13fe   : > { %v3985_v5 = vpack.c.bf16 %v3047_v42, %v3045_v60  ;;  %v3100_v55 = vpop.permute.xlu0 %3099  ;;  %v3983_v38 = vpack.c.bf16 %v3048_v14, %v3046_v52  ;;  %v3553_v14 = vld [vmem:[%s6823_s5 + $0x20] sm:$0xff] }
0x1400   : > { %3984 = vmatprep.subr.bf16.mxu0 %v3983_v38 }
0x1401   : > { %3986 = vmatpush1.bf16.msra.mxu0 %v3985_v5 }
0x1402   : > { %3989 = vmatprep.subr.msk.bf16.mxu0 %vm4818_vm14, %v3987_v2  ;;  %v3056_v19 = vpop.permute.xlu0 %3055  ;;  %v3075_v2 = vsel %vm454_vm4, %v3070_v34, %v6590_v63 }
0x1403   : > { %v3058_v58 = vsel %vm441_vm13, %v6594_v47, %v3056_v19  ;;  %v3060_v25 = vsel %vm441_vm13, %v3056_v19, %v6594_v47  ;;  %v3078_v63 = vmul.f32 %v3075_v2, %v4384_v23 }
0x1404   : > { %v3063_v31 = vmul.f32 %v3058_v58, %v4374_v15  ;;  %v3064_v50 = vmul.f32 %v3060_v25, %v4326_v45  ;;  %v3560_v58 = vld [vmem:[%s6826_s8 + $0x10] sm:$0xff] }
0x1405   : > { %3992 = vmatpush1.bf16.msk.msra.mxu0 %vm4818_vm14, %v3990_v22  ;;  %v3102_v22 = vpop.permute.xlu1 %3101 }
0x1406   : > { %v3995_v47 = vpack.c.bf16 %v3063_v31, %v3061_v61  ;;  %v3072_v54 = vpop.permute.xlu0 %3071  ;;  %v3993_v12 = vpack.c.bf16 %v3064_v50, %v3062_v51  ;;  %v3105_v59 = vsel %vm480_vm11, %v6614_v41, %v3102_v22  ;;  %v3107_v57 = vsel %vm480_vm11, %v3102_v22, %v6614_v41 }
0x1407   : > { %v3074_v3 = vsel %vm454_vm4, %v6596_v36, %v3072_v54  ;;  %v3076_v44 = vsel %vm454_vm4, %v3072_v54, %v6596_v36  ;;  %v3109_v17 = vmul.f32 %v3105_v59, %v4374_v15  ;;  %v3110_v60 = vmul.f32 %v3107_v57, %v4413_v48 }
0x1408   : > { %v3079_v32 = vmul.f32 %v3074_v3, %v4338_v49  ;;  %v3080_v27 = vmul.f32 %v3076_v44, %v4384_v23  ;;  %3994 = vmatprep.subr.bf16.mxu0 %v3993_v12 }
0x1409   : > { %3996 = vmatpush1.bf16.msra.mxu0 %v3995_v47  ;;  %v3116_v34 = vpop.permute.xlu1 %3115 }
0x140a   : > { %v3999_v37 = vpack.c.bf16 %v3079_v32, %v3077_v28  ;;  %v3088_v26 = vpop.permute.xlu0 %3087  ;;  %v3997_v62 = vpack.c.bf16 %v3080_v27, %v3078_v63 }
0x140b   : > { %v3092_v36 = vsel %vm467_vm5, %v3088_v26, %v6598_v13  ;;  %v3090_v29 = vsel %vm467_vm5, %v6598_v13, %v3088_v26 }
0x140c   : > { %v3096_v24 = vmul.f32 %v3092_v36, %v4402_v40  ;;  %3998 = vmatprep.subr.bf16.mxu0 %v3997_v62  ;;  %v4003_v56 = vpack.c.bf16 %v3090_v29, %v3089_v43 }
0x140d   : > { %4000 = vmatpush1.bf16.msra.mxu0 %v3999_v37 }
0x140e   : > { %v3104_v0 = vpop.permute.xlu0 %3103  ;;  %v4001_v33 = vpack.c.bf16 %v3096_v24, %v3094_v4 }
0x140f   : > { %v3106_v13 = vsel %vm480_vm11, %v3100_v55, %v3104_v0  ;;  %v3108_v7 = vsel %vm480_vm11, %v3104_v0, %v3100_v55 }
0x1410   : > { %v3111_v41 = vmul.f32 %v3106_v13, %v4374_v15  ;;  %v3112_v52 = vmul.f32 %v3108_v7, %v4413_v48  ;;  %4002 = vmatprep.subr.bf16.mxu0 %v4001_v33 }
0x1411   : > { %4004 = vmatpush1.bf16.msra.mxu0 %v4003_v56 }
0x1412   : > { %v4007_v35 = vpack.c.bf16 %v3111_v41, %v3109_v17  ;;  %v4005_v42 = vpack.c.bf16 %v3112_v52, %v3110_v60 }
0x1414   : > { %4006 = vmatprep.subr.bf16.mxu0 %v4005_v42 }
0x1415   : > { %4008 = vmatpush1.bf16.msra.mxu0 %v4007_v35 }
0x1418   : > { %3186 = vmatmul.mubr.f32.vlgmr.msra.gmra.mrb[18].mxu0 %v3553_v14 }
0x14eb   : > { %v3187_v5 = vpop.f32.mrb[18].mxu0 }
0x14ec   : > { %v3188_v55 = vadd.f32 %v3187_v5, %v3116_v34  ;;  %v3189_v38 = vpop.f32.mrb[19].mxu0 }
0x14ed   : > { %v3190_v6 = vadd.f32 %v3189_v38, %v3116_v34 }
0x14ee   : > { %v6721_v53 = vmax.f32 %v3188_v55, 0.0 }
0x14ef   : > { %v3193_v19 = vmax.f32 %v3190_v6, 0.0 }
0x14f0   : > { %3198 = vrot.lane.b32.xlu0 %v6721_v53, %s4132_s11 }
0x14f1   : > { %3200 = vrot.lane.b32.xlu1 %v3193_v19, %s4132_s11 }
0x14f4   : > { %3206 = vrot.lane.b32.xlu0 %v6721_v53, %s4133_s16 }
0x14f5   : > { %3208 = vrot.lane.b32.xlu1 %v3193_v19, %s4133_s16 }
0x14f8   : > { %3214 = vrot.lane.b32.xlu0 %v6721_v53, %s4134_s17 }
0x14f9   : > { %3216 = vrot.lane.b32.xlu1 %v3193_v19, %s4134_s17 }
0x14fc   : > { %3222 = vrot.lane.b32.xlu0 %v6721_v53, %s4135_s18 }
0x14fd   : > { %3224 = vrot.lane.b32.xlu1 %v3193_v19, %s4135_s18 }
0x1500   : > { %3230 = vrot.lane.b32.xlu0 %v6721_v53, %s4136_s19 }
0x1501   : > { %3232 = vrot.lane.b32.xlu1 %v3193_v19, %s4136_s19 }
0x1504   : > { %3238 = vrot.lane.b32.xlu0 %v6721_v53, %s4137_s20 }
0x1505   : > { %3240 = vrot.lane.b32.xlu1 %v3193_v19, %s4137_s20 }
0x1508   : > { %3246 = vrot.lane.b32.xlu0 %v6721_v53, %s4138_s21 }
0x1509   : > { %3248 = vrot.lane.b32.xlu1 %v3193_v19, %s4138_s21 }
0x150c   : > { %3254 = vrot.lane.b32.xlu0 %v6721_v53, %s4139_s22 }
0x150d   : > { %3256 = vrot.lane.b32.xlu1 %v3193_v19, %s4139_s22 }
0x1510   : > { %3264 = vperm.xlu0 %4045, %v3560_v58  }
0x1562   : > { %v3199_v25 = vpop.permute.xlu0 %3198 }
0x1563   : > { %v3201_v61 = vpop.permute.xlu1 %3200 }
0x1564   : > { %v3202_v51 = vsel %vm389_vm6, %v3199_v25, %v3201_v61  ;;  %v3203_v9 = vsel %vm389_vm6, %v3201_v61, %v3199_v25 }
0x1565   : > { %v3205_v50 = vmul.f32 %v3202_v51, %v4285_v20  ;;  %v3204_v54 = vmul.f32 %v3203_v9, %v4288_v21 }
0x1566   : > { %v3207_v31 = vpop.permute.xlu0 %3206 }
0x1567   : > { %v3209_v18 = vpop.permute.xlu1 %3208 }
0x1568   : > { %v3210_v2 = vsel %vm402_vm7, %v3207_v31, %v3209_v18  ;;  %v3211_v47 = vsel %vm402_vm7, %v3209_v18, %v3207_v31 }
0x1569   : > { %v3212_v12 = vmul.f32 %v3211_v47, %v4302_v30  ;;  %v4009_v3 = vpack.c.bf16 %v3210_v2, %v3205_v50 }
0x156a   : > { %v3215_v44 = vpop.permute.xlu0 %3214 }
0x156b   : > { %v4011_v28 = vpack.c.bf16 %v3212_v12, %v3204_v54  ;;  %v3217_v63 = vpop.permute.xlu1 %3216  ;;  %4010 = vmatprep.subr.bf16.mxu1 %v4009_v3 }
0x156c   : > { %v3218_v32 = vsel %vm415_vm10, %v3215_v44, %v3217_v63  ;;  %v3219_v27 = vsel %vm415_vm10, %v3217_v63, %v3215_v44 }
0x156d   : > { %4012 = vmatpush1.bf16.msra.mxu1 %v4011_v28  ;;  %v3220_v30 = vmul.f32 %v3219_v27, %v4329_v46  ;;  %v3221_v26 = vmul.f32 %v3218_v32, %v4326_v45 }
0x156e   : > { %v3223_v8 = vpop.permute.xlu0 %3222 }
0x156f   : > { %v3225_v22 = vpop.permute.xlu1 %3224 }
0x1570   : > { %v3226_v37 = vsel %vm428_vm12, %v3223_v8, %v3225_v22  ;;  %v3227_v21 = vsel %vm428_vm12, %v3225_v22, %v3223_v8 }
0x1571   : > { %v3228_v62 = vmul.f32 %v3227_v21, %v4338_v49  ;;  %v3229_v36 = vmul.f32 %v3226_v37, %v4285_v20 }
0x1572   : > { %v3231_v4 = vpop.permute.xlu0 %3230 }
0x1573   : > { %v4015_v29 = vpack.c.bf16 %v3228_v62, %v3220_v30  ;;  %v3233_v24 = vpop.permute.xlu1 %3232  ;;  %v4013_v59 = vpack.c.bf16 %v3229_v36, %v3221_v26 }
0x1574   : > { %v3234_v57 = vsel %vm441_vm13, %v3231_v4, %v3233_v24  ;;  %v3235_v43 = vsel %vm441_vm13, %v3233_v24, %v3231_v4 }
0x1575   : > { %v3236_v0 = vmul.f32 %v3234_v57, %v4374_v15  ;;  %v3237_v46 = vmul.f32 %v3235_v43, %v4326_v45  ;;  %4014 = vmatprep.subr.bf16.mxu1 %v4013_v59 }
0x1576   : > { %4016 = vmatpush1.bf16.msra.mxu1 %v4015_v29  ;;  %v3239_v33 = vpop.permute.xlu0 %3238 }
0x1577   : > { %v4019_v56 = vpack.c.bf16 %v3236_v0, %v6721_v53  ;;  %v3241_v20 = vpop.permute.xlu1 %3240  ;;  %v4017_v13 = vpack.c.bf16 %v3237_v46, %v3193_v19 }
0x1578   : > { %v3243_v7 = vsel %vm454_vm4, %v3241_v20, %v3239_v33  ;;  %v3242_v60 = vsel %vm454_vm4, %v3239_v33, %v3241_v20 }
0x1579   : > { %4018 = vmatprep.subr.bf16.mxu1 %v4017_v13  ;;  %v3245_v52 = vmul.f32 %v3243_v7, %v4384_v23  ;;  %v3244_v14 = vmul.f32 %v3242_v60, %v4338_v49  ;;  %v3559_v49 = vld [vmem:[%s6825_s7 + $0x10] sm:$0xff] }
0x157a   : > { %4020 = vmatpush1.bf16.msra.mxu1 %v4019_v56  ;;  %v3247_v17 = vpop.permute.xlu0 %3246 }
0x157b   : > { %v3249_v41 = vpop.permute.xlu1 %3248 }
0x157c   : > { %v3251_v45 = vsel %vm467_vm5, %v3249_v41, %v3247_v17  ;;  %v3250_v35 = vsel %vm467_vm5, %v3247_v17, %v3249_v41 }
0x157d   : > { %v3253_v42 = vmul.f32 %v3251_v45, %v4402_v40  ;;  %v4023_v38 = vpack.c.bf16 %v3250_v35, %v3244_v14 }
0x157e   : > { %v3255_v34 = vpop.permute.xlu0 %3254 }
0x157f   : > { %v3257_v5 = vpop.permute.xlu1 %3256  ;;  %v4021_v55 = vpack.c.bf16 %v3253_v42, %v3245_v52 }
0x1580   : > { %v3259_v6 = vsel %vm480_vm11, %v3257_v5, %v3255_v34  ;;  %v3258_v53 = vsel %vm480_vm11, %v3255_v34, %v3257_v5 }
0x1581   : > { %v3261_v19 = vmul.f32 %v3259_v6, %v4413_v48  ;;  %4022 = vmatprep.subr.bf16.mxu1 %v4021_v55  ;;  %v3260_v23 = vmul.f32 %v3258_v53, %v4374_v15 }
0x1582   : > { %4024 = vmatpush1.bf16.msra.mxu1 %v4023_v38 }
0x1583   : > { %3286 = vmatprep.subr.mxu1 %v3261_v19 }
0x1586   : > { %3287 = vmatpush1.msra.mxu1 %v3260_v23 }
0x1587   : > { %3561 = vmatmul.mubr.msk.f32.vlgmr.msra.gmra.mrb[14].mxu1 %vm6843_vm1, %v3559_v49 }
0x158f   : > { %v3265_v40 = vpop.permute.xlu0 %3264 }
0x165a   : > { %v3336_v58 = vpop.f32.mrb[14].mxu1 }
0x165b   : > { %v3337_v25 = vadd.f32 %v3336_v58, %v3265_v40  ;;  %v3338_v61 = vpop.f32.mrb[15].mxu1 }
0x165c   : > { %v3339_v10 = vadd.f32 %v3338_v61, %v3265_v40 }
0x165d   : > { %v3562_v51 = vmul.f32 -1.442695, %v3337_v25 }
0x165e   : > { %v3563_v9 = vmul.f32 -1.442695, %v3339_v10 }
0x165f   : > { %4112 = vpow2.f32 %v3562_v51 }
0x1660   : > { %4114 = vpow2.f32 %v3563_v9 }
0x1669   : > { %v4113_v48 = vpop.eup %4112 }
0x166a   : > { %v4115_v31 = vpop.eup %4114  ;;  %v3347_v50 = vadd.f32 1.0, %v4113_v48 }
0x166b   : > { %v3348_v15 = vadd.f32 1.0, %v4115_v31 }
0x166c   : > { %4116 = vrcp.f32 %v3347_v50 }
0x166d   : > { %4118 = vrcp.f32 %v3348_v15 }
0x1676   : > { %v4117_v18 = vpop.eup %4116 }
0x1677   : > { %v4119_v2 = vpop.eup %4118  ;;  %v3355_v47 = vrot.slane %v4117_v18, 2 }
0x1678   : > { %v3356_v54 = vrot.slane %v4119_v2, 2 }
0x1679   : > { %v3359_v12 = vsel %vm836_vm8, %v6499_v16, %v3355_v47  ;;  %v3390_v3 = vrot.slane %v3355_v47, 5 }
0x167a   : > { %v3388_v44 = vrot.slane %v3359_v12, 5  ;;  %v3360_v28 = vsel %vm836_vm8, %v6501_v11, %v3356_v54  ;;  %v3392_v63 = vrot.slane %v3356_v54, 5 }
0x167b   : > { %v3389_v32 = vrot.slane %v3360_v28, 5 }
0x167c   : > { %v3391_v27 = vsel %vm374_vm0, %v3388_v44, %v3390_v3  ;;  %v3402_v8 = vsel %vm374_vm0, %v6177_v39, %v3388_v44 }
0x167d   : > { %3410 = vst [vmem:[%s4679_s24 + $0x30] sm:$0xff] %v3402_v8  ;;  %3412 = vst [vmem:[%s4679_s24 + $0x40] sm:$0xf] %v3391_v27  ;;  %v3393_v22 = vsel %vm374_vm0, %v3389_v32, %v3392_v63  ;;  %v3403_v37 = vsel %vm374_vm0, %v6183_v1, %v3389_v32 }
0x167e   : > { %3411 = vst [vmem:[%s4679_s24 + $0x38] sm:$0xff] %v3403_v37  ;;  %3413 = vst [vmem:[%s4679_s24 + $0x48] sm:$0xf] %v3393_v22 }
0x167f PF: > { %s19_s30 = sadd.s32 1, %s4129_s30  }
0x1680   : > { %p16_p4 = scmp.ge.s32.totalorder %s19_s30, 4  }
0x1682   :  { %18 = sbr.rel (!%p16_p4) target bundleno = 1 (0x1), region = 106 }

</bundles_post_ra>
